<compile_context>
chip_gen: v7x
topology: tpu7x:2x2x1
jax: 0.10.0
libtpu: 0.0.40
codegen_flags: <defaults>
</compile_context>

<pallas_src>
import jax
import jax.numpy as jnp
from jax.experimental import pallas as pl
from jax.experimental.pallas import tpu as pltpu


# ------------------------------ LeNet constants ------------------------------
_H = _W = 28      # input spatial (implied: conv3 is 5x5 on a 5x5 map)
_PAD = 2          # conv1 padding
_K = 5            # kernel size of all convs
_H1 = 28          # conv1 output H (= W)
_H2 = 10          # conv2 output H (= W)


# --------------------------------- the kernel --------------------------------
def _lenet_kernel(x_ref, m1_ref, b1_ref, pw1_ref, m2_ref, b2_ref, pw2_ref,
                  m3f_ref, bfin_ref, o_ref):
    f32 = jnp.float32
    B = x_ref.shape[1]                       # batch block (multiple of 8)

    # ---- conv1 + sigmoid --------------------------------------------------
    # Input block is (28, B, 28): H on the leading dim, batch on sublanes,
    # W on lanes.  H padding (pad=2) via a small zero concat; W padding and
    # the kx loop are folded into the banded matrices m1[ky].
    zpad = jnp.zeros((_PAD, B, _W), f32)
    xpad = jnp.concatenate([zpad, x_ref[...], zpad], axis=0)        # (32, B, 28)

    acc = None
    for ky in range(_K):
        lhs = xpad[ky:ky + _H1].reshape(_H1 * B, _W)                # (28B, 28)
        t = jnp.dot(lhs, m1_ref[ky], preferred_element_type=f32)    # (28B, 168)
        acc = t if acc is None else acc + t
    a1 = jax.nn.sigmoid(acc + b1_ref[...])                          # (28B, 168)

    # ---- pool1: 2x2 avg pool (H: aligned pair-sum, W: one matmul) ---------
    a1 = a1.reshape(_H1 // 2, 2, B, a1.shape[-1])
    hsum = a1[:, 0] + a1[:, 1]                                      # (14, B, 168)
    p1 = jnp.dot(hsum.reshape((_H1 // 2) * B, hsum.shape[-1]), pw1_ref[...],
                 preferred_element_type=f32)                        # (14B, 84)
    p1 = p1.reshape(_H1 // 2, B, p1.shape[-1])                      # (14, B, 84)

    # ---- conv2 + sigmoid --------------------------------------------------
    acc = None
    for ky in range(_K):
        lhs = p1[ky:ky + _H2].reshape(_H2 * B, p1.shape[-1])        # (10B, 84)
        t = jnp.dot(lhs, m2_ref[ky], preferred_element_type=f32)    # (10B, 160)
        acc = t if acc is None else acc + t
    a2 = jax.nn.sigmoid(acc + b2_ref[...])                          # (10B, 160)

    # ---- pool2 ------------------------------------------------------------
    a2 = a2.reshape(_H2 // 2, 2, B, a2.shape[-1])
    hsum2 = a2[:, 0] + a2[:, 1]                                     # (5, B, 160)
    p2 = jnp.dot(hsum2.reshape((_H2 // 2) * B, hsum2.shape[-1]), pw2_ref[...],
                 preferred_element_type=f32)                        # (5B, 80)
    p2 = p2.reshape(_H2 // 2, B, p2.shape[-1])                      # (5, B, 80)

    # ---- conv3 + fc2 + fc3 (linear tail fused into m3f / bfin) ------------
    acc = None
    for ky in range(_K):
        t = jnp.dot(p2[ky], m3f_ref[ky], preferred_element_type=f32)  # (B, 10)
        acc = t if acc is None else acc + t
    o_ref[...] = (acc + bfin_ref[...]).astype(o_ref.dtype)            # (B, 10)


# ------------------------- one-time parameter prep ---------------------------
def _banded_conv_mats(w_oikk, pad, w_in):
    """PyTorch conv weight (O, Cin, KH, KW) -> per-ky banded matmul matrices.

    For activations laid out with lanes = w*Cin + c the conv output (same
    layout) is  Y = sum_ky A_padH[ky:ky+Ho, :] @ M[ky],  where M has shape
    (KH, w_in*Cin, wo*O) and folds kx, input channels and W zero-padding.
    """
    o, c, kh, kw = w_oikk.shape
    wo = w_in + 2 * pad - kw + 1
    w = jnp.transpose(w_oikk, (2, 3, 1, 0)).astype(jnp.float32)     # (KH,KW,C,O)
    kx = jnp.arange(w_in)[:, None] - jnp.arange(wo)[None, :] + pad  # (w_in, wo)
    valid = (kx >= 0) & (kx < kw)
    m = jnp.where(valid[None, :, :, None, None],
                  w[:, jnp.clip(kx, 0, kw - 1)], 0.0)     # (KH, w_in, wo, C, O)
    m = jnp.transpose(m, (0, 1, 3, 2, 4)).reshape(kh, w_in * c, wo * o)
    return m, wo


def _pool_w_mat(w, c):
    """Lane-direction half of 2x2 avg pool on layout (.., w*c): Y = A @ pw."""
    sel = (jnp.arange(w)[:, None] // 2 ==
           jnp.arange(w // 2)[None, :]).astype(jnp.float32)         # (w, w/2)
    return jnp.kron(sel, jnp.eye(c, dtype=jnp.float32))             # (w*c, w/2*c)


def prepare_params(p):
    """Run-once conversion of PyTorch-layout params to kernel operands."""
    m1, wo1 = _banded_conv_mats(p['w1'], pad=_PAD, w_in=_W)   # (5, 28, 168)
    m2, wo2 = _banded_conv_mats(p['w2'], pad=0, w_in=14)      # (5, 84, 160)
    m3, _ = _banded_conv_mats(p['w3'], pad=0, w_in=5)         # (5, 80, 120)

    # Fused linear tail: conv3 -> flatten -> fc2 -> fc3 (no activations
    # between them in the reference module, so composition is exact).
    w_tail = p['w_fc2'].T @ p['w_fc3'].T                      # (120, 10)
    m3f = jnp.einsum('kij,jo->kio', m3, w_tail)               # (5, 80, 10)
    b_fin = (p['b3'] @ w_tail
             + p['b_fc2'] @ p['w_fc3'].T
             + p['b_fc3'])                                    # (10,)

    # 2x2/stride-2 avg pooling: the 0.25 factor is folded into the lane
    # pooling matrices; the H direction is a plain pair-sum in-kernel.
    pw1 = _pool_w_mat(28, 6) * 0.25                           # (168, 84)
    pw2 = _pool_w_mat(10, 16) * 0.25                          # (160, 80)

    return dict(
        m1=m1, b1=jnp.tile(p['b1'], wo1)[None, :],
        m2=m2, b2=jnp.tile(p['b2'], wo2)[None, :],
        pw1=pw1, pw2=pw2,
        m3f=m3f, bfin=b_fin[None, :],
    )


# ------------------------------- forward pass --------------------------------
def lenet_forward(x_nchw, kp, *, block_b=64):
    """Fused LeNet forward.  block_b = images per grid step (sweep 32-128)."""
    n, cin, h, w = x_nchw.shape
    assert (cin, h, w) == (1, _H, _W)

    # Batch block: multiple of 8 (free, tile-aligned reshapes on sublanes).
    bb = max(8, ((min(block_b, n) + 7) // 8) * 8)
    npad = pl.cdiv(n, bb) * bb

    x = x_nchw.reshape(n, _H, _W)
    if npad != n:
        x = jnp.concatenate(
            [x, jnp.zeros((npad - n, _H, _W), x.dtype)], axis=0)
    # (H, N, W): batch on sublanes so every per-ky conv slice inside the
    # kernel is a tile-aligned leading-dim view.  One cheap XLA transpose of
    # the (small) input per call; weights/activations never round-trip HBM.
    x_hbw = jnp.transpose(x, (1, 0, 2))                       # (28, npad, 28)

    weights = (kp['m1'], kp['b1'], kp['pw1'],
               kp['m2'], kp['b2'], kp['pw2'],
               kp['m3f'], kp['bfin'])

    def const_spec(a):
        # Whole (small) array resident in VMEM, same block for every step.
        return pl.BlockSpec(a.shape, lambda i, _nd=a.ndim: (0,) * _nd)

    out = pl.pallas_call(
        _lenet_kernel,
        out_shape=jax.ShapeDtypeStruct((npad, 10), jnp.float32),
        grid=(npad // bb,),
        in_specs=[pl.BlockSpec((_H, bb, _W), lambda i: (0, i, 0))]
                + [const_spec(a) for a in weights],
        out_specs=pl.BlockSpec((bb, 10), lambda i: (i, 0)),
        compiler_params=pltpu.CompilerParams(
            dimension_semantics=("parallel",)),               # 2 TCs on v7x
    )(x_hbw, *weights)
    return out[:n]


# --------------------------- plain-JAX reference -----------------------------
def _ref_conv(x, w_oikk, b, padding):
    y = jax.lax.conv_general_dilated(
        x, jnp.transpose(w_oikk, (2, 3, 1, 0)),
        window_strides=(1, 1),
        padding=[(padding, padding), (padding, padding)],
        dimension_numbers=('NHWC', 'HWIO', 'NHWC'))
    return y + b.reshape(1, 1, 1, -1)


def _ref_pool(x):
    n, h, w, c = x.shape
    return x.reshape(n, h // 2, 2, w // 2, 2, c).mean(axis=(2, 4))


def ref_forward(x_nchw, p):
    x = jnp.transpose(x_nchw, (0, 2, 3, 1))
    x = jax.nn.sigmoid(_ref_conv(x, p['w1'], p['b1'], 2))
    x = _ref_pool(x)
    x = jax.nn.sigmoid(_ref_conv(x, p['w2'], p['b2'], 0))
    x = _ref_pool(x)
    x = _ref_conv(x, p['w3'], p['b3'], 0)
    x = x.reshape(x.shape[0], -1)
    x = x @ p['w_fc2'].T + p['b_fc2']
    x = x @ p['w_fc3'].T + p['b_fc3']
    return x


# ---------------------------------- params -----------------------------------
def init_params(key):
    def uni(k, shape, fan_in):
        bound = 1.0 / jnp.sqrt(fan_in)
        return jax.random.uniform(k, shape, jnp.float32, -bound, bound)

    ks = jax.random.split(key, 10)
    return {
        'w1': uni(ks[0], (6, 1, 5, 5), 1 * 5 * 5),      # conv1
        'b1': uni(ks[1], (6,), 1 * 5 * 5),
        'w2': uni(ks[2], (16, 6, 5, 5), 6 * 5 * 5),     # conv2
        'b2': uni(ks[3], (16,), 6 * 5 * 5),
        'w3': uni(ks[4], (120, 16, 5, 5), 16 * 5 * 5),  # conv3
        'b3': uni(ks[5], (120,), 16 * 5 * 5),
        'w_fc2': uni(ks[6], (84, 120), 120),            # fc2 (out, in)
        'b_fc2': uni(ks[7], (84,), 120),
        'w_fc3': uni(ks[8], (10, 84), 84),              # fc3 (out, in)
        'b_fc3': uni(ks[9], (10,), 84),
    }


if __name__ == "__main__":
    root = jax.random.PRNGKey(0)
    k_x, k_p = jax.random.split(root)
    # LeNet's architecture (conv3 is 5x5 on a 5x5 map) implies 28x28 input.
    # Small demo batch; block_b=8 -> 2 grid steps (exercises batch padding,
    # the batch-blocked grid and megacore sharding on v7x).
    x = jax.random.normal(k_x, (10, 1, 28, 28), jnp.float32)
    params = init_params(k_p)
    kparams = prepare_params(params)          # one-time weight prep (hoisted)

    fwd = jax.jit(lambda xx, pp: lenet_forward(xx, pp, block_b=8))
    out = jax.block_until_ready(fwd(x, kparams))
    ref = jax.block_until_ready(ref_forward(x, params))

    assert out.shape == (10, 10), out.shape
    err = jnp.max(jnp.abs(out - ref))
    assert jnp.allclose(out, ref, atol=2e-4, rtol=2e-4), f"max abs err {err}"
    print("KERNEL_OK")
</pallas_src>

<mosaic_0001>
module attributes {stable_mosaic.version = 11 : i64} {
  func.func @_lenet_kernel(%arg0: i32, %arg1: memref<28x8x28xf32, #tpu.memory_space<vmem>>, %arg2: memref<5x28x168xf32, #tpu.memory_space<vmem>>, %arg3: memref<1x168xf32, #tpu.memory_space<vmem>>, %arg4: memref<168x84xf32, #tpu.memory_space<vmem>>, %arg5: memref<5x84x160xf32, #tpu.memory_space<vmem>>, %arg6: memref<1x160xf32, #tpu.memory_space<vmem>>, %arg7: memref<160x80xf32, #tpu.memory_space<vmem>>, %arg8: memref<5x80x10xf32, #tpu.memory_space<vmem>>, %arg9: memref<1x10xf32, #tpu.memory_space<vmem>>, %arg10: memref<8x10xf32, #tpu.memory_space<vmem>>) attributes {dimension_semantics = [#tpu.dimension_semantics<parallel>], iteration_bounds = array<i64: 2>, scalar_prefetch = 0 : i64, scratch_operands = 0 : i64, tpu.core_type = #tpu.core_type<tc>, window_params = [{transform_indices = @transform_0, window_bounds = array<i64: 28, 8, 28>}, {pipeline_mode = #tpu.pipeline_mode<synchronous>, transform_indices = @transform_1, window_bounds = array<i64: 5, 28, 168>}, {pipeline_mode = #tpu.pipeline_mode<synchronous>, transform_indices = @transform_2, window_bounds = array<i64: 1, 168>}, {pipeline_mode = #tpu.pipeline_mode<synchronous>, transform_indices = @transform_3, window_bounds = array<i64: 168, 84>}, {pipeline_mode = #tpu.pipeline_mode<synchronous>, transform_indices = @transform_4, window_bounds = array<i64: 5, 84, 160>}, {pipeline_mode = #tpu.pipeline_mode<synchronous>, transform_indices = @transform_5, window_bounds = array<i64: 1, 160>}, {pipeline_mode = #tpu.pipeline_mode<synchronous>, transform_indices = @transform_6, window_bounds = array<i64: 160, 80>}, {pipeline_mode = #tpu.pipeline_mode<synchronous>, transform_indices = @transform_7, window_bounds = array<i64: 5, 80, 10>}, {pipeline_mode = #tpu.pipeline_mode<synchronous>, transform_indices = @transform_8, window_bounds = array<i64: 1, 10>}, {transform_indices = @transform_9, window_bounds = array<i64: 8, 10>}]} {
    %cst = arith.constant 0.000000e+00 : f32
    %0 = vector.broadcast %cst : f32 to vector<2x8x28xf32>
    %c0 = arith.constant 0 : index
    %c0_0 = arith.constant 0 : index
    %c0_1 = arith.constant 0 : index
    %1 = vector.load %arg1[%c0, %c0_0, %c0_1] : memref<28x8x28xf32, #tpu.memory_space<vmem>>, vector<28x8x28xf32>
    %2 = tpu.concatenate %0, %1, %0 in 0 : vector<2x8x28xf32>, vector<28x8x28xf32>, vector<2x8x28xf32> -> vector<32x8x28xf32>
    %3 = vector.extract_strided_slice %2 {offsets = [0, 0, 0], sizes = [28, 8, 28], strides = [1, 1, 1]} : vector<32x8x28xf32> to vector<28x8x28xf32>
    %4 = vector.shape_cast %3 : vector<28x8x28xf32> to vector<224x28xf32>
    %c0_2 = arith.constant 0 : index
    %c0_3 = arith.constant 0 : index
    %c0_4 = arith.constant 0 : index
    %5 = vector.load %arg2[%c0_2, %c0_3, %c0_4] : memref<5x28x168xf32, #tpu.memory_space<vmem>>, vector<1x28x168xf32>
    %6 = vector.shape_cast %5 : vector<1x28x168xf32> to vector<28x168xf32>
    %cst_5 = arith.constant dense<0.000000e+00> : vector<224x168xf32>
    %7 = tpu.matmul %4, %6, %cst_5 {dimension_numbers = #tpu.dot_dimension_numbers<[1], [0], [0], [1], [0, 0, 1, 1], [], []>} : vector<224x28xf32>, vector<28x168xf32>, vector<224x168xf32> -> vector<224x168xf32>
    %8 = vector.extract_strided_slice %2 {offsets = [1, 0, 0], sizes = [28, 8, 28], strides = [1, 1, 1]} : vector<32x8x28xf32> to vector<28x8x28xf32>
    %9 = vector.shape_cast %8 : vector<28x8x28xf32> to vector<224x28xf32>
    %c1 = arith.constant 1 : index
    %c0_6 = arith.constant 0 : index
    %c0_7 = arith.constant 0 : index
    %10 = vector.load %arg2[%c1, %c0_6, %c0_7] : memref<5x28x168xf32, #tpu.memory_space<vmem>>, vector<1x28x168xf32>
    %11 = vector.shape_cast %10 : vector<1x28x168xf32> to vector<28x168xf32>
    %cst_8 = arith.constant dense<0.000000e+00> : vector<224x168xf32>
    %12 = tpu.matmul %9, %11, %cst_8 {dimension_numbers = #tpu.dot_dimension_numbers<[1], [0], [0], [1], [0, 0, 1, 1], [], []>} : vector<224x28xf32>, vector<28x168xf32>, vector<224x168xf32> -> vector<224x168xf32>
    %13 = arith.addf %7, %12 : vector<224x168xf32>
    %14 = vector.extract_strided_slice %2 {offsets = [2, 0, 0], sizes = [28, 8, 28], strides = [1, 1, 1]} : vector<32x8x28xf32> to vector<28x8x28xf32>
    %15 = vector.shape_cast %14 : vector<28x8x28xf32> to vector<224x28xf32>
    %c2 = arith.constant 2 : index
    %c0_9 = arith.constant 0 : index
    %c0_10 = arith.constant 0 : index
    %16 = vector.load %arg2[%c2, %c0_9, %c0_10] : memref<5x28x168xf32, #tpu.memory_space<vmem>>, vector<1x28x168xf32>
    %17 = vector.shape_cast %16 : vector<1x28x168xf32> to vector<28x168xf32>
    %cst_11 = arith.constant dense<0.000000e+00> : vector<224x168xf32>
    %18 = tpu.matmul %15, %17, %cst_11 {dimension_numbers = #tpu.dot_dimension_numbers<[1], [0], [0], [1], [0, 0, 1, 1], [], []>} : vector<224x28xf32>, vector<28x168xf32>, vector<224x168xf32> -> vector<224x168xf32>
    %19 = arith.addf %13, %18 : vector<224x168xf32>
    %20 = vector.extract_strided_slice %2 {offsets = [3, 0, 0], sizes = [28, 8, 28], strides = [1, 1, 1]} : vector<32x8x28xf32> to vector<28x8x28xf32>
    %21 = vector.shape_cast %20 : vector<28x8x28xf32> to vector<224x28xf32>
    %c3 = arith.constant 3 : index
    %c0_12 = arith.constant 0 : index
    %c0_13 = arith.constant 0 : index
    %22 = vector.load %arg2[%c3, %c0_12, %c0_13] : memref<5x28x168xf32, #tpu.memory_space<vmem>>, vector<1x28x168xf32>
    %23 = vector.shape_cast %22 : vector<1x28x168xf32> to vector<28x168xf32>
    %cst_14 = arith.constant dense<0.000000e+00> : vector<224x168xf32>
    %24 = tpu.matmul %21, %23, %cst_14 {dimension_numbers = #tpu.dot_dimension_numbers<[1], [0], [0], [1], [0, 0, 1, 1], [], []>} : vector<224x28xf32>, vector<28x168xf32>, vector<224x168xf32> -> vector<224x168xf32>
    %25 = arith.addf %19, %24 : vector<224x168xf32>
    %26 = vector.extract_strided_slice %2 {offsets = [4, 0, 0], sizes = [28, 8, 28], strides = [1, 1, 1]} : vector<32x8x28xf32> to vector<28x8x28xf32>
    %27 = vector.shape_cast %26 : vector<28x8x28xf32> to vector<224x28xf32>
    %c4 = arith.constant 4 : index
    %c0_15 = arith.constant 0 : index
    %c0_16 = arith.constant 0 : index
    %28 = vector.load %arg2[%c4, %c0_15, %c0_16] : memref<5x28x168xf32, #tpu.memory_space<vmem>>, vector<1x28x168xf32>
    %29 = vector.shape_cast %28 : vector<1x28x168xf32> to vector<28x168xf32>
    %cst_17 = arith.constant dense<0.000000e+00> : vector<224x168xf32>
    %30 = tpu.matmul %27, %29, %cst_17 {dimension_numbers = #tpu.dot_dimension_numbers<[1], [0], [0], [1], [0, 0, 1, 1], [], []>} : vector<224x28xf32>, vector<28x168xf32>, vector<224x168xf32> -> vector<224x168xf32>
    %31 = arith.addf %25, %30 : vector<224x168xf32>
    %c0_18 = arith.constant 0 : index
    %c0_19 = arith.constant 0 : index
    %32 = vector.load %arg3[%c0_18, %c0_19] : memref<1x168xf32, #tpu.memory_space<vmem>>, vector<1x168xf32>
    %33 = vector.broadcast %32 : vector<1x168xf32> to vector<224x168xf32>
    %34 = arith.addf %31, %33 : vector<224x168xf32>
    %35 = arith.negf %34 : vector<224x168xf32>
    %36 = math.exp %35 : vector<224x168xf32>
    %cst_20 = arith.constant 1.000000e+00 : f32
    %37 = vector.broadcast %cst_20 : f32 to vector<224x168xf32>
    %38 = arith.addf %37, %36 : vector<224x168xf32>
    %39 = arith.divf %37, %38 : vector<224x168xf32>
    %40 = vector.shape_cast %39 : vector<224x168xf32> to vector<14x2x8x168xf32>
    %41 = vector.extract_strided_slice %40 {offsets = [0, 0, 0, 0], sizes = [14, 1, 8, 168], strides = [1, 1, 1, 1]} : vector<14x2x8x168xf32> to vector<14x1x8x168xf32>
    %42 = vector.shape_cast %41 : vector<14x1x8x168xf32> to vector<14x8x168xf32>
    %43 = vector.extract_strided_slice %40 {offsets = [0, 1, 0, 0], sizes = [14, 1, 8, 168], strides = [1, 1, 1, 1]} : vector<14x2x8x168xf32> to vector<14x1x8x168xf32>
    %44 = vector.shape_cast %43 : vector<14x1x8x168xf32> to vector<14x8x168xf32>
    %45 = arith.addf %42, %44 : vector<14x8x168xf32>
    %46 = vector.shape_cast %45 : vector<14x8x168xf32> to vector<112x168xf32>
    %c0_21 = arith.constant 0 : index
    %c0_22 = arith.constant 0 : index
    %47 = vector.load %arg4[%c0_21, %c0_22] : memref<168x84xf32, #tpu.memory_space<vmem>>, vector<168x84xf32>
    %cst_23 = arith.constant dense<0.000000e+00> : vector<112x84xf32>
    %48 = tpu.matmul %46, %47, %cst_23 {dimension_numbers = #tpu.dot_dimension_numbers<[1], [0], [0], [1], [0, 0, 1, 1], [], []>} : vector<112x168xf32>, vector<168x84xf32>, vector<112x84xf32> -> vector<112x84xf32>
    %49 = vector.shape_cast %48 : vector<112x84xf32> to vector<14x8x84xf32>
    %50 = vector.extract_strided_slice %49 {offsets = [0, 0, 0], sizes = [10, 8, 84], strides = [1, 1, 1]} : vector<14x8x84xf32> to vector<10x8x84xf32>
    %51 = vector.shape_cast %50 : vector<10x8x84xf32> to vector<80x84xf32>
    %c0_24 = arith.constant 0 : index
    %c0_25 = arith.constant 0 : index
    %c0_26 = arith.constant 0 : index
    %52 = vector.load %arg5[%c0_24, %c0_25, %c0_26] : memref<5x84x160xf32, #tpu.memory_space<vmem>>, vector<1x84x160xf32>
    %53 = vector.shape_cast %52 : vector<1x84x160xf32> to vector<84x160xf32>
    %cst_27 = arith.constant dense<0.000000e+00> : vector<80x160xf32>
    %54 = tpu.matmul %51, %53, %cst_27 {dimension_numbers = #tpu.dot_dimension_numbers<[1], [0], [0], [1], [0, 0, 1, 1], [], []>} : vector<80x84xf32>, vector<84x160xf32>, vector<80x160xf32> -> vector<80x160xf32>
    %55 = vector.extract_strided_slice %49 {offsets = [1, 0, 0], sizes = [10, 8, 84], strides = [1, 1, 1]} : vector<14x8x84xf32> to vector<10x8x84xf32>
    %56 = vector.shape_cast %55 : vector<10x8x84xf32> to vector<80x84xf32>
    %c1_28 = arith.constant 1 : index
    %c0_29 = arith.constant 0 : index
    %c0_30 = arith.constant 0 : index
    %57 = vector.load %arg5[%c1_28, %c0_29, %c0_30] : memref<5x84x160xf32, #tpu.memory_space<vmem>>, vector<1x84x160xf32>
    %58 = vector.shape_cast %57 : vector<1x84x160xf32> to vector<84x160xf32>
    %cst_31 = arith.constant dense<0.000000e+00> : vector<80x160xf32>
    %59 = tpu.matmul %56, %58, %cst_31 {dimension_numbers = #tpu.dot_dimension_numbers<[1], [0], [0], [1], [0, 0, 1, 1], [], []>} : vector<80x84xf32>, vector<84x160xf32>, vector<80x160xf32> -> vector<80x160xf32>
    %60 = arith.addf %54, %59 : vector<80x160xf32>
    %61 = vector.extract_strided_slice %49 {offsets = [2, 0, 0], sizes = [10, 8, 84], strides = [1, 1, 1]} : vector<14x8x84xf32> to vector<10x8x84xf32>
    %62 = vector.shape_cast %61 : vector<10x8x84xf32> to vector<80x84xf32>
    %c2_32 = arith.constant 2 : index
    %c0_33 = arith.constant 0 : index
    %c0_34 = arith.constant 0 : index
    %63 = vector.load %arg5[%c2_32, %c0_33, %c0_34] : memref<5x84x160xf32, #tpu.memory_space<vmem>>, vector<1x84x160xf32>
    %64 = vector.shape_cast %63 : vector<1x84x160xf32> to vector<84x160xf32>
    %cst_35 = arith.constant dense<0.000000e+00> : vector<80x160xf32>
    %65 = tpu.matmul %62, %64, %cst_35 {dimension_numbers = #tpu.dot_dimension_numbers<[1], [0], [0], [1], [0, 0, 1, 1], [], []>} : vector<80x84xf32>, vector<84x160xf32>, vector<80x160xf32> -> vector<80x160xf32>
    %66 = arith.addf %60, %65 : vector<80x160xf32>
    %67 = vector.extract_strided_slice %49 {offsets = [3, 0, 0], sizes = [10, 8, 84], strides = [1, 1, 1]} : vector<14x8x84xf32> to vector<10x8x84xf32>
    %68 = vector.shape_cast %67 : vector<10x8x84xf32> to vector<80x84xf32>
    %c3_36 = arith.constant 3 : index
    %c0_37 = arith.constant 0 : index
    %c0_38 = arith.constant 0 : index
    %69 = vector.load %arg5[%c3_36, %c0_37, %c0_38] : memref<5x84x160xf32, #tpu.memory_space<vmem>>, vector<1x84x160xf32>
    %70 = vector.shape_cast %69 : vector<1x84x160xf32> to vector<84x160xf32>
    %cst_39 = arith.constant dense<0.000000e+00> : vector<80x160xf32>
    %71 = tpu.matmul %68, %70, %cst_39 {dimension_numbers = #tpu.dot_dimension_numbers<[1], [0], [0], [1], [0, 0, 1, 1], [], []>} : vector<80x84xf32>, vector<84x160xf32>, vector<80x160xf32> -> vector<80x160xf32>
    %72 = arith.addf %66, %71 : vector<80x160xf32>
    %73 = vector.extract_strided_slice %49 {offsets = [4, 0, 0], sizes = [10, 8, 84], strides = [1, 1, 1]} : vector<14x8x84xf32> to vector<10x8x84xf32>
    %74 = vector.shape_cast %73 : vector<10x8x84xf32> to vector<80x84xf32>
    %c4_40 = arith.constant 4 : index
    %c0_41 = arith.constant 0 : index
    %c0_42 = arith.constant 0 : index
    %75 = vector.load %arg5[%c4_40, %c0_41, %c0_42] : memref<5x84x160xf32, #tpu.memory_space<vmem>>, vector<1x84x160xf32>
    %76 = vector.shape_cast %75 : vector<1x84x160xf32> to vector<84x160xf32>
    %cst_43 = arith.constant dense<0.000000e+00> : vector<80x160xf32>
    %77 = tpu.matmul %74, %76, %cst_43 {dimension_numbers = #tpu.dot_dimension_numbers<[1], [0], [0], [1], [0, 0, 1, 1], [], []>} : vector<80x84xf32>, vector<84x160xf32>, vector<80x160xf32> -> vector<80x160xf32>
    %78 = arith.addf %72, %77 : vector<80x160xf32>
    %c0_44 = arith.constant 0 : index
    %c0_45 = arith.constant 0 : index
    %79 = vector.load %arg6[%c0_44, %c0_45] : memref<1x160xf32, #tpu.memory_space<vmem>>, vector<1x160xf32>
    %80 = vector.broadcast %79 : vector<1x160xf32> to vector<80x160xf32>
    %81 = arith.addf %78, %80 : vector<80x160xf32>
    %82 = arith.negf %81 : vector<80x160xf32>
    %83 = math.exp %82 : vector<80x160xf32>
    %cst_46 = arith.constant 1.000000e+00 : f32
    %84 = vector.broadcast %cst_46 : f32 to vector<80x160xf32>
    %85 = arith.addf %84, %83 : vector<80x160xf32>
    %86 = arith.divf %84, %85 : vector<80x160xf32>
    %87 = vector.shape_cast %86 : vector<80x160xf32> to vector<5x2x8x160xf32>
    %88 = vector.extract_strided_slice %87 {offsets = [0, 0, 0, 0], sizes = [5, 1, 8, 160], strides = [1, 1, 1, 1]} : vector<5x2x8x160xf32> to vector<5x1x8x160xf32>
    %89 = vector.shape_cast %88 : vector<5x1x8x160xf32> to vector<5x8x160xf32>
    %90 = vector.extract_strided_slice %87 {offsets = [0, 1, 0, 0], sizes = [5, 1, 8, 160], strides = [1, 1, 1, 1]} : vector<5x2x8x160xf32> to vector<5x1x8x160xf32>
    %91 = vector.shape_cast %90 : vector<5x1x8x160xf32> to vector<5x8x160xf32>
    %92 = arith.addf %89, %91 : vector<5x8x160xf32>
    %93 = vector.shape_cast %92 : vector<5x8x160xf32> to vector<40x160xf32>
    %c0_47 = arith.constant 0 : index
    %c0_48 = arith.constant 0 : index
    %94 = vector.load %arg7[%c0_47, %c0_48] : memref<160x80xf32, #tpu.memory_space<vmem>>, vector<160x80xf32>
    %cst_49 = arith.constant dense<0.000000e+00> : vector<40x80xf32>
    %95 = tpu.matmul %93, %94, %cst_49 {dimension_numbers = #tpu.dot_dimension_numbers<[1], [0], [0], [1], [0, 0, 1, 1], [], []>} : vector<40x160xf32>, vector<160x80xf32>, vector<40x80xf32> -> vector<40x80xf32>
    %96 = vector.shape_cast %95 : vector<40x80xf32> to vector<5x8x80xf32>
    %97 = vector.extract_strided_slice %96 {offsets = [0, 0, 0], sizes = [1, 8, 80], strides = [1, 1, 1]} : vector<5x8x80xf32> to vector<1x8x80xf32>
    %98 = vector.shape_cast %97 : vector<1x8x80xf32> to vector<8x80xf32>
    %c0_50 = arith.constant 0 : index
    %c0_51 = arith.constant 0 : index
    %c0_52 = arith.constant 0 : index
    %99 = vector.load %arg8[%c0_50, %c0_51, %c0_52] : memref<5x80x10xf32, #tpu.memory_space<vmem>>, vector<1x80x10xf32>
    %100 = vector.shape_cast %99 : vector<1x80x10xf32> to vector<80x10xf32>
    %cst_53 = arith.constant dense<0.000000e+00> : vector<8x10xf32>
    %101 = tpu.matmul %98, %100, %cst_53 {dimension_numbers = #tpu.dot_dimension_numbers<[1], [0], [0], [1], [0, 0, 1, 1], [], []>} : vector<8x80xf32>, vector<80x10xf32>, vector<8x10xf32> -> vector<8x10xf32>
    %102 = vector.extract_strided_slice %96 {offsets = [1, 0, 0], sizes = [1, 8, 80], strides = [1, 1, 1]} : vector<5x8x80xf32> to vector<1x8x80xf32>
    %103 = vector.shape_cast %102 : vector<1x8x80xf32> to vector<8x80xf32>
    %c1_54 = arith.constant 1 : index
    %c0_55 = arith.constant 0 : index
    %c0_56 = arith.constant 0 : index
    %104 = vector.load %arg8[%c1_54, %c0_55, %c0_56] : memref<5x80x10xf32, #tpu.memory_space<vmem>>, vector<1x80x10xf32>
    %105 = vector.shape_cast %104 : vector<1x80x10xf32> to vector<80x10xf32>
    %cst_57 = arith.constant dense<0.000000e+00> : vector<8x10xf32>
    %106 = tpu.matmul %103, %105, %cst_57 {dimension_numbers = #tpu.dot_dimension_numbers<[1], [0], [0], [1], [0, 0, 1, 1], [], []>} : vector<8x80xf32>, vector<80x10xf32>, vector<8x10xf32> -> vector<8x10xf32>
    %107 = arith.addf %101, %106 : vector<8x10xf32>
    %108 = vector.extract_strided_slice %96 {offsets = [2, 0, 0], sizes = [1, 8, 80], strides = [1, 1, 1]} : vector<5x8x80xf32> to vector<1x8x80xf32>
    %109 = vector.shape_cast %108 : vector<1x8x80xf32> to vector<8x80xf32>
    %c2_58 = arith.constant 2 : index
    %c0_59 = arith.constant 0 : index
    %c0_60 = arith.constant 0 : index
    %110 = vector.load %arg8[%c2_58, %c0_59, %c0_60] : memref<5x80x10xf32, #tpu.memory_space<vmem>>, vector<1x80x10xf32>
    %111 = vector.shape_cast %110 : vector<1x80x10xf32> to vector<80x10xf32>
    %cst_61 = arith.constant dense<0.000000e+00> : vector<8x10xf32>
    %112 = tpu.matmul %109, %111, %cst_61 {dimension_numbers = #tpu.dot_dimension_numbers<[1], [0], [0], [1], [0, 0, 1, 1], [], []>} : vector<8x80xf32>, vector<80x10xf32>, vector<8x10xf32> -> vector<8x10xf32>
    %113 = arith.addf %107, %112 : vector<8x10xf32>
    %114 = vector.extract_strided_slice %96 {offsets = [3, 0, 0], sizes = [1, 8, 80], strides = [1, 1, 1]} : vector<5x8x80xf32> to vector<1x8x80xf32>
    %115 = vector.shape_cast %114 : vector<1x8x80xf32> to vector<8x80xf32>
    %c3_62 = arith.constant 3 : index
    %c0_63 = arith.constant 0 : index
    %c0_64 = arith.constant 0 : index
    %116 = vector.load %arg8[%c3_62, %c0_63, %c0_64] : memref<5x80x10xf32, #tpu.memory_space<vmem>>, vector<1x80x10xf32>
    %117 = vector.shape_cast %116 : vector<1x80x10xf32> to vector<80x10xf32>
    %cst_65 = arith.constant dense<0.000000e+00> : vector<8x10xf32>
    %118 = tpu.matmul %115, %117, %cst_65 {dimension_numbers = #tpu.dot_dimension_numbers<[1], [0], [0], [1], [0, 0, 1, 1], [], []>} : vector<8x80xf32>, vector<80x10xf32>, vector<8x10xf32> -> vector<8x10xf32>
    %119 = arith.addf %113, %118 : vector<8x10xf32>
    %120 = vector.extract_strided_slice %96 {offsets = [4, 0, 0], sizes = [1, 8, 80], strides = [1, 1, 1]} : vector<5x8x80xf32> to vector<1x8x80xf32>
    %121 = vector.shape_cast %120 : vector<1x8x80xf32> to vector<8x80xf32>
    %c4_66 = arith.constant 4 : index
    %c0_67 = arith.constant 0 : index
    %c0_68 = arith.constant 0 : index
    %122 = vector.load %arg8[%c4_66, %c0_67, %c0_68] : memref<5x80x10xf32, #tpu.memory_space<vmem>>, vector<1x80x10xf32>
    %123 = vector.shape_cast %122 : vector<1x80x10xf32> to vector<80x10xf32>
    %cst_69 = arith.constant dense<0.000000e+00> : vector<8x10xf32>
    %124 = tpu.matmul %121, %123, %cst_69 {dimension_numbers = #tpu.dot_dimension_numbers<[1], [0], [0], [1], [0, 0, 1, 1], [], []>} : vector<8x80xf32>, vector<80x10xf32>, vector<8x10xf32> -> vector<8x10xf32>
    %125 = arith.addf %119, %124 : vector<8x10xf32>
    %c0_70 = arith.constant 0 : index
    %c0_71 = arith.constant 0 : index
    %126 = vector.load %arg9[%c0_70, %c0_71] : memref<1x10xf32, #tpu.memory_space<vmem>>, vector<1x10xf32>
    %127 = vector.broadcast %126 : vector<1x10xf32> to vector<8x10xf32>
    %128 = arith.addf %125, %127 : vector<8x10xf32>
    %c0_72 = arith.constant 0 : index
    %c0_73 = arith.constant 0 : index
    %129 = vector.load %arg10[%c0_72, %c0_73] : memref<8x10xf32, #tpu.memory_space<vmem>>, vector<8x10xf32>
    tpu.vector_store %arg10[%c0_72, %c0_73], %128 {strides = array<i32>} : memref<8x10xf32, #tpu.memory_space<vmem>>, vector<8x10xf32>,
    return
  }
  func.func @transform_0(%arg0: i32) -> (i32, i32, i32) {
    %c0_i32 = arith.constant 0 : i32
    %c0_i32_0 = arith.constant 0 : i32
    %c0_i32_1 = arith.constant 0 : i32
    return %c0_i32, %arg0, %c0_i32_0 : i32, i32, i32
  }
  func.func @transform_1(%arg0: i32) -> (i32, i32, i32) {
    %c0_i32 = arith.constant 0 : i32
    %c0_i32_0 = arith.constant 0 : i32
    %c0_i32_1 = arith.constant 0 : i32
    %c0_i32_2 = arith.constant 0 : i32
    return %c0_i32, %c0_i32_0, %c0_i32_1 : i32, i32, i32
  }
  func.func @transform_2(%arg0: i32) -> (i32, i32) {
    %c0_i32 = arith.constant 0 : i32
    %c0_i32_0 = arith.constant 0 : i32
    %c0_i32_1 = arith.constant 0 : i32
    return %c0_i32, %c0_i32_0 : i32, i32
  }
  func.func @transform_3(%arg0: i32) -> (i32, i32) {
    %c0_i32 = arith.constant 0 : i32
    %c0_i32_0 = arith.constant 0 : i32
    %c0_i32_1 = arith.constant 0 : i32
    return %c0_i32, %c0_i32_0 : i32, i32
  }
  func.func @transform_4(%arg0: i32) -> (i32, i32, i32) {
    %c0_i32 = arith.constant 0 : i32
    %c0_i32_0 = arith.constant 0 : i32
    %c0_i32_1 = arith.constant 0 : i32
    %c0_i32_2 = arith.constant 0 : i32
    return %c0_i32, %c0_i32_0, %c0_i32_1 : i32, i32, i32
  }
  func.func @transform_5(%arg0: i32) -> (i32, i32) {
    %c0_i32 = arith.constant 0 : i32
    %c0_i32_0 = arith.constant 0 : i32
    %c0_i32_1 = arith.constant 0 : i32
    return %c0_i32, %c0_i32_0 : i32, i32
  }
  func.func @transform_6(%arg0: i32) -> (i32, i32) {
    %c0_i32 = arith.constant 0 : i32
    %c0_i32_0 = arith.constant 0 : i32
    %c0_i32_1 = arith.constant 0 : i32
    return %c0_i32, %c0_i32_0 : i32, i32
  }
  func.func @transform_7(%arg0: i32) -> (i32, i32, i32) {
    %c0_i32 = arith.constant 0 : i32
    %c0_i32_0 = arith.constant 0 : i32
    %c0_i32_1 = arith.constant 0 : i32
    %c0_i32_2 = arith.constant 0 : i32
    return %c0_i32, %c0_i32_0, %c0_i32_1 : i32, i32, i32
  }
  func.func @transform_8(%arg0: i32) -> (i32, i32) {
    %c0_i32 = arith.constant 0 : i32
    %c0_i32_0 = arith.constant 0 : i32
    %c0_i32_1 = arith.constant 0 : i32
    return %c0_i32, %c0_i32_0 : i32, i32
  }
  func.func @transform_9(%arg0: i32) -> (i32, i32) {
    %c0_i32 = arith.constant 0 : i32
    %c0_i32_0 = arith.constant 0 : i32
    return %arg0, %c0_i32 : i32, i32
  }
}

</mosaic_0001>

<bundles_post_ra>
// kernel: _lambda_.1
= control target key start
LH: loop header
LB: loop body
LE: loop exit
PB: predicated region body
PF: predicated region fallthrough
CT: control target
= control target key end

     0   :  { %14 = vsyncpa [#allocation4], 0  ;;  %s7957_s0 = inlined_call_operand.vmem [shape: f32[28,16,28], index: 0, kind: input, shape index: {}]   ;;  %s7958_s1 = inlined_call_operand.vmem [shape: f32[5,28,168], index: 1, kind: input, shape index: {}]   ;;  %s7959_s2 = inlined_call_operand.vmem [shape: f32[1,168], index: 2, kind: input, shape index: {}]   ;;  %s7960_s3 = inlined_call_operand.vmem [shape: f32[168,84], index: 3, kind: input, shape index: {}]   ;;  %s7961_s4 = inlined_call_operand.vmem [shape: f32[5,84,160], index: 4, kind: input, shape index: {}]   ;;  %s7962_s5 = inlined_call_operand.vmem [shape: f32[1,160], index: 5, kind: input, shape index: {}]   ;;  %s7963_s6 = inlined_call_operand.vmem [shape: f32[160,80], index: 6, kind: input, shape index: {}]   ;;  %s7964_s7 = inlined_call_operand.vmem [shape: f32[5,80,10], index: 7, kind: input, shape index: {}]   ;;  %s7965_s8 = inlined_call_operand.vmem [shape: f32[1,10], index: 8, kind: input, shape index: {}]   ;;  %s7966_s9 = inlined_call_operand.hbm [shape: f32[16,10], index: 9, kind: output, shape index: {}]  }
   0x1   :  { %16 = vsyncpa [#allocation4 + $0x1], 0  ;;  %s6006_s30 = smov 0   ;;  %s6008_s10 = smov 0  }
   0x2   :  { %s6010_s11 = smov 0   ;;  %s6012_s12 = smov 0  }
   0x3 LB: > { %s4299_s13 = sadd.s32 4294967295, %s5949_s12   ;;  %s4300_s14 = sadd.s32 4294967294, %s5949_s12   ;;  %s5949_s12 = sphi %s6012_s12, %s7996_s12   ;;  %s5945_s11 = sphi %s6010_s11, %s7995_s11   ;;  %s5941_s10 = sphi %s6008_s10, %s7994_s10   ;;  %s5937_s30 = sphi %s6006_s30, %s7993_s30  }
   0x4   : > { %s6029_s15 = sadd.s32 1, %s5949_s12   ;;  %s29_s16 = sadd.s32 1, %s5945_s11 }
   0x5   : > { %s26_s17 = ssub.s32 %s5949_s12, %s6029_s15  ;;  %p36_p0 = scmp.ne.s32.totalorder %s5945_s11, %s5941_s10 }
   0x6   : > { %p27_p1 = scmp.eq.s32.totalorder %s26_s17, 0  ;;  %p37_p2 = scmp.eq.s32.totalorder %s5949_s12, 0 }
   0x7   : > { %p234_p3 = scmp.eq.s32.totalorder %s4299_s13, 1  ;;  %p239_p4 = scmp.ne.s32.totalorder %s5941_s10, %s5937_s30 }
   0x8   : > { %s6042_s18 = scalar_select %p27_p1, %s5945_s11, %s29_s16  }
   0x9   : > { %p38_p5 = por %p37_p2, %p36_p0  ;;  %p6044_p6 = por %p234_p3, %p36_p0 }
   0xa   : > { %p240_p7 = scmp.eq.s32.totalorder %s4300_s14, 1  ;;  %p4302_p9 = scmp.ge.s32.totalorder %s5949_s12, 2 }
   0xc   : > { %p6048_p8 = por %p240_p7, %p239_p4  ;;  %280 = sbr.rel (%p4302_p9) target bundleno = 37 (0x25), region = 48 }
  0x13   : > { %283 = sbr.rel (!%p38_p5) target bundleno = 37 (0x25), region = 52  ;;  %s285_s21 = sand.u32 (%p38_p5), 1, %s5945_s11  }
  0x14   : > { %s4303_s22 = sshll.u32 (%p38_p5), %s5949_s12, 3  ;;  %s5538_s23 = smul.u32 (%p38_p5), 224, %s285_s21 }
  0x15   : > { %s6060_s26 = scalar_lea.vmem (%p38_p5), %s7957_s0, %s4303_s22 }
  0x16   : > { %v371_v0 = vld [vmem:[%s6060_s26] sm:$0xff] (%p38_p5)  ;;  %v373_v1 = vld [vmem:[%s6060_s26 + $0x10] sm:$0xff] (%p38_p5)  ;;  %s6068_s27 = scalar_lea.vmem (%p38_p5), [#allocation2], %s5538_s23 }
  0x17   : > { %v375_v2 = vld [vmem:[%s6060_s26 + $0x20] sm:$0xff] (%p38_p5)  ;;  %v377_v3 = vld [vmem:[%s6060_s26 + $0x30] sm:$0xff] (%p38_p5)  ;;  %372 = vst [vmem:[%s6068_s27] sm:$0xff] (%p38_p5), %v371_v0  ;;  %374 = vst [vmem:[%s6068_s27 + $0x8] sm:$0xff] (%p38_p5), %v373_v1 }
  0x18   : > { %v379_v4 = vld [vmem:[%s6060_s26 + $0x40] sm:$0xff] (%p38_p5)  ;;  %v381_v5 = vld [vmem:[%s6060_s26 + $0x50] sm:$0xff] (%p38_p5)  ;;  %376 = vst [vmem:[%s6068_s27 + $0x10] sm:$0xff] (%p38_p5), %v375_v2  ;;  %378 = vst [vmem:[%s6068_s27 + $0x18] sm:$0xff] (%p38_p5), %v377_v3 }
  0x19   : > { %380 = vst [vmem:[%s6068_s27 + $0x20] sm:$0xff] (%p38_p5), %v379_v4  ;;  %382 = vst [vmem:[%s6068_s27 + $0x28] sm:$0xff] (%p38_p5), %v381_v5  ;;  %v383_v6 = vld [vmem:[%s6060_s26 + $0x60] sm:$0xff] (%p38_p5)  ;;  %v385_v7 = vld [vmem:[%s6060_s26 + $0x70] sm:$0xff] (%p38_p5) }
  0x1a   : > { %v387_v8 = vld [vmem:[%s6060_s26 + $0x80] sm:$0xff]  ;;  %384 = vst [vmem:[%s6068_s27 + $0x30] sm:$0xff] %v383_v6  ;;  %386 = vst [vmem:[%s6068_s27 + $0x38] sm:$0xff] %v385_v7  ;;  %v389_v9 = vld [vmem:[%s6060_s26 + $0x90] sm:$0xff] }
  0x1b   : > { %388 = vst [vmem:[%s6068_s27 + $0x40] sm:$0xff] %v387_v8  ;;  %v391_v10 = vld [vmem:[%s6060_s26 + $0xa0] sm:$0xff]  ;;  %v393_v11 = vld [vmem:[%s6060_s26 + $0xb0] sm:$0xff]  ;;  %390 = vst [vmem:[%s6068_s27 + $0x48] sm:$0xff] %v389_v9 }
  0x1c   : > { %392 = vst [vmem:[%s6068_s27 + $0x50] sm:$0xff] %v391_v10  ;;  %394 = vst [vmem:[%s6068_s27 + $0x58] sm:$0xff] %v393_v11  ;;  %v395_v12 = vld [vmem:[%s6060_s26 + $0xc0] sm:$0xff]  ;;  %v397_v13 = vld [vmem:[%s6060_s26 + $0xd0] sm:$0xff] }
  0x1d   : > { %v399_v14 = vld [vmem:[%s6060_s26 + $0xe0] sm:$0xff]  ;;  %396 = vst [vmem:[%s6068_s27 + $0x60] sm:$0xff] %v395_v12  ;;  %398 = vst [vmem:[%s6068_s27 + $0x68] sm:$0xff] %v397_v13  ;;  %v401_v15 = vld [vmem:[%s6060_s26 + $0xf0] sm:$0xff] }
  0x1e   : > { %400 = vst [vmem:[%s6068_s27 + $0x70] sm:$0xff] %v399_v14  ;;  %v403_v16 = vld [vmem:[%s6060_s26 + $0x100] sm:$0xff]  ;;  %v405_v17 = vld [vmem:[%s6060_s26 + $0x110] sm:$0xff]  ;;  %402 = vst [vmem:[%s6068_s27 + $0x78] sm:$0xff] %v401_v15 }
  0x1f   : > { %404 = vst [vmem:[%s6068_s27 + $0x80] sm:$0xff] %v403_v16  ;;  %406 = vst [vmem:[%s6068_s27 + $0x88] sm:$0xff] %v405_v17  ;;  %v407_v18 = vld [vmem:[%s6060_s26 + $0x120] sm:$0xff]  ;;  %v409_v19 = vld [vmem:[%s6060_s26 + $0x130] sm:$0xff] }
  0x20   : > { %v411_v20 = vld [vmem:[%s6060_s26 + $0x140] sm:$0xff]  ;;  %408 = vst [vmem:[%s6068_s27 + $0x90] sm:$0xff] %v407_v18  ;;  %410 = vst [vmem:[%s6068_s27 + $0x98] sm:$0xff] %v409_v19  ;;  %v413_v21 = vld [vmem:[%s6060_s26 + $0x150] sm:$0xff] }
  0x21   : > { %412 = vst [vmem:[%s6068_s27 + $0xa0] sm:$0xff] %v411_v20  ;;  %v415_v22 = vld [vmem:[%s6060_s26 + $0x160] sm:$0xff]  ;;  %v417_v23 = vld [vmem:[%s6060_s26 + $0x170] sm:$0xff]  ;;  %414 = vst [vmem:[%s6068_s27 + $0xa8] sm:$0xff] %v413_v21 }
  0x22   : > { %416 = vst [vmem:[%s6068_s27 + $0xb0] sm:$0xff] %v415_v22  ;;  %418 = vst [vmem:[%s6068_s27 + $0xb8] sm:$0xff] %v417_v23  ;;  %v419_v24 = vld [vmem:[%s6060_s26 + $0x180] sm:$0xff]  ;;  %v421_v25 = vld [vmem:[%s6060_s26 + $0x190] sm:$0xff] }
  0x23   : > { %v423_v26 = vld [vmem:[%s6060_s26 + $0x1a0] sm:$0xff]  ;;  %420 = vst [vmem:[%s6068_s27 + $0xc0] sm:$0xff] %v419_v24  ;;  %422 = vst [vmem:[%s6068_s27 + $0xc8] sm:$0xff] %v421_v25  ;;  %v425_v27 = vld [vmem:[%s6060_s26 + $0x1b0] sm:$0xff] }
  0x24   : > { %424 = vst [vmem:[%s6068_s27 + $0xd0] sm:$0xff] %v423_v26  ;;  %426 = vst [vmem:[%s6068_s27 + $0xd8] sm:$0xff] %v425_v27 }
  0x25 PF: > { %p4304_p10 = scmp.ge.s32.totalorder %s5949_s12, 1  ;;  %p431_p11 = scmp.lt.s32.totalorder %s5949_s12, 3 }
  0x27   : > { %p432_p12 = pnand %p4304_p10, %p431_p11 }
  0x29   : > { %435 = sbr.rel (%p432_p12) target bundleno = 1856 (0x740), region = 90 }
  0x30   : > { %v4307_v28 = vld [vmem:[%s7958_s1 + $0x48] sm:$0xff]  ;;  %v4309_v29 = vld [vmem:[%s7958_s1 + $0x58] sm:$0xff]  ;;  %v4306_v30 = vld [vmem:[%s7958_s1 + $0x40] sm:$0xff]  ;;  %vm603_vm0 = vcmask 1043456   ;;  %v7969_v35 = vmov 0.0   ;;  %vm5952_vm1 = vmmov 1  }
  0x31   : > { %v4945_v31 = vpack.c.bf16 %v4309_v29, %v4307_v28  ;;  %v4308_v32 = vld [vmem:[%s7958_s1 + $0x50] sm:$0xff]  ;;  %v4311_v33 = vld [vmem:[%s7958_s1 + $0x68] sm:$0xff]  ;;  %v4313_v34 = vld [vmem:[%s7958_s1 + $0x78] sm:$0xf]  ;;  %674 = vmatprep.mubr.f32.mxu0 %v7969_v35  ;;  %692 = vmatprep.mubr.f32.mxu1 %v7969_v35  ;;  %s6154_s17 = sand.u32 1, %s5941_s10   ;;  %vm518_vm3 = vcmask 228352  }
  0x32   : > { %v4947_v36 = vpack.c.bf16 %v4308_v32, %v4306_v30  ;;  %v4949_v37 = vpack.c.bf16 %v4313_v34, %v4311_v33  ;;  %vm6143_vm2 = vmpackc.low %vm603_vm0, %vm5952_vm1  ;;  %v4310_v39 = vld [vmem:[%s7958_s1 + $0x60] sm:$0xff]  ;;  %v4312_v40 = vld [vmem:[%s7958_s1 + $0x70] sm:$0xf]  ;;  %s5539_s29 = smul.u32 224, %s6154_s17  ;;  %vm2450_vm4 = vcmask 326656   ;;  %vm2673_vm5 = vcmask 687104  }
  0x33   : > { %4946 = vmatprep.subr.bf16.mxu0 %v4945_v31  ;;  %v502_v41 = vld [vmem:[%s7958_s1 + $0x8] sm:$0xff]  ;;  %v504_v42 = vld [vmem:[%s7958_s1 + $0x18] sm:$0xff]  ;;  %5230 = vmatprep.subr.bf16.mxu1 %v4945_v31  ;;  %v4952_v43 = vpack.c.bf16 %v4312_v40, %v4310_v39  ;;  %v501_v45 = vld [vmem:[%s7958_s1] sm:$0xff]  ;;  %vm3682_vm6 = vcmask 261120   ;;  %vm5954_vm7 = vmmov 0   ;;  %vm3809_vm8 = vcmask 654336  }
  0x34   : > { %4948 = vmatpush1.bf16.msra.mxu0 %v4947_v36  ;;  %5232 = vmatpush1.bf16.msra.mxu1 %v4947_v36  ;;  %v4955_v44 = vpack.c.bf16 %v504_v42, %v502_v41  ;;  %v503_v46 = vld [vmem:[%s7958_s1 + $0x10] sm:$0xff]  ;;  %v506_v47 = vld [vmem:[%s7958_s1 + $0x28] sm:$0xff]  ;;  %v508_v48 = vld [vmem:[%s7958_s1 + $0x38] sm:$0xf]  ;;  %s6195_s21 = scalar_lea.vmem [#allocation2], %s5539_s29  ;;  %s4305_s23 = sshll.u32 %s6154_s17, 3 }
  0x35   : > { %4951 = vmatprep.subr.msk.bf16.mxu0 %vm6143_vm2, %v4949_v37  ;;  %5231 = vmatprep.subr.msk.bf16.mxu1 %vm6143_vm2, %v4949_v37  ;;  %v4957_v49 = vpack.c.bf16 %v503_v46, %v501_v45  ;;  %v4959_v50 = vpack.c.bf16 %v508_v48, %v506_v47  ;;  %v505_v51 = vld [vmem:[%s7958_s1 + $0x20] sm:$0xff]  ;;  %v507_v52 = vld [vmem:[%s7958_s1 + $0x30] sm:$0xf]  ;;  %v4372_v53 = vld [vmem:[%s7958_s1 + $0x88] sm:$0xff]  ;;  %s4772_s26 = sshll.u32 %s4299_s13, 7  ;;  %s472_s27 = scalar_lea.vmem [#allocation3], %s4305_s23 }
  0x36   : > { %v4374_v54 = vld [vmem:[%s7958_s1 + $0x98] sm:$0xff]  ;;  %v6198_v55 = vld [vmem:[%s6195_s21 + $0x10] sm:$0xff]  ;;  %v6205_v56 = vld [vmem:[%s6195_s21] sm:$0xff]  ;;  %v4962_v57 = vpack.c.bf16 %v507_v52, %v505_v51  ;;  %s4235_s28 = sshll.u32 %s472_s27, 4  ;;  %vm4219_vm9 = vcmask 80896   ;;  %s4222_s29 = scalar_lea.sflag [#allocation4], %s6154_s17  ;;  %s7915_s28 = int_to_ptr.vmem [resolvable:$true] %s4235_s28 }
  0x37   : > { %v4965_v58 = vpack.c.bf16 %v4374_v54, %v4372_v53  ;;  %v6211_v59 = vld [vmem:[%s6195_s21 + $0x18] sm:$0xff]  ;;  %v6221_v60 = vld [vmem:[%s6195_s21 + $0x8] sm:$0xff]  ;;  %v4371_v61 = vld [vmem:[%s7958_s1 + $0x80] sm:$0xff]  ;;  %s5887_s22 = scalar_lea.vmem %s7915_s28, 128  ;;  %s5955_s13 = smov [#allocation3]  }
  0x38   : > { %4954 = vmatpush1.bf16.msk.msra.mxu0 %vm6143_vm2, %v4952_v43  ;;  %5233 = vmatpush1.bf16.msk.msra.mxu1 %vm6143_vm2, %v4952_v43  ;;  %v4373_v62 = vld [vmem:[%s7958_s1 + $0x90] sm:$0xff]  ;;  %v6231_v63 = vld [vmem:[%s6195_s21 + $0x20] sm:$0xff]  ;;  %v4376_v0 = vld [vmem:[%s7958_s1 + $0xa8] sm:$0xff]  ;;  %p5888_p13 = scmp.ne.s32.totalorder %s7915_s28, %s5887_s22  ;;  %s5891_s23 = sshll.u32 %s5955_s13, 4  ;;  %s5892_s23 = int_to_ptr.vmem [resolvable:$false] %s5891_s23 }
  0x39   : > { %4956 = vmatprep.subr.bf16.mxu0 %v4955_v44  ;;  %v4378_v1 = vld [vmem:[%s7958_s1 + $0xb8] sm:$0xf]  ;;  %v4967_v2 = vpack.c.bf16 %v4373_v62, %v4371_v61  ;;  %v4375_v4 = vld [vmem:[%s7958_s1 + $0xa0] sm:$0xff]  ;;  %v4377_v5 = vld [vmem:[%s7958_s1 + $0xb0] sm:$0xf]  ;;  %s5893_s24 = scalar_lea.vmem %s5892_s23, 256  ;;  %p5894_p2 = scmp.lt.s32.totalorder %s7915_s28, %s5892_s23 }
  0x3a   : > { %v4969_v3 = vpack.c.bf16 %v4378_v1, %v4376_v0  ;;  %v6252_v6 = vld [vmem:[%s6195_s21 + $0x28] sm:$0xff]  ;;  %v4412_v8 = vld [vmem:[%s7958_s1 + $0xd8] sm:$0xff]  ;;  %v4972_v9 = vpack.c.bf16 %v4377_v5, %v4375_v4  ;;  %v6268_v11 = vld [vmem:[%s6195_s21 + $0x30] sm:$0xff]  ;;  %p5889_p0 = pnand %p5888_p13, %p6044_p6  ;;  %p5895_p3 = scmp.lt.s32.totalorder %s5893_s24, %s5887_s22 }
  0x3b   : > { %675 = vmatmul.mubr.f32.vlgmr.msra.gmra.mrb[0].mxu0 %v7969_v35  ;;  %4318 = vmatmul.mubr.msk.f32.vlgmr.msra.gmra.mrb[0].mxu1 %vm518_vm3, %v6198_v55  ;;  %v4410_v7 = vld [vmem:[%s7958_s1 + $0xc8] sm:$0xff]  ;;  %v6278_v12 = vld [vmem:[%s6195_s21 + $0x38] sm:$0xff]  ;;  %v6287_v13 = vld [vmem:[%s6195_s21 + $0x40] sm:$0xff] }
  0x3c   : > { %4958 = vmatpush1.bf16.msra.mxu0 %v4957_v49  ;;  %680 = vmatprep.mubr.f32.mxu0 %v7969_v35  ;;  %v4975_v10 = vpack.c.bf16 %v4412_v8, %v4410_v7  ;;  %v6296_v14 = vld [vmem:[%s6195_s21 + $0x48] sm:$0xff]  ;;  %v6305_v15 = vld [vmem:[%s6195_s21 + $0x50] sm:$0xff]  ;;  %v6314_v16 = vld [vmem:[%s6195_s21 + $0x58] sm:$0xff]  ;;  %p5890_p1 = pneg %p5889_p0  ;;  %p5896_p4 = por %p5895_p3, %p5894_p2 }
  0x3d   : > { %4961 = vmatprep.subr.msk.bf16.mxu0 %vm6143_vm2, %v4959_v50  ;;  %698 = vmatprep.mubr.f32.mxu1 %v7969_v35  ;;  %v6323_v17 = vld [vmem:[%s6195_s21 + $0x60] sm:$0xff]  ;;  %v6332_v18 = vld [vmem:[%s6195_s21 + $0x68] sm:$0xff]  ;;  %v6341_v19 = vld [vmem:[%s6195_s21 + $0x70] sm:$0xff] }
  0x3e   : > { %v6350_v20 = vld [vmem:[%s6195_s21 + $0x78] sm:$0xff]  ;;  %v6359_v21 = vld [vmem:[%s6195_s21 + $0x80] sm:$0xff]  ;;  %v6368_v22 = vld [vmem:[%s6195_s21 + $0x88] sm:$0xff]  ;;  %p5897_p5 = pnand %p5896_p4, %p5890_p1 }
  0x3f   : > { %4316 = vmatmul.mubr.msk.f32.gmra.mrb[2].mxu0 %vm518_vm3, %v6205_v56  ;;  %4319 = vmatmul.mubr.msk.f32.gmra.mrb[2].mxu1 %vm518_vm3, %v6211_v59  ;;  %v6377_v23 = vld [vmem:[%s6195_s21 + $0x90] sm:$0xff]  ;;  %v6386_v24 = vld [vmem:[%s6195_s21 + $0x98] sm:$0xff]  ;;  %v6395_v25 = vld [vmem:[%s6195_s21 + $0xa0] sm:$0xff] }
  0x40   : > { %686 = vmatprep.mubr.f32.mxu0 %v7969_v35  ;;  %4964 = vmatpush1.bf16.msk.msra.mxu0 %vm6143_vm2, %v4962_v57  ;;  %v6404_v26 = vld [vmem:[%s6195_s21 + $0xa8] sm:$0xff]  ;;  %v6413_v27 = vld [vmem:[%s6195_s21 + $0xb0] sm:$0xff]  ;;  %v6422_v28 = vld [vmem:[%s6195_s21 + $0xb8] sm:$0xff] }
  0x41   : > { %4966 = vmatprep.subr.bf16.mxu0 %v4965_v58  ;;  %704 = vmatprep.mubr.f32.mxu1 %v7969_v35  ;;  %v6431_v29 = vld [vmem:[%s6195_s21 + $0xc0] sm:$0xff]  ;;  %v6440_v30 = vld [vmem:[%s6195_s21 + $0xc8] sm:$0xff]  ;;  %v6452_v31 = vld [vmem:[%s6195_s21 + $0xd0] sm:$0xff] }
  0x42   : > { %v4409_v32 = vld [vmem:[%s7958_s1 + $0xc0] sm:$0xff]  ;;  %v4411_v33 = vld [vmem:[%s7958_s1 + $0xd0] sm:$0xff]  ;;  %v4414_v34 = vld [vmem:[%s7958_s1 + $0xe8] sm:$0xff] }
  0x43   : > { %4317 = vmatmul.mubr.msk.f32.gmra.mrb[4].mxu0 %vm518_vm3, %v6221_v60  ;;  %4320 = vmatmul.mubr.msk.f32.gmra.mrb[4].mxu1 %vm518_vm3, %v6231_v63  ;;  %v4416_v36 = vld [vmem:[%s7958_s1 + $0xf8] sm:$0xf]  ;;  %v4977_v37 = vpack.c.bf16 %v4411_v33, %v4409_v32  ;;  %v4413_v40 = vld [vmem:[%s7958_s1 + $0xe0] sm:$0xff]  ;;  %v4415_v41 = vld [vmem:[%s7958_s1 + $0xf0] sm:$0xf] }
  0x44   : > { %913 = vmatprep.mubr.f32.mxu0 %v7969_v35  ;;  %710 = vmatprep.mubr.f32.mxu1 %v7969_v35  ;;  %v4979_v39 = vpack.c.bf16 %v4416_v36, %v4414_v34  ;;  %v4447_v42 = vld [vmem:[%s7958_s1 + $0x108] sm:$0xff]  ;;  %v4449_v43 = vld [vmem:[%s7958_s1 + $0x118] sm:$0xff]  ;;  %v4982_v44 = vpack.c.bf16 %v4415_v41, %v4413_v40  ;;  %v4446_v47 = vld [vmem:[%s7958_s1 + $0x100] sm:$0xff] }
  0x45   : > { %v4985_v45 = vpack.c.bf16 %v4449_v43, %v4447_v42  ;;  %v6584_v46 = vld [vmem:[%s6195_s21 + $0xd8] sm:$0xff]  ;;  %v4448_v48 = vld [vmem:[%s7958_s1 + $0x110] sm:$0xff]  ;;  %v4451_v49 = vld [vmem:[%s7958_s1 + $0x128] sm:$0xff]  ;;  %s7913_s21 = scalar_lea.hbm %s7966_s9, %s4772_s26 }
  0x46   : > { %v4453_v50 = vld [vmem:[%s7958_s1 + $0x138] sm:$0xf]  ;;  %v4987_v51 = vpack.c.bf16 %v4448_v48, %v4446_v47  ;;  %v4450_v53 = vld [vmem:[%s7958_s1 + $0x120] sm:$0xff]  ;;  %v4452_v54 = vld [vmem:[%s7958_s1 + $0x130] sm:$0xf] }
  0x47   : > { %914 = vmatmul.mubr.f32.vlgmr.msra.gmra.mrb[0].mxu0 %v7969_v35  ;;  %4321 = vmatmul.mubr.msk.f32.gmra.mrb[6].mxu1 %vm518_vm3, %v6252_v6  ;;  %v4989_v52 = vpack.c.bf16 %v4453_v50, %v4451_v49  ;;  %v2429_v38 = vld [vmem:[%s7960_s3] sm:$0xff]  ;;  %v2430_v57 = vld [vmem:[%s7960_s3 + $0x8] sm:$0xff]  ;;  %v2431_v58 = vld [vmem:[%s7960_s3 + $0x10] sm:$0xff] }
  0x48   : > { %4968 = vmatpush1.bf16.msra.mxu0 %v4967_v2  ;;  %919 = vmatprep.mubr.f32.mxu0 %v7969_v35  ;;  %v4996_v61 = vpack.c.bf16 %v2430_v57, %v2429_v38  ;;  %v2432_v62 = vld [vmem:[%s7960_s3 + $0x18] sm:$0xff]  ;;  %v2433_v1 = vld [vmem:[%s7960_s3 + $0x20] sm:$0xff]  ;;  %v2434_v2 = vld [vmem:[%s7960_s3 + $0x28] sm:$0xff] }
  0x49   : > { %4971 = vmatprep.subr.msk.bf16.mxu0 %vm6143_vm2, %v4969_v3  ;;  %716 = vmatprep.mubr.f32.mxu1 %v7969_v35  ;;  %v4999_v0 = vpack.c.bf16 %v2432_v62, %v2431_v58  ;;  %v5002_v3 = vpack.c.bf16 %v2434_v2, %v2433_v1  ;;  %v2437_v4 = vld [vmem:[%s7960_s3 + $0x40] sm:$0xff]  ;;  %v2438_v5 = vld [vmem:[%s7960_s3 + $0x48] sm:$0xff] }
  0x4a   : > { %v5008_v7 = vpack.c.bf16 %v2438_v5, %v2437_v4  ;;  %v2449_v36 = vld [vmem:[%s7960_s3 + $0xa0] sm:$0xff] }
  0x4b   : > { %920 = vmatmul.mubr.f32.gmra.mrb[2].mxu0 %v7969_v35  ;;  %4322 = vmatmul.mubr.msk.f32.gmra.mrb[8].mxu1 %vm518_vm3, %v6268_v11 }
  0x4c   : > { %925 = vmatprep.mubr.f32.mxu0 %v7969_v35  ;;  %4974 = vmatpush1.bf16.msk.msra.mxu0 %vm6143_vm2, %v4972_v9  ;;  %v2439_v9 = vld [vmem:[%s7960_s3 + $0x50] sm:$0xff] }
  0x4d   : > { %4976 = vmatprep.subr.bf16.mxu0 %v4975_v10  ;;  %722 = vmatprep.mubr.f32.mxu1 %v7969_v35  ;;  %v2440_v10 = vld [vmem:[%s7960_s3 + $0x58] sm:$0xff] }
  0x4f   : > { %4345 = vmatmul.mubr.msk.f32.gmra.mrb[4].mxu0 %vm518_vm3, %v6205_v56  ;;  %4323 = vmatmul.mubr.msk.f32.gmra.mrb[10].mxu1 %vm518_vm3, %v6278_v12 }
  0x50   : > { %931 = vmatprep.mubr.f32.mxu0 %v7969_v35  ;;  %728 = vmatprep.mubr.f32.mxu1 %v7969_v35 }
  0x53   : > { %4346 = vmatmul.mubr.msk.f32.gmra.mrb[6].mxu0 %vm518_vm3, %v6221_v60  ;;  %4324 = vmatmul.mubr.msk.f32.gmra.mrb[12].mxu1 %vm518_vm3, %v6287_v13 }
  0x54   : > { %937 = vmatprep.mubr.f32.mxu0 %v7969_v35  ;;  %734 = vmatprep.mubr.f32.mxu1 %v7969_v35 }
  0x57   : > { %4347 = vmatmul.mubr.msk.f32.gmra.mrb[8].mxu0 %vm518_vm3, %v6198_v55  ;;  %4325 = vmatmul.mubr.msk.f32.gmra.mrb[14].mxu1 %vm518_vm3, %v6296_v14 }
  0x58   : > { %943 = vmatprep.mubr.f32.mxu0 %v7969_v35  ;;  %740 = vmatprep.mubr.f32.mxu1 %v7969_v35 }
  0x5b   : > { %4348 = vmatmul.mubr.msk.f32.gmra.mrb[10].mxu0 %vm518_vm3, %v6211_v59  ;;  %4326 = vmatmul.mubr.msk.f32.gmra.mrb[16].mxu1 %vm518_vm3, %v6305_v15 }
  0x5c   : > { %949 = vmatprep.mubr.f32.mxu0 %v7969_v35  ;;  %746 = vmatprep.mubr.f32.mxu1 %v7969_v35 }
  0x5f   : > { %4349 = vmatmul.mubr.msk.f32.gmra.mrb[12].mxu0 %vm518_vm3, %v6231_v63  ;;  %4327 = vmatmul.mubr.msk.f32.gmra.mrb[18].mxu1 %vm518_vm3, %v6314_v16 }
  0x60   : > { %955 = vmatprep.mubr.f32.mxu0 %v7969_v35  ;;  %752 = vmatprep.mubr.f32.mxu1 %v7969_v35 }
  0x63   : > { %4350 = vmatmul.mubr.msk.f32.gmra.mrb[14].mxu0 %vm518_vm3, %v6252_v6  ;;  %4328 = vmatmul.mubr.msk.f32.gmra.mrb[20].mxu1 %vm518_vm3, %v6323_v17 }
  0x64   : > { %961 = vmatprep.mubr.f32.mxu0 %v7969_v35  ;;  %758 = vmatprep.mubr.f32.mxu1 %v7969_v35 }
  0x67   : > { %4351 = vmatmul.mubr.msk.f32.gmra.mrb[16].mxu0 %vm518_vm3, %v6268_v11  ;;  %4329 = vmatmul.mubr.msk.f32.gmra.mrb[22].mxu1 %vm518_vm3, %v6332_v18 }
  0x68   : > { %967 = vmatprep.mubr.f32.mxu0 %v7969_v35  ;;  %764 = vmatprep.mubr.f32.mxu1 %v7969_v35 }
  0x6b   : > { %4352 = vmatmul.mubr.msk.f32.gmra.mrb[18].mxu0 %vm518_vm3, %v6278_v12  ;;  %4330 = vmatmul.mubr.msk.f32.gmra.mrb[24].mxu1 %vm518_vm3, %v6341_v19 }
  0x6c   : > { %973 = vmatprep.mubr.f32.mxu0 %v7969_v35  ;;  %770 = vmatprep.mubr.f32.mxu1 %v7969_v35 }
  0x6f   : > { %4353 = vmatmul.mubr.msk.f32.gmra.mrb[20].mxu0 %vm518_vm3, %v6287_v13  ;;  %4331 = vmatmul.mubr.msk.f32.gmra.mrb[26].mxu1 %vm518_vm3, %v6350_v20 }
  0x70   : > { %979 = vmatprep.mubr.f32.mxu0 %v7969_v35  ;;  %776 = vmatprep.mubr.f32.mxu1 %v7969_v35 }
  0x73   : > { %4354 = vmatmul.mubr.msk.f32.gmra.mrb[22].mxu0 %vm518_vm3, %v6296_v14  ;;  %4332 = vmatmul.mubr.msk.f32.gmra.mrb[28].mxu1 %vm518_vm3, %v6359_v21 }
  0x74   : > { %985 = vmatprep.mubr.f32.mxu0 %v7969_v35  ;;  %782 = vmatprep.mubr.f32.mxu1 %v7969_v35 }
  0x77   : > { %4355 = vmatmul.mubr.msk.f32.gmra.mrb[24].mxu0 %vm518_vm3, %v6305_v15  ;;  %4333 = vmatmul.mubr.msk.f32.gmra.mrb[30].mxu1 %vm518_vm3, %v6368_v22 }
  0x78   : > { %991 = vmatprep.mubr.f32.mxu0 %v7969_v35  ;;  %788 = vmatprep.mubr.f32.mxu1 %v7969_v35 }
  0x7b   : > { %4356 = vmatmul.mubr.msk.f32.gmra.mrb[26].mxu0 %vm518_vm3, %v6314_v16  ;;  %4334 = vmatmul.mubr.msk.f32.gmra.mrb[32].mxu1 %vm518_vm3, %v6377_v23 }
  0x7c   : > { %997 = vmatprep.mubr.f32.mxu0 %v7969_v35  ;;  %794 = vmatprep.mubr.f32.mxu1 %v7969_v35 }
  0x7f   : > { %4357 = vmatmul.mubr.msk.f32.gmra.mrb[28].mxu0 %vm518_vm3, %v6323_v17  ;;  %4335 = vmatmul.mubr.msk.f32.gmra.mrb[34].mxu1 %vm518_vm3, %v6386_v24 }
  0x80   : > { %1003 = vmatprep.mubr.f32.mxu0 %v7969_v35  ;;  %800 = vmatprep.mubr.f32.mxu1 %v7969_v35 }
  0x83   : > { %4358 = vmatmul.mubr.msk.f32.gmra.mrb[30].mxu0 %vm518_vm3, %v6332_v18  ;;  %4336 = vmatmul.mubr.msk.f32.gmra.mrb[36].mxu1 %vm518_vm3, %v6395_v25 }
  0x84   : > { %1009 = vmatprep.mubr.f32.mxu0 %v7969_v35  ;;  %806 = vmatprep.mubr.f32.mxu1 %v7969_v35 }
  0x87   : > { %4359 = vmatmul.mubr.msk.f32.gmra.mrb[32].mxu0 %vm518_vm3, %v6341_v19  ;;  %4337 = vmatmul.mubr.msk.f32.gmra.mrb[38].mxu1 %vm518_vm3, %v6404_v26 }
  0x88   : > { %1015 = vmatprep.mubr.f32.mxu0 %v7969_v35  ;;  %812 = vmatprep.mubr.f32.mxu1 %v7969_v35 }
  0x8b   : > { %4360 = vmatmul.mubr.msk.f32.gmra.mrb[34].mxu0 %vm518_vm3, %v6350_v20  ;;  %4338 = vmatmul.mubr.msk.f32.gmra.mrb[40].mxu1 %vm518_vm3, %v6413_v27 }
  0x8c   : > { %1021 = vmatprep.mubr.f32.mxu0 %v7969_v35  ;;  %818 = vmatprep.mubr.f32.mxu1 %v7969_v35 }
  0x8f   : > { %4361 = vmatmul.mubr.msk.f32.gmra.mrb[36].mxu0 %vm518_vm3, %v6359_v21  ;;  %4339 = vmatmul.mubr.msk.f32.gmra.mrb[42].mxu1 %vm518_vm3, %v6422_v28 }
  0x90   : > { %1027 = vmatprep.mubr.f32.mxu0 %v7969_v35  ;;  %824 = vmatprep.mubr.f32.mxu1 %v7969_v35 }
  0x93   : > { %4362 = vmatmul.mubr.msk.f32.gmra.mrb[38].mxu0 %vm518_vm3, %v6368_v22  ;;  %4340 = vmatmul.mubr.msk.f32.gmra.mrb[44].mxu1 %vm518_vm3, %v6431_v29 }
  0x94   : > { %1033 = vmatprep.mubr.f32.mxu0 %v7969_v35  ;;  %830 = vmatprep.mubr.f32.mxu1 %v7969_v35 }
  0x97   : > { %4363 = vmatmul.mubr.msk.f32.gmra.mrb[40].mxu0 %vm518_vm3, %v6377_v23  ;;  %4341 = vmatmul.mubr.msk.f32.gmra.mrb[46].mxu1 %vm518_vm3, %v6440_v30 }
  0x98   : > { %1039 = vmatprep.mubr.f32.mxu0 %v7969_v35  ;;  %836 = vmatprep.mubr.f32.mxu1 %v7969_v35 }
  0x9b   : > { %4364 = vmatmul.mubr.msk.f32.gmra.mrb[42].mxu0 %vm518_vm3, %v6386_v24  ;;  %4342 = vmatmul.mubr.msk.f32.gmra.mrb[48].mxu1 %vm518_vm3, %v6452_v31 }
  0x9c   : > { %1045 = vmatprep.mubr.f32.mxu0 %v7969_v35 }
  0x9f   : > { %4365 = vmatmul.mubr.msk.f32.gmra.mrb[44].mxu0 %vm518_vm3, %v6395_v25 }
  0xa0   : > { %1051 = vmatprep.mubr.f32.mxu0 %v7969_v35 }
  0xa3   : > { %4366 = vmatmul.mubr.msk.f32.gmra.mrb[46].mxu0 %vm518_vm3, %v6404_v26 }
  0xa4   : > { %1057 = vmatprep.mubr.f32.mxu0 %v7969_v35 }
  0xa7   : > { %4367 = vmatmul.mubr.msk.f32.gmra.mrb[48].mxu0 %vm518_vm3, %v6413_v27 }
  0xa8   : > { %1063 = vmatprep.mubr.f32.mxu0 %v7969_v35 }
  0xab   : > { %4368 = vmatmul.mubr.msk.f32.gmra.mrb[50].mxu0 %vm518_vm3, %v6422_v28 }
  0xac   : > { %1069 = vmatprep.mubr.f32.mxu0 %v7969_v35 }
  0xaf   : > { %4369 = vmatmul.mubr.msk.f32.gmra.mrb[52].mxu0 %vm518_vm3, %v6431_v29 }
  0xb0   : > { %1075 = vmatprep.mubr.f32.mxu0 %v7969_v35 }
  0xb3   : > { %4370 = vmatmul.mubr.msk.f32.gmra.mrb[54].mxu0 %vm518_vm3, %v6440_v30 }
  0xb4   : > { %1164 = vmatprep.mubr.f32.mxu0 %v7969_v35 }
  0xb7   : > { %4381 = vmatmul.mubr.msk.f32.vlgmr.msra.gmra.mrb[0].mxu0 %vm518_vm3, %v6205_v56  ;;  %v4992_v56 = vpack.c.bf16 %v4452_v54, %v4450_v53 }
  0xb8   : > { %4978 = vmatpush1.bf16.msra.mxu0 %v4977_v37  ;;  %1170 = vmatprep.mubr.f32.mxu0 %v7969_v35 }
  0xb9   : > { %4981 = vmatprep.subr.msk.bf16.mxu0 %vm6143_vm2, %v4979_v39 }
  0xbb   : > { %4382 = vmatmul.mubr.msk.f32.gmra.mrb[2].mxu0 %vm518_vm3, %v6221_v60 }
  0xbc   : > { %1176 = vmatprep.mubr.f32.mxu0 %v7969_v35  ;;  %4984 = vmatpush1.bf16.msk.msra.mxu0 %vm6143_vm2, %v4982_v44 }
  0xbd   : > { %4986 = vmatprep.subr.bf16.mxu0 %v4985_v45 }
  0xbf   : > { %4383 = vmatmul.mubr.msk.f32.gmra.mrb[4].mxu0 %vm518_vm3, %v6198_v55 }
  0xc0   : > { %1182 = vmatprep.mubr.f32.mxu0 %v7969_v35 }
  0xc3   : > { %4384 = vmatmul.mubr.msk.f32.gmra.mrb[6].mxu0 %vm518_vm3, %v6211_v59 }
  0xc4   : > { %1188 = vmatprep.mubr.f32.mxu0 %v7969_v35 }
  0xc7   : > { %4385 = vmatmul.mubr.msk.f32.gmra.mrb[8].mxu0 %vm518_vm3, %v6231_v63 }
  0xc8   : > { %1194 = vmatprep.mubr.f32.mxu0 %v7969_v35 }
  0xcb   : > { %4386 = vmatmul.mubr.msk.f32.gmra.mrb[10].mxu0 %vm518_vm3, %v6252_v6 }
  0xcc   : > { %1200 = vmatprep.mubr.f32.mxu0 %v7969_v35 }
  0xcf   : > { %4387 = vmatmul.mubr.msk.f32.gmra.mrb[12].mxu0 %vm518_vm3, %v6268_v11 }
  0xd0   : > { %1206 = vmatprep.mubr.f32.mxu0 %v7969_v35 }
  0xd3   : > { %4388 = vmatmul.mubr.msk.f32.gmra.mrb[14].mxu0 %vm518_vm3, %v6278_v12 }
  0xd4   : > { %1212 = vmatprep.mubr.f32.mxu0 %v7969_v35 }
  0xd7   : > { %4389 = vmatmul.mubr.msk.f32.gmra.mrb[16].mxu0 %vm518_vm3, %v6287_v13 }
  0xd8   : > { %1218 = vmatprep.mubr.f32.mxu0 %v7969_v35 }
  0xdb   : > { %4390 = vmatmul.mubr.msk.f32.gmra.mrb[18].mxu0 %vm518_vm3, %v6296_v14 }
  0xdc   : > { %1224 = vmatprep.mubr.f32.mxu0 %v7969_v35 }
  0xdf   : > { %4391 = vmatmul.mubr.msk.f32.gmra.mrb[20].mxu0 %vm518_vm3, %v6305_v15 }
  0xe0   : > { %1230 = vmatprep.mubr.f32.mxu0 %v7969_v35 }
  0xe3   : > { %4392 = vmatmul.mubr.msk.f32.gmra.mrb[22].mxu0 %vm518_vm3, %v6314_v16 }
  0xe4   : > { %1236 = vmatprep.mubr.f32.mxu0 %v7969_v35 }
  0xe7   : > { %4393 = vmatmul.mubr.msk.f32.gmra.mrb[24].mxu0 %vm518_vm3, %v6323_v17 }
  0xe8   : > { %1242 = vmatprep.mubr.f32.mxu0 %v7969_v35 }
  0xeb   : > { %4394 = vmatmul.mubr.msk.f32.gmra.mrb[26].mxu0 %vm518_vm3, %v6332_v18 }
  0xec   : > { %1248 = vmatprep.mubr.f32.mxu0 %v7969_v35 }
  0xef   : > { %4395 = vmatmul.mubr.msk.f32.gmra.mrb[28].mxu0 %vm518_vm3, %v6341_v19 }
  0xf0   : > { %1254 = vmatprep.mubr.f32.mxu0 %v7969_v35 }
  0xf3   : > { %4396 = vmatmul.mubr.msk.f32.gmra.mrb[30].mxu0 %vm518_vm3, %v6350_v20 }
  0xf4   : > { %1260 = vmatprep.mubr.f32.mxu0 %v7969_v35 }
  0xf7   : > { %4397 = vmatmul.mubr.msk.f32.gmra.mrb[32].mxu0 %vm518_vm3, %v6359_v21 }
  0xf8   : > { %1266 = vmatprep.mubr.f32.mxu0 %v7969_v35 }
  0xfb   : > { %4398 = vmatmul.mubr.msk.f32.gmra.mrb[34].mxu0 %vm518_vm3, %v6368_v22 }
  0xfc   : > { %1272 = vmatprep.mubr.f32.mxu0 %v7969_v35 }
  0xff   : > { %4399 = vmatmul.mubr.msk.f32.gmra.mrb[36].mxu0 %vm518_vm3, %v6377_v23 }
 0x100   : > { %1278 = vmatprep.mubr.f32.mxu0 %v7969_v35 }
 0x103   : > { %4400 = vmatmul.mubr.msk.f32.gmra.mrb[38].mxu0 %vm518_vm3, %v6386_v24 }
 0x104   : > { %1284 = vmatprep.mubr.f32.mxu0 %v7969_v35 }
 0x107   : > { %4401 = vmatmul.mubr.msk.f32.gmra.mrb[40].mxu0 %vm518_vm3, %v6395_v25 }
 0x108   : > { %1290 = vmatprep.mubr.f32.mxu0 %v7969_v35 }
 0x10b   : > { %4402 = vmatmul.mubr.msk.f32.gmra.mrb[42].mxu0 %vm518_vm3, %v6404_v26 }
 0x10c   : > { %1296 = vmatprep.mubr.f32.mxu0 %v7969_v35 }
 0x10f   : > { %4403 = vmatmul.mubr.msk.f32.gmra.mrb[44].mxu0 %vm518_vm3, %v6413_v27 }
 0x110   : > { %1302 = vmatprep.mubr.f32.mxu0 %v7969_v35 }
 0x113   : > { %4404 = vmatmul.mubr.msk.f32.gmra.mrb[46].mxu0 %vm518_vm3, %v6422_v28 }
 0x114   : > { %1308 = vmatprep.mubr.f32.mxu0 %v7969_v35 }
 0x117   : > { %4405 = vmatmul.mubr.msk.f32.gmra.mrb[48].mxu0 %vm518_vm3, %v6431_v29 }
 0x118   : > { %1314 = vmatprep.mubr.f32.mxu0 %v7969_v35 }
 0x11b   : > { %4406 = vmatmul.mubr.msk.f32.gmra.mrb[50].mxu0 %vm518_vm3, %v6440_v30 }
 0x11c   : > { %1320 = vmatprep.mubr.f32.mxu0 %v7969_v35 }
 0x11f   : > { %4407 = vmatmul.mubr.msk.f32.gmra.mrb[52].mxu0 %vm518_vm3, %v6452_v31 }
 0x120   : > { %1326 = vmatprep.mubr.f32.mxu0 %v7969_v35 }
 0x123   : > { %4408 = vmatmul.mubr.msk.f32.gmra.mrb[54].mxu0 %vm518_vm3, %v6584_v46 }
 0x124   : > { %1468 = vmatprep.mubr.f32.mxu0 %v7969_v35 }
 0x127   : > { %4419 = vmatmul.mubr.msk.f32.vlgmr.msra.gmra.mrb[0].mxu0 %vm518_vm3, %v6221_v60  ;;  %v7967_v60 = vmov 0.0|0.0  }
 0x128   : > { %4988 = vmatpush1.bf16.msra.mxu0 %v4987_v51  ;;  %1474 = vmatprep.mubr.f32.mxu0 %v7969_v35 }
 0x129   : > { %4991 = vmatprep.subr.msk.bf16.mxu0 %vm6143_vm2, %v4989_v52  ;;  %4995 = vmatprep.subr.bf16.mxu1 %v7967_v60 }
 0x12a   : > { %4997 = vmatpush1.bf16.msra.mxu1 %v4996_v61 }
 0x12b   : > { %4420 = vmatmul.mubr.msk.f32.gmra.mrb[2].mxu0 %vm518_vm3, %v6198_v55  ;;  %4998 = vmatprep.subr.bf16.mxu1 %v7967_v60 }
 0x12c   : > { %1480 = vmatprep.mubr.f32.mxu0 %v7969_v35  ;;  %4994 = vmatpush1.bf16.msk.msra.mxu0 %vm6143_vm2, %v4992_v56 }
 0x12e   : > { %5000 = vmatpush1.bf16.msra.mxu1 %v4999_v0 }
 0x12f   : > { %4421 = vmatmul.mubr.msk.f32.gmra.mrb[4].mxu0 %vm518_vm3, %v6211_v59  ;;  %5001 = vmatprep.subr.bf16.mxu1 %v7967_v60 }
 0x130   : > { %1486 = vmatprep.mubr.f32.mxu0 %v7969_v35 }
 0x132   : > { %5003 = vmatpush1.bf16.msra.mxu1 %v5002_v3 }
 0x133   : > { %4422 = vmatmul.mubr.msk.f32.gmra.mrb[6].mxu0 %vm518_vm3, %v6231_v63  ;;  %5004 = vmatprep.subr.bf16.mxu1 %v7967_v60 }
 0x134   : > { %1492 = vmatprep.mubr.f32.mxu0 %v7969_v35 }
 0x137   : > { %4423 = vmatmul.mubr.msk.f32.gmra.mrb[8].mxu0 %vm518_vm3, %v6252_v6 }
 0x138   : > { %1498 = vmatprep.mubr.f32.mxu0 %v7969_v35 }
 0x13b   : > { %4424 = vmatmul.mubr.msk.f32.gmra.mrb[10].mxu0 %vm518_vm3, %v6268_v11 }
 0x13c   : > { %1504 = vmatprep.mubr.f32.mxu0 %v7969_v35 }
 0x13f   : > { %4425 = vmatmul.mubr.msk.f32.gmra.mrb[12].mxu0 %vm518_vm3, %v6278_v12 }
 0x140   : > { %1510 = vmatprep.mubr.f32.mxu0 %v7969_v35 }
 0x143   : > { %4426 = vmatmul.mubr.msk.f32.gmra.mrb[14].mxu0 %vm518_vm3, %v6287_v13 }
 0x144   : > { %1516 = vmatprep.mubr.f32.mxu0 %v7969_v35 }
 0x147   : > { %4427 = vmatmul.mubr.msk.f32.gmra.mrb[16].mxu0 %vm518_vm3, %v6296_v14 }
 0x148   : > { %1522 = vmatprep.mubr.f32.mxu0 %v7969_v35 }
 0x14b   : > { %4428 = vmatmul.mubr.msk.f32.gmra.mrb[18].mxu0 %vm518_vm3, %v6305_v15 }
 0x14c   : > { %1528 = vmatprep.mubr.f32.mxu0 %v7969_v35 }
 0x14f   : > { %4429 = vmatmul.mubr.msk.f32.gmra.mrb[20].mxu0 %vm518_vm3, %v6314_v16 }
 0x150   : > { %1534 = vmatprep.mubr.f32.mxu0 %v7969_v35 }
 0x153   : > { %4430 = vmatmul.mubr.msk.f32.gmra.mrb[22].mxu0 %vm518_vm3, %v6323_v17 }
 0x154   : > { %1540 = vmatprep.mubr.f32.mxu0 %v7969_v35 }
 0x157   : > { %4431 = vmatmul.mubr.msk.f32.gmra.mrb[24].mxu0 %vm518_vm3, %v6332_v18 }
 0x158   : > { %1546 = vmatprep.mubr.f32.mxu0 %v7969_v35 }
 0x15b   : > { %4432 = vmatmul.mubr.msk.f32.gmra.mrb[26].mxu0 %vm518_vm3, %v6341_v19 }
 0x15c   : > { %1552 = vmatprep.mubr.f32.mxu0 %v7969_v35 }
 0x15f   : > { %4433 = vmatmul.mubr.msk.f32.gmra.mrb[28].mxu0 %vm518_vm3, %v6350_v20 }
 0x160   : > { %1558 = vmatprep.mubr.f32.mxu0 %v7969_v35 }
 0x163   : > { %4434 = vmatmul.mubr.msk.f32.gmra.mrb[30].mxu0 %vm518_vm3, %v6359_v21 }
 0x164   : > { %1564 = vmatprep.mubr.f32.mxu0 %v7969_v35 }
 0x167   : > { %4435 = vmatmul.mubr.msk.f32.gmra.mrb[32].mxu0 %vm518_vm3, %v6368_v22 }
 0x168   : > { %1570 = vmatprep.mubr.f32.mxu0 %v7969_v35 }
 0x16b   : > { %4436 = vmatmul.mubr.msk.f32.gmra.mrb[34].mxu0 %vm518_vm3, %v6377_v23 }
 0x16c   : > { %1576 = vmatprep.mubr.f32.mxu0 %v7969_v35 }
 0x16f   : > { %4437 = vmatmul.mubr.msk.f32.gmra.mrb[36].mxu0 %vm518_vm3, %v6386_v24 }
 0x170   : > { %1582 = vmatprep.mubr.f32.mxu0 %v7969_v35 }
 0x173   : > { %4438 = vmatmul.mubr.msk.f32.gmra.mrb[38].mxu0 %vm518_vm3, %v6395_v25 }
 0x174   : > { %1588 = vmatprep.mubr.f32.mxu0 %v7969_v35 }
 0x177   : > { %4439 = vmatmul.mubr.msk.f32.gmra.mrb[40].mxu0 %vm518_vm3, %v6404_v26 }
 0x178   : > { %1594 = vmatprep.mubr.f32.mxu0 %v7969_v35 }
 0x17b   : > { %4440 = vmatmul.mubr.msk.f32.gmra.mrb[42].mxu0 %vm518_vm3, %v6413_v27 }
 0x17c   : > { %1600 = vmatprep.mubr.f32.mxu0 %v7969_v35 }
 0x17f   : > { %4441 = vmatmul.mubr.msk.f32.gmra.mrb[44].mxu0 %vm518_vm3, %v6422_v28 }
 0x180   : > { %1606 = vmatprep.mubr.f32.mxu0 %v7969_v35 }
 0x183   : > { %4442 = vmatmul.mubr.msk.f32.gmra.mrb[46].mxu0 %vm518_vm3, %v6431_v29 }
 0x184   : > { %1612 = vmatprep.mubr.f32.mxu0 %v7969_v35 }
 0x187   : > { %4443 = vmatmul.mubr.msk.f32.gmra.mrb[48].mxu0 %vm518_vm3, %v6440_v30 }
 0x188   : > { %1618 = vmatprep.mubr.f32.mxu0 %v7969_v35 }
 0x18b   : > { %4444 = vmatmul.mubr.msk.f32.gmra.mrb[50].mxu0 %vm518_vm3, %v6452_v31 }
 0x18c   : > { %1624 = vmatprep.mubr.f32.mxu0 %v7969_v35 }
 0x18f   : > { %4445 = vmatmul.mubr.msk.f32.gmra.mrb[52].mxu0 %vm518_vm3, %v6584_v46 }
 0x190   : > { %1630 = vmatprep.mubr.f32.mxu0 %v7969_v35 }
 0x193   : > { %1631 = vmatmul.mubr.f32.gmra.mrb[54].mxu0 %v7969_v35 }
 0x194   : > { %1772 = vmatprep.mubr.f32.mxu0 %v7969_v35 }
 0x197   : > { %4456 = vmatmul.mubr.msk.f32.vlgmr.msra.gmra.mrb[0].mxu0 %vm518_vm3, %v6198_v55  ;;  %v2435_v55 = vld [vmem:[%s7960_s3 + $0x30] sm:$0xff] }
 0x198   : > { %1778 = vmatprep.mubr.f32.mxu0 %v7969_v35 }
 0x19b   : > { %4457 = vmatmul.mubr.msk.f32.gmra.mrb[2].mxu0 %vm518_vm3, %v6211_v59  ;;  %v2436_v59 = vld [vmem:[%s7960_s3 + $0x38] sm:$0xff] }
 0x19c   : > { %1784 = vmatprep.mubr.f32.mxu0 %v7969_v35 }
 0x19f   : > { %4458 = vmatmul.mubr.msk.f32.gmra.mrb[4].mxu0 %vm518_vm3, %v6231_v63  ;;  %v5005_v63 = vpack.c.bf16 %v2436_v59, %v2435_v55 }
 0x1a0   : > { %1790 = vmatprep.mubr.f32.mxu0 %v7969_v35 }
 0x1a1   : > { %5006 = vmatpush1.bf16.msra.mxu1 %v5005_v63 }
 0x1a2   : > { %5007 = vmatprep.subr.bf16.mxu1 %v7967_v60 }
 0x1a3   : > { %4459 = vmatmul.mubr.msk.f32.gmra.mrb[6].mxu0 %vm518_vm3, %v6252_v6  ;;  %v6801_v6 = vpop.f32.mrb[0].mxu1 }
 0x1a4   : > { %1796 = vmatprep.mubr.f32.mxu0 %v7969_v35  ;;  %v6805_v8 = vpop.f32.mrb[1].mxu1 }
 0x1a5   : > { %5009 = vmatpush1.bf16.msra.mxu1 %v5008_v7 }
 0x1a6   : > { %5010 = vmatprep.subr.bf16.mxu1 %v7967_v60 }
 0x1a7   : > { %4460 = vmatmul.mubr.msk.f32.gmra.mrb[8].mxu0 %vm518_vm3, %v6268_v11  ;;  %v5011_v11 = vpack.c.bf16 %v2440_v10, %v2439_v9 }
 0x1a8   : > { %1802 = vmatprep.mubr.f32.mxu0 %v7969_v35 }
 0x1a9   : > { %5012 = vmatpush1.bf16.msra.mxu1 %v5011_v11 }
 0x1aa   : > { %5013 = vmatprep.subr.bf16.mxu1 %v7967_v60 }
 0x1ab   : > { %4461 = vmatmul.mubr.msk.f32.gmra.mrb[10].mxu0 %vm518_vm3, %v6278_v12  ;;  %v6815_v12 = vpop.f32.mrb[2].mxu1 }
 0x1ac   : > { %1808 = vmatprep.mubr.f32.mxu0 %v7969_v35 }
 0x1af   : > { %4462 = vmatmul.mubr.msk.f32.gmra.mrb[12].mxu0 %vm518_vm3, %v6287_v13  ;;  %v6819_v13 = vpop.f32.mrb[3].mxu1 }
 0x1b0   : > { %1814 = vmatprep.mubr.f32.mxu0 %v7969_v35 }
 0x1b3   : > { %4463 = vmatmul.mubr.msk.f32.gmra.mrb[14].mxu0 %vm518_vm3, %v6296_v14  ;;  %v2441_v14 = vld [vmem:[%s7960_s3 + $0x60] sm:$0xff] }
 0x1b4   : > { %1820 = vmatprep.mubr.f32.mxu0 %v7969_v35 }
 0x1b7   : > { %4464 = vmatmul.mubr.msk.f32.gmra.mrb[16].mxu0 %vm518_vm3, %v6305_v15  ;;  %v2442_v15 = vld [vmem:[%s7960_s3 + $0x68] sm:$0xff] }
 0x1b8   : > { %1826 = vmatprep.mubr.f32.mxu0 %v7969_v35 }
 0x1bb   : > { %4465 = vmatmul.mubr.msk.f32.gmra.mrb[18].mxu0 %vm518_vm3, %v6314_v16  ;;  %v5014_v16 = vpack.c.bf16 %v2442_v15, %v2441_v14  ;;  %v1999_v15 = vlaneseq }
 0x1bc   : > { %1832 = vmatprep.mubr.f32.mxu0 %v7969_v35 }
 0x1bd   : > { %5015 = vmatpush1.bf16.msra.mxu1 %v5014_v16  ;;  %v6949_v16 = vshrl.u32 %v1999_v15, 7 }
 0x1be   : > { %5016 = vmatprep.subr.bf16.mxu1 %v7967_v60 }
 0x1bf   : > { %4466 = vmatmul.mubr.msk.f32.gmra.mrb[20].mxu0 %vm518_vm3, %v6323_v17  ;;  %v6829_v17 = vpop.f32.mrb[4].mxu1  ;;  %7983 = vst [vmem:[#allocation10_spill] sm:$0xff] %v6949_v16 }
 0x1c0   : > { %1838 = vmatprep.mubr.f32.mxu0 %v7969_v35 }
 0x1c3   : > { %4467 = vmatmul.mubr.msk.f32.gmra.mrb[22].mxu0 %vm518_vm3, %v6332_v18  ;;  %v6832_v18 = vpop.f32.mrb[5].mxu1 }
 0x1c4   : > { %1844 = vmatprep.mubr.f32.mxu0 %v7969_v35 }
 0x1c7   : > { %4468 = vmatmul.mubr.msk.f32.gmra.mrb[24].mxu0 %vm518_vm3, %v6341_v19  ;;  %v2443_v19 = vld [vmem:[%s7960_s3 + $0x70] sm:$0xff] }
 0x1c8   : > { %1850 = vmatprep.mubr.f32.mxu0 %v7969_v35 }
 0x1cb   : > { %4469 = vmatmul.mubr.msk.f32.gmra.mrb[26].mxu0 %vm518_vm3, %v6350_v20  ;;  %v2444_v20 = vld [vmem:[%s7960_s3 + $0x78] sm:$0xff] }
 0x1cc   : > { %1856 = vmatprep.mubr.f32.mxu0 %v7969_v35 }
 0x1cf   : > { %4470 = vmatmul.mubr.msk.f32.gmra.mrb[28].mxu0 %vm518_vm3, %v6359_v21  ;;  %v5017_v21 = vpack.c.bf16 %v2444_v20, %v2443_v19  ;;  %v7971_v19 = vsub.s32 0, %v6949_v16  ;;  %v1997_v20 = vld [vmem:[%s7959_s2] sm:$0x3] }
 0x1d0   : > { %1862 = vmatprep.mubr.f32.mxu0 %v7969_v35 }
 0x1d1   : > { %5018 = vmatpush1.bf16.msra.mxu1 %v5017_v21  ;;  %v7974_v21 = vsub.s32 1, %v6949_v16 }
 0x1d2   : > { %5019 = vmatprep.subr.bf16.mxu1 %v7967_v60 }
 0x1d3   : > { %4471 = vmatmul.mubr.msk.f32.gmra.mrb[30].mxu0 %vm518_vm3, %v6368_v22  ;;  %v6842_v22 = vpop.f32.mrb[6].mxu1 }
 0x1d4   : > { %1868 = vmatprep.mubr.f32.mxu0 %v7969_v35 }
 0x1d7   : > { %4472 = vmatmul.mubr.msk.f32.gmra.mrb[32].mxu0 %vm518_vm3, %v6377_v23  ;;  %v6845_v23 = vpop.f32.mrb[7].mxu1 }
 0x1d8   : > { %1874 = vmatprep.mubr.f32.mxu0 %v7969_v35 }
 0x1db   : > { %4473 = vmatmul.mubr.msk.f32.gmra.mrb[34].mxu0 %vm518_vm3, %v6386_v24  ;;  %v2445_v24 = vld [vmem:[%s7960_s3 + $0x80] sm:$0xff] }
 0x1dc   : > { %1880 = vmatprep.mubr.f32.mxu0 %v7969_v35 }
 0x1df   : > { %4474 = vmatmul.mubr.msk.f32.gmra.mrb[36].mxu0 %vm518_vm3, %v6395_v25  ;;  %v2446_v25 = vld [vmem:[%s7960_s3 + $0x88] sm:$0xff] }
 0x1e0   : > { %1886 = vmatprep.mubr.f32.mxu0 %v7969_v35 }
 0x1e3   : > { %4475 = vmatmul.mubr.msk.f32.gmra.mrb[38].mxu0 %vm518_vm3, %v6404_v26  ;;  %v5020_v26 = vpack.c.bf16 %v2446_v25, %v2445_v24  ;;  %v6958_v24 = vrot.slane %v1997_v20, %v7971_v19  ;;  %v6962_v25 = vrot.slane %v1997_v20, %v7974_v21 }
 0x1e4   : > { %1892 = vmatprep.mubr.f32.mxu0 %v7969_v35 }
 0x1e5   : > { %5021 = vmatpush1.bf16.msra.mxu1 %v5020_v26 }
 0x1e6   : > { %5022 = vmatprep.subr.bf16.mxu1 %v7967_v60 }
 0x1e7   : > { %4476 = vmatmul.mubr.msk.f32.gmra.mrb[40].mxu0 %vm518_vm3, %v6413_v27  ;;  %v6854_v27 = vpop.f32.mrb[8].mxu1 }
 0x1e8   : > { %1898 = vmatprep.mubr.f32.mxu0 %v7969_v35 }
 0x1eb   : > { %4477 = vmatmul.mubr.msk.f32.gmra.mrb[42].mxu0 %vm518_vm3, %v6422_v28  ;;  %v6856_v28 = vpop.f32.mrb[9].mxu1 }
 0x1ec   : > { %1904 = vmatprep.mubr.f32.mxu0 %v7969_v35  ;;  %v6865_v32 = vpop.f32.mrb[10].mxu1 }
 0x1ed   : > { %v6867_v33 = vpop.f32.mrb[11].mxu1 }
 0x1ee   : > { %v6870_v34 = vpop.f32.mrb[12].mxu1 }
 0x1ef   : > { %4478 = vmatmul.mubr.msk.f32.gmra.mrb[44].mxu0 %vm518_vm3, %v6431_v29  ;;  %v2447_v29 = vld [vmem:[%s7960_s3 + $0x90] sm:$0xff]  ;;  %v6875_v37 = vpop.f32.mrb[13].mxu1 }
 0x1f0   : > { %1910 = vmatprep.mubr.f32.mxu0 %v7969_v35  ;;  %v6877_v39 = vpop.f32.mrb[14].mxu1 }
 0x1f1   : > { %v6879_v40 = vpop.f32.mrb[15].mxu1 }
 0x1f2   : > { %v6881_v41 = vpop.f32.mrb[16].mxu1 }
 0x1f3   : > { %4479 = vmatmul.mubr.msk.f32.gmra.mrb[46].mxu0 %vm518_vm3, %v6440_v30  ;;  %v2448_v30 = vld [vmem:[%s7960_s3 + $0x98] sm:$0xff]  ;;  %v6883_v42 = vpop.f32.mrb[17].mxu1 }
 0x1f4   : > { %1916 = vmatprep.mubr.f32.mxu0 %v7969_v35  ;;  %v6885_v43 = vpop.f32.mrb[18].mxu1 }
 0x1f5   : > { %v6887_v44 = vpop.f32.mrb[19].mxu1 }
 0x1f6   : > { %v6889_v45 = vpop.f32.mrb[20].mxu1 }
 0x1f7   : > { %4480 = vmatmul.mubr.msk.f32.gmra.mrb[48].mxu0 %vm518_vm3, %v6452_v31  ;;  %v5023_v31 = vpack.c.bf16 %v2448_v30, %v2447_v29 }
 0x1f8   : > { %1922 = vmatprep.mubr.f32.mxu0 %v7969_v35 }
 0x1f9   : > { %5024 = vmatpush1.bf16.msra.mxu1 %v5023_v31 }
 0x1fa   : > { %2533 = vmatprep.subr.mxu1 %v7969_v35 }
 0x1fb   : > { %4481 = vmatmul.mubr.msk.f32.gmra.mrb[50].mxu0 %vm518_vm3, %v6584_v46  ;;  %v6891_v46 = vpop.f32.mrb[21].mxu1 }
 0x1fc   : > { %1928 = vmatprep.mubr.f32.mxu0 %v7969_v35  ;;  %v6893_v47 = vpop.f32.mrb[22].mxu1 }
 0x1fd   : > { %2534 = vmatpush1.msra.mxu1 %v2449_v36  ;;  %v6895_v48 = vpop.f32.mrb[23].mxu1 }
 0x1fe   : > { %v6897_v49 = vpop.f32.mrb[24].mxu1 }
 0x1ff   : > { %1929 = vmatmul.mubr.f32.gmra.mrb[52].mxu0 %v7969_v35  ;;  %v6899_v50 = vpop.f32.mrb[25].mxu1 }
 0x200   : > { %1934 = vmatprep.mubr.f32.mxu0 %v7969_v35  ;;  %v6901_v51 = vpop.f32.mrb[26].mxu1 }
 0x201   : > { %v6903_v52 = vpop.f32.mrb[27].mxu1 }
 0x202   : > { %v6905_v53 = vpop.f32.mrb[28].mxu1 }
 0x203   : > { %1935 = vmatmul.mubr.f32.gmra.mrb[54].mxu0 %v7969_v35  ;;  %v6907_v54 = vpop.f32.mrb[29].mxu1 }
 0x204   : > { %v6909_v56 = vpop.f32.mrb[30].mxu1 }
 0x205   : > { %v6911_v38 = vpop.f32.mrb[31].mxu1 }
 0x206   : > { %v6913_v57 = vpop.f32.mrb[32].mxu1 }
 0x207   : > { %v6915_v58 = vpop.f32.mrb[33].mxu1 }
 0x208   : > { %v6917_v61 = vpop.f32.mrb[34].mxu1 }
 0x209   : > { %v6919_v62 = vpop.f32.mrb[35].mxu1 }
 0x20a   : > { %v6921_v0 = vpop.f32.mrb[36].mxu1 }
 0x20b   : > { %v6923_v1 = vpop.f32.mrb[37].mxu1 }
 0x20c   : > { %v6925_v2 = vpop.f32.mrb[38].mxu1 }
 0x20d   : > { %v6927_v3 = vpop.f32.mrb[39].mxu1 }
 0x20e   : > { %v6929_v55 = vpop.f32.mrb[40].mxu1 }
 0x20f   : > { %v6931_v59 = vpop.f32.mrb[41].mxu1 }
 0x210   : > { %v6933_v63 = vpop.f32.mrb[42].mxu1 }
 0x211   : > { %v6935_v4 = vpop.f32.mrb[43].mxu1 }
 0x212   : > { %v6937_v5 = vpop.f32.mrb[44].mxu1 }
 0x213   : > { %v6939_v7 = vpop.f32.mrb[45].mxu1 }
 0x214   : > { %v6941_v9 = vpop.f32.mrb[46].mxu1 }
 0x215   : > { %7979 = vst [vmem:[#allocation6_spill] sm:$0xff] %v6941_v9  ;;  %v6943_v10 = vpop.f32.mrb[47].mxu1 }
 0x216   : > { %7980 = vst [vmem:[#allocation7_spill] sm:$0xff] %v6943_v10  ;;  %v6945_v11 = vpop.f32.mrb[48].mxu1 }
 0x217   : > { %7981 = vst [vmem:[#allocation8_spill] sm:$0xff] %v6945_v11  ;;  %v6947_v14 = vpop.f32.mrb[49].mxu1 }
 0x218   : > { %7982 = vst [vmem:[#allocation9_spill] sm:$0xff] %v6947_v14 }
 0x26a   : > { %v1774_v26 = vpop.f32.mrb[0].mxu0 }
 0x26b   : > { %v2009_v29 = vadd.f32 %v6958_v24, %v1774_v26  ;;  %v1776_v30 = vpop.f32.mrb[1].mxu0 }
 0x26c   : > { %v2010_v31 = vadd.f32 %v6962_v25, %v1776_v30 }
 0x26d   : > { %v4482_v36 = vmul.f32 -1.442695, %v2009_v29 }
 0x26e   : > { %v4483_v15 = vmul.f32 -1.442695, %v2010_v31  ;;  %v1780_v60 = vpop.f32.mrb[2].mxu0 }
 0x26f   : > { %5583 = vpow2.f32 %v4482_v36  ;;  %v2011_v35 = vadd.f32 %v6958_v24, %v1780_v60  ;;  %v1782_v14 = vpop.f32.mrb[3].mxu0 }
 0x270   : > { %5585 = vpow2.f32 %v4483_v15  ;;  %v2012_v19 = vadd.f32 %v6962_v25, %v1782_v14 }
 0x271   : > { %v4484_v11 = vmul.f32 -1.442695, %v2011_v35 }
 0x272   : > { %v4485_v16 = vmul.f32 -1.442695, %v2012_v19  ;;  %v1786_v20 = vpop.f32.mrb[4].mxu0 }
 0x273   : > { %5587 = vpow2.f32 %v4484_v11  ;;  %v2013_v21 = vadd.f32 %v6958_v24, %v1786_v20  ;;  %v1788_v26 = vpop.f32.mrb[5].mxu0 }
 0x274   : > { %5589 = vpow2.f32 %v4485_v16  ;;  %v2014_v30 = vadd.f32 %v6962_v25, %v1788_v26 }
 0x275   : > { %v4486_v29 = vmul.f32 -1.442695, %v2013_v21 }
 0x276   : > { %v4487_v31 = vmul.f32 -1.442695, %v2014_v30  ;;  %v1792_v10 = vpop.f32.mrb[6].mxu0 }
 0x277   : > { %5591 = vpow2.f32 %v4486_v29  ;;  %v5234_v60 = vadd.f32 %v1792_v10, %v6801_v6  ;;  %v1794_v36 = vpop.f32.mrb[7].mxu0  ;;  %v4553_v6 = vld [vmem:[%s7961_s4 + $0xb8] sm:$0xff] }
 0x278   : > { %5593 = vpow2.f32 %v4487_v31  ;;  %v5235_v14 = vadd.f32 %v1794_v36, %v6805_v8  ;;  %v4555_v8 = vld [vmem:[%s7961_s4 + $0xc8] sm:$0xff] }
 0x279   : > { %v5584_v35 = vpop.eup %5583  ;;  %v2015_v19 = vadd.f32 %v5234_v60, %v6958_v24  ;;  %v5025_v31 = vpack.c.bf16 %v4555_v8, %v4553_v6 }
 0x27a   : > { %v5586_v11 = vpop.eup %5585  ;;  %v2233_v15 = vadd.f32 1.0, %v5584_v35  ;;  %v2016_v20 = vadd.f32 %v5235_v14, %v6962_v25  ;;  %v1798_v16 = vpop.f32.mrb[8].mxu0 }
 0x27b   : > { %v2234_v9 = vadd.f32 1.0, %v5586_v11  ;;  %v4488_v26 = vmul.f32 -1.442695, %v2015_v19  ;;  %v5236_v21 = vadd.f32 %v1798_v16, %v6815_v12  ;;  %v1800_v30 = vpop.f32.mrb[9].mxu0  ;;  %5026 = vmatprep.subr.bf16.mxu1 %v5025_v31 }
 0x27c   : > { %5595 = vrcp.f32 %v2233_v15  ;;  %v4489_v10 = vmul.f32 -1.442695, %v2016_v20  ;;  %v5237_v29 = vadd.f32 %v1800_v30, %v6819_v13 }
 0x27d   : > { %v5588_v60 = vpop.eup %5587  ;;  %5597 = vrcp.f32 %v2234_v9  ;;  %v2017_v36 = vadd.f32 %v5236_v21, %v6958_v24 }
 0x27e   : > { %v5590_v14 = vpop.eup %5589  ;;  %v2235_v12 = vadd.f32 1.0, %v5588_v60  ;;  %5599 = vpow2.f32 %v4488_v26  ;;  %v2018_v35 = vadd.f32 %v5237_v29, %v6962_v25  ;;  %v1804_v19 = vpop.f32.mrb[10].mxu0 }
 0x27f   : > { %v2236_v11 = vadd.f32 1.0, %v5590_v14  ;;  %5601 = vpow2.f32 %v4489_v10  ;;  %v4490_v16 = vmul.f32 -1.442695, %v2017_v36  ;;  %v5238_v15 = vadd.f32 %v1804_v19, %v6829_v17  ;;  %v1806_v20 = vpop.f32.mrb[11].mxu0 }
 0x280   : > { %5603 = vrcp.f32 %v2235_v12  ;;  %v4491_v13 = vmul.f32 -1.442695, %v2018_v35  ;;  %v5239_v30 = vadd.f32 %v1806_v20, %v6832_v18 }
 0x281   : > { %v5592_v9 = vpop.eup %5591  ;;  %5605 = vrcp.f32 %v2236_v11  ;;  %v2019_v21 = vadd.f32 %v5238_v15, %v6958_v24 }
 0x282   : > { %v5594_v6 = vpop.eup %5593  ;;  %v2237_v26 = vadd.f32 1.0, %v5592_v9  ;;  %5607 = vpow2.f32 %v4490_v16  ;;  %v2020_v8 = vadd.f32 %v5239_v30, %v6962_v25  ;;  %v1810_v29 = vpop.f32.mrb[12].mxu0 }
 0x283   : > { %5609 = vpow2.f32 %v4491_v13  ;;  %v4492_v10 = vmul.f32 -1.442695, %v2019_v21  ;;  %v5240_v31 = vadd.f32 %v1810_v29, %v6842_v22  ;;  %v1812_v17 = vpop.f32.mrb[13].mxu0  ;;  %v2238_v60 = vadd.f32 1.0, %v5594_v6  ;;  %v4552_v22 = vld [vmem:[%s7961_s4 + $0xb0] sm:$0xff] }
 0x284   : > { %v4493_v36 = vmul.f32 -1.442695, %v2020_v8  ;;  %v5241_v14 = vadd.f32 %v1812_v17, %v6845_v23  ;;  %5611 = vrcp.f32 %v2237_v26  ;;  %v4554_v23 = vld [vmem:[%s7961_s4 + $0xc0] sm:$0xff]  ;;  %v4557_v17 = vld [vmem:[%s7961_s4 + $0xd8] sm:$0xff] }
 0x285   : > { %v2021_v18 = vadd.f32 %v5240_v31, %v6958_v24  ;;  %5613 = vpow2.f32 %v4492_v10  ;;  %v5027_v31 = vpack.c.bf16 %v4554_v23, %v4552_v22 }
 0x286   : > { %v5596_v12 = vpop.eup %5595  ;;  %v2022_v35 = vadd.f32 %v5241_v14, %v6962_v25  ;;  %v1816_v19 = vpop.f32.mrb[14].mxu0  ;;  %5615 = vpow2.f32 %v4493_v36 }
 0x287   : > { %v5598_v11 = vpop.eup %5597  ;;  %v4494_v16 = vmul.f32 -1.442695, %v2021_v18  ;;  %v5242_v15 = vadd.f32 %v1816_v19, %v6854_v27  ;;  %v1818_v20 = vpop.f32.mrb[15].mxu0  ;;  %5617 = vrcp.f32 %v2238_v60 }
 0x288   : > { %v5600_v13 = vpop.eup %5599  ;;  %v4495_v30 = vmul.f32 -1.442695, %v2022_v35  ;;  %v5243_v9 = vadd.f32 %v1818_v20, %v6856_v28  ;;  %v4559_v28 = vld [vmem:[%s7961_s4 + $0xe8] sm:$0xff] }
 0x289   : > { %v5602_v21 = vpop.eup %5601  ;;  %v2239_v6 = vadd.f32 1.0, %v5600_v13  ;;  %5619 = vpow2.f32 %v4494_v16  ;;  %v2023_v26 = vadd.f32 %v5242_v15, %v6958_v24 }
 0x28a   : > { %v5604_v27 = vpop.eup %5603  ;;  %v2240_v8 = vadd.f32 1.0, %v5602_v21  ;;  %5621 = vpow2.f32 %v4495_v30  ;;  %v2024_v29 = vadd.f32 %v5243_v9, %v6962_v25  ;;  %v1822_v10 = vpop.f32.mrb[16].mxu0  ;;  %v5029_v30 = vpack.c.bf16 %v4559_v28, %v4557_v17  ;;  %v4556_v9 = vld [vmem:[%s7961_s4 + $0xd0] sm:$0xff] }
 0x28b   : > { %v5606_v60 = vpop.eup %5605  ;;  %5623 = vrcp.f32 %v2239_v6  ;;  %v4496_v36 = vmul.f32 -1.442695, %v2023_v26  ;;  %v5244_v14 = vadd.f32 %v1822_v10, %v6865_v32  ;;  %v1824_v18 = vpop.f32.mrb[17].mxu0  ;;  %v2401_v35 = vadd.f32 %v5604_v27, %v5596_v12  ;;  %v4558_v32 = vld [vmem:[%s7961_s4 + $0xe0] sm:$0xff]  ;;  %v4563_v6 = vld [vmem:[%s7961_s4 + $0x108] sm:$0xff] }
 0x28c   : > { %v5608_v19 = vpop.eup %5607  ;;  %5625 = vrcp.f32 %v2240_v8  ;;  %v4497_v16 = vmul.f32 -1.442695, %v2024_v29  ;;  %v5245_v15 = vadd.f32 %v1824_v18, %v6867_v33  ;;  %v2402_v20 = vadd.f32 %v5606_v60, %v5598_v11  ;;  %v4561_v11 = vld [vmem:[%s7961_s4 + $0xf8] sm:$0xff] }
 0x28d   : > { %v5610_v22 = vpop.eup %5609  ;;  %v2241_v23 = vadd.f32 1.0, %v5608_v19  ;;  %5627 = vpow2.f32 %v4496_v36  ;;  %v2025_v13 = vadd.f32 %v5244_v14, %v6958_v24  ;;  %v5031_v60 = vpack.c.bf16 %v4558_v32, %v4556_v9  ;;  %v4560_v36 = vld [vmem:[%s7961_s4 + $0xf0] sm:$0xff]  ;;  %v4562_v14 = vld [vmem:[%s7961_s4 + $0x100] sm:$0xff] }
 0x28e   : > { %v2242_v12 = vadd.f32 1.0, %v5610_v22  ;;  %5629 = vpow2.f32 %v4497_v16  ;;  %v2026_v21 = vadd.f32 %v5245_v15, %v6962_v25  ;;  %v1828_v33 = vpop.f32.mrb[18].mxu0  ;;  %4538 = vmatprep.mubr.msk.f32.mxu1 %vm2450_vm4, %v2402_v20  ;;  %v5612_v26 = vpop.eup %5611  ;;  %v5035_v9 = vpack.c.bf16 %v4562_v14, %v4560_v36 }
 0x28f   : > { %5631 = vrcp.f32 %v2241_v23  ;;  %v4498_v27 = vmul.f32 -1.442695, %v2025_v13  ;;  %v5246_v8 = vadd.f32 %v1828_v33, %v6870_v34  ;;  %v1830_v29 = vpop.f32.mrb[19].mxu0  ;;  %2558 = vmatmul.mubr.f32.vlgmr.msra.gmra.mrb[50].mxu1 %v2401_v35  ;;  %v5614_v10 = vpop.eup %5613  ;;  %v5033_v35 = vpack.c.bf16 %v4563_v6, %v4561_v11 }
 0x290   : > { %5633 = vrcp.f32 %v2242_v12  ;;  %v4499_v17 = vmul.f32 -1.442695, %v2026_v21  ;;  %v5247_v28 = vadd.f32 %v1830_v29, %v6875_v37  ;;  %5028 = vmatpush1.bf16.msra.mxu1 %v5027_v31  ;;  %v5616_v18 = vpop.eup %5615  ;;  %v2243_v19 = vadd.f32 1.0, %v5614_v10 }
 0x291   : > { %5635 = vpow2.f32 %v4498_v27  ;;  %v2027_v34 = vadd.f32 %v5246_v8, %v6958_v24  ;;  %5030 = vmatprep.subr.bf16.mxu1 %v5029_v30  ;;  %v5618_v16 = vpop.eup %5617  ;;  %v2244_v15 = vadd.f32 1.0, %v5616_v18 }
 0x292   : > { %5637 = vpow2.f32 %v4499_v17  ;;  %v2028_v37 = vadd.f32 %v5247_v28, %v6962_v25  ;;  %v1834_v31 = vpop.f32.mrb[20].mxu0 }
 0x293   : > { %v5620_v20 = vpop.eup %5619  ;;  %5639 = vrcp.f32 %v2243_v19  ;;  %v4500_v22 = vmul.f32 -1.442695, %v2027_v34  ;;  %v5248_v23 = vadd.f32 %v1834_v31, %v6877_v39  ;;  %v1836_v13 = vpop.f32.mrb[21].mxu0 }
 0x294   : > { %v5622_v32 = vpop.eup %5621  ;;  %5641 = vrcp.f32 %v2244_v15  ;;  %v2245_v12 = vadd.f32 1.0, %v5620_v20  ;;  %v4501_v21 = vmul.f32 -1.442695, %v2028_v37  ;;  %v5249_v30 = vadd.f32 %v1836_v13, %v6879_v40  ;;  %5032 = vmatpush1.bf16.msra.mxu1 %v5031_v60 }
 0x295   : > { %v5624_v33 = vpop.eup %5623  ;;  %v2246_v11 = vadd.f32 1.0, %v5622_v32  ;;  %5643 = vpow2.f32 %v4500_v22  ;;  %v2029_v6 = vadd.f32 %v5248_v23, %v6958_v24  ;;  %5034 = vmatprep.subr.bf16.mxu1 %v5033_v35 }
 0x296   : > { %v5626_v27 = vpop.eup %5625  ;;  %5645 = vrcp.f32 %v2245_v12  ;;  %v2030_v8 = vadd.f32 %v5249_v30, %v6962_v25  ;;  %v1840_v39 = vpop.f32.mrb[22].mxu0  ;;  %v2403_v29 = vadd.f32 %v5624_v33, %v5612_v26 }
 0x297   : > { %v5628_v10 = vpop.eup %5627  ;;  %5647 = vrcp.f32 %v2246_v11  ;;  %v4502_v17 = vmul.f32 -1.442695, %v2029_v6  ;;  %v5250_v28 = vadd.f32 %v1840_v39, %v6881_v41  ;;  %v1842_v36 = vpop.f32.mrb[23].mxu0  ;;  %v2404_v40 = vadd.f32 %v5626_v27, %v5618_v16 }
 0x298   : > { %v5630_v60 = vpop.eup %5629  ;;  %v2247_v14 = vadd.f32 1.0, %v5628_v10  ;;  %5649 = vpow2.f32 %v4501_v21  ;;  %v4503_v18 = vmul.f32 -1.442695, %v2030_v8  ;;  %v5251_v19 = vadd.f32 %v1842_v36, %v6883_v42  ;;  %5036 = vmatpush1.bf16.msra.mxu1 %v5035_v9 }
 0x299   : > { %v5632_v34 = vpop.eup %5631  ;;  %v2248_v35 = vadd.f32 1.0, %v5630_v60  ;;  %5651 = vpow2.f32 %v4502_v17  ;;  %v2031_v15 = vadd.f32 %v5250_v28, %v6958_v24  ;;  %4539 = vmatprep.mubr.msk.f32.mxu1 %vm2450_vm4, %v2404_v40 }
 0x29a   : > { %v5634_v26 = vpop.eup %5633  ;;  %5653 = vrcp.f32 %v2247_v14  ;;  %v2032_v41 = vadd.f32 %v5251_v19, %v6962_v25  ;;  %2563 = vmatmul.mubr.f32.gmra.mrb[52].mxu1 %v2403_v29  ;;  %v1846_v16 = vpop.f32.mrb[24].mxu0 }
 0x29b   : > { %v5636_v37 = vpop.eup %5635  ;;  %5655 = vrcp.f32 %v2248_v35  ;;  %v4504_v31 = vmul.f32 -1.442695, %v2031_v15  ;;  %v5252_v20 = vadd.f32 %v1846_v16, %v6885_v43  ;;  %v1848_v42 = vpop.f32.mrb[25].mxu0 }
 0x29c   : > { %v5638_v22 = vpop.eup %5637  ;;  %v2249_v23 = vadd.f32 1.0, %v5636_v37  ;;  %5657 = vpow2.f32 %v4503_v18  ;;  %v4505_v13 = vmul.f32 -1.442695, %v2032_v41  ;;  %v5253_v9 = vadd.f32 %v1848_v42, %v6887_v44 }
 0x29d   : > { %v5640_v32 = vpop.eup %5639  ;;  %5659 = vpow2.f32 %v4504_v31  ;;  %v2033_v12 = vadd.f32 %v5252_v20, %v6958_v24  ;;  %v2250_v30 = vadd.f32 1.0, %v5638_v22 }
 0x29e   : > { %v5642_v21 = vpop.eup %5641  ;;  %v2034_v33 = vadd.f32 %v5253_v9, %v6962_v25  ;;  %v1852_v11 = vpop.f32.mrb[26].mxu0  ;;  %v2405_v6 = vadd.f32 %v5640_v32, %v5632_v34  ;;  %5661 = vrcp.f32 %v2249_v23 }
 0x29f   : > { %v5644_v27 = vpop.eup %5643  ;;  %v4506_v43 = vmul.f32 -1.442695, %v2033_v12  ;;  %v5254_v8 = vadd.f32 %v1852_v11, %v6889_v45  ;;  %v1854_v39 = vpop.f32.mrb[27].mxu0  ;;  %v2406_v29 = vadd.f32 %v5642_v21, %v5634_v26  ;;  %5663 = vpow2.f32 %v4505_v13 }
 0x2a0   : > { %v5646_v10 = vpop.eup %5645  ;;  %v2251_v17 = vadd.f32 1.0, %v5644_v27  ;;  %v4507_v44 = vmul.f32 -1.442695, %v2034_v33  ;;  %v5255_v28 = vadd.f32 %v1854_v39, %v6891_v46 }
 0x2a1   : > { %v5648_v36 = vpop.eup %5647  ;;  %5665 = vpow2.f32 %v4506_v43  ;;  %v2035_v40 = vadd.f32 %v5254_v8, %v6958_v24  ;;  %4540 = vmatprep.mubr.msk.f32.mxu1 %vm2450_vm4, %v2406_v29 }
 0x2a2   : > { %v5650_v60 = vpop.eup %5649  ;;  %5667 = vrcp.f32 %v2251_v17  ;;  %v2036_v14 = vadd.f32 %v5255_v28, %v6962_v25  ;;  %2568 = vmatmul.mubr.f32.gmra.mrb[54].mxu1 %v2405_v6  ;;  %v1858_v45 = vpop.f32.mrb[28].mxu0 }
 0x2a3   : > { %v5652_v18 = vpop.eup %5651  ;;  %v2252_v19 = vadd.f32 1.0, %v5650_v60  ;;  %5669 = vpow2.f32 %v4507_v44  ;;  %v4508_v34 = vmul.f32 -1.442695, %v2035_v40  ;;  %v5256_v35 = vadd.f32 %v1858_v45, %v6893_v47  ;;  %v1860_v15 = vpop.f32.mrb[29].mxu0 }
 0x2a4   : > { %v5654_v46 = vpop.eup %5653  ;;  %5671 = vrcp.f32 %v2250_v30  ;;  %v2253_v26 = vadd.f32 1.0, %v5652_v18  ;;  %v4509_v41 = vmul.f32 -1.442695, %v2036_v14  ;;  %v5257_v16 = vadd.f32 %v1860_v15, %v6895_v48 }
 0x2a5   : > { %v5656_v37 = vpop.eup %5655  ;;  %5673 = vrcp.f32 %v2252_v19  ;;  %v2037_v31 = vadd.f32 %v5256_v35, %v6958_v24  ;;  %v2407_v20 = vadd.f32 %v5654_v46, %v5646_v10 }
 0x2a6   : > { %v5658_v42 = vpop.eup %5657  ;;  %5675 = vrcp.f32 %v2253_v26  ;;  %v2038_v22 = vadd.f32 %v5257_v16, %v6962_v25  ;;  %v1864_v23 = vpop.f32.mrb[30].mxu0  ;;  %v2408_v13 = vadd.f32 %v5656_v37, %v5648_v36 }
 0x2a7   : > { %v5660_v9 = vpop.eup %5659  ;;  %v2254_v47 = vadd.f32 1.0, %v5658_v42  ;;  %5677 = vpow2.f32 %v4508_v34  ;;  %v4510_v32 = vmul.f32 -1.442695, %v2037_v31  ;;  %v5258_v12 = vadd.f32 %v1864_v23, %v6897_v49  ;;  %v1866_v21 = vpop.f32.mrb[31].mxu0 }
 0x2a8   : > { %v2255_v30 = vadd.f32 1.0, %v5660_v9  ;;  %5679 = vpow2.f32 %v4509_v41  ;;  %v4511_v48 = vmul.f32 -1.442695, %v2038_v22  ;;  %v5259_v33 = vadd.f32 %v1866_v21, %v6899_v50  ;;  %4541 = vmatprep.mubr.msk.f32.mxu1 %vm2450_vm4, %v2408_v13  ;;  %v5662_v11 = vpop.eup %5661 }
 0x2a9   : > { %5681 = vrcp.f32 %v2254_v47  ;;  %v2039_v6 = vadd.f32 %v5258_v12, %v6958_v24  ;;  %2573 = vmatmul.mubr.f32.gmra.mrb[56].mxu1 %v2407_v20  ;;  %v5664_v27 = vpop.eup %5663 }
 0x2aa   : > { %5683 = vrcp.f32 %v2255_v30  ;;  %v2040_v43 = vadd.f32 %v5259_v33, %v6962_v25  ;;  %v1870_v8 = vpop.f32.mrb[32].mxu0  ;;  %v2256_v49 = vadd.f32 1.0, %v5664_v27 }
 0x2ab   : > { %v5666_v39 = vpop.eup %5665  ;;  %5685 = vpow2.f32 %v4510_v32  ;;  %v4512_v29 = vmul.f32 -1.442695, %v2039_v6  ;;  %v5260_v10 = vadd.f32 %v1870_v8, %v6901_v51  ;;  %v1872_v17 = vpop.f32.mrb[33].mxu0 }
 0x2ac   : > { %v5668_v50 = vpop.eup %5667  ;;  %v2257_v44 = vadd.f32 1.0, %v5666_v39  ;;  %5687 = vpow2.f32 %v4511_v48  ;;  %v5261_v28 = vadd.f32 %v1872_v17, %v6903_v52  ;;  %v4513_v40 = vmul.f32 -1.442695, %v2040_v43 }
 0x2ad   : > { %v5670_v36 = vpop.eup %5669  ;;  %5689 = vrcp.f32 %v2256_v49  ;;  %v2041_v60 = vadd.f32 %v5260_v10, %v6958_v24  ;;  %v2409_v14 = vadd.f32 %v5668_v50, %v5662_v11 }
 0x2ae   : > { %v5672_v45 = vpop.eup %5671  ;;  %5691 = vrcp.f32 %v2257_v44  ;;  %v2258_v18 = vadd.f32 1.0, %v5670_v36  ;;  %v2042_v19 = vadd.f32 %v5261_v28, %v6962_v25  ;;  %v1876_v34 = vpop.f32.mrb[34].mxu0 }
 0x2af   : > { %v5674_v35 = vpop.eup %5673  ;;  %5693 = vpow2.f32 %v4512_v29  ;;  %v4514_v51 = vmul.f32 -1.442695, %v2041_v60  ;;  %v5262_v15 = vadd.f32 %v1876_v34, %v6905_v53  ;;  %v1878_v46 = vpop.f32.mrb[35].mxu0 }
 0x2b0   : > { %v5676_v26 = vpop.eup %5675  ;;  %5695 = vrcp.f32 %v2258_v18  ;;  %v4515_v52 = vmul.f32 -1.442695, %v2042_v19  ;;  %v5263_v41 = vadd.f32 %v1878_v46, %v6907_v54  ;;  %v2410_v16 = vadd.f32 %v5674_v35, %v5672_v45 }
 0x2b1   : > { %v5678_v37 = vpop.eup %5677  ;;  %5697 = vpow2.f32 %v4513_v40  ;;  %v2043_v31 = vadd.f32 %v5262_v15, %v6958_v24 }
 0x2b2   : > { %v5680_v20 = vpop.eup %5679  ;;  %v2259_v42 = vadd.f32 1.0, %v5678_v37  ;;  %5699 = vpow2.f32 %v4514_v51  ;;  %v2044_v22 = vadd.f32 %v5263_v41, %v6962_v25  ;;  %4542 = vmatprep.mubr.msk.f32.mxu1 %vm2450_vm4, %v2410_v16  ;;  %v1882_v23 = vpop.f32.mrb[36].mxu0 }
 0x2b3   : > { %v5682_v53 = vpop.eup %5681  ;;  %v2260_v13 = vadd.f32 1.0, %v5680_v20  ;;  %5701 = vpow2.f32 %v4515_v52  ;;  %v4516_v9 = vmul.f32 -1.442695, %v2043_v31  ;;  %2578 = vmatmul.mubr.f32.gmra.mrb[58].mxu1 %v2409_v14  ;;  %v5264_v54 = vadd.f32 %v1882_v23, %v6909_v56  ;;  %v1884_v47 = vpop.f32.mrb[37].mxu0 }
 0x2b4   : > { %v5684_v32 = vpop.eup %5683  ;;  %5703 = vrcp.f32 %v2259_v42  ;;  %v4517_v12 = vmul.f32 -1.442695, %v2044_v22  ;;  %v5265_v21 = vadd.f32 %v1884_v47, %v6911_v38 }
 0x2b5   : > { %v5686_v30 = vpop.eup %5685  ;;  %5705 = vrcp.f32 %v2260_v13  ;;  %v2045_v48 = vadd.f32 %v5264_v54, %v6958_v24  ;;  %v2411_v33 = vadd.f32 %v5684_v32, %v5676_v26 }
 0x2b6   : > { %v5688_v11 = vpop.eup %5687  ;;  %v2261_v6 = vadd.f32 1.0, %v5686_v30  ;;  %5707 = vpow2.f32 %v4516_v9  ;;  %v2046_v27 = vadd.f32 %v5265_v21, %v6962_v25  ;;  %v1888_v43 = vpop.f32.mrb[38].mxu0 }
 0x2b7   : > { %v5690_v8 = vpop.eup %5689  ;;  %v2262_v39 = vadd.f32 1.0, %v5688_v11  ;;  %5709 = vpow2.f32 %v4517_v12  ;;  %v4518_v56 = vmul.f32 -1.442695, %v2045_v48  ;;  %v5266_v49 = vadd.f32 %v1888_v43, %v6913_v57  ;;  %v1890_v29 = vpop.f32.mrb[39].mxu0 }
 0x2b8   : > { %v5692_v10 = vpop.eup %5691  ;;  %5711 = vrcp.f32 %v2261_v6  ;;  %v4519_v38 = vmul.f32 -1.442695, %v2046_v27  ;;  %v5267_v17 = vadd.f32 %v1890_v29, %v6915_v58  ;;  %v2412_v50 = vadd.f32 %v5690_v8, %v5682_v53 }
 0x2b9   : > { %v5694_v44 = vpop.eup %5693  ;;  %5713 = vrcp.f32 %v2262_v39  ;;  %v2047_v28 = vadd.f32 %v5266_v49, %v6958_v24 }
 0x2ba   : > { %v5696_v36 = vpop.eup %5695  ;;  %v2263_v40 = vadd.f32 1.0, %v5694_v44  ;;  %5715 = vpow2.f32 %v4518_v56  ;;  %v2048_v60 = vadd.f32 %v5267_v17, %v6962_v25  ;;  %4543 = vmatprep.mubr.msk.f32.mxu1 %vm2450_vm4, %v2412_v50  ;;  %v1894_v14 = vpop.f32.mrb[40].mxu0 }
 0x2bb   : > { %v5698_v57 = vpop.eup %5697  ;;  %5717 = vpow2.f32 %v4519_v38  ;;  %v4520_v45 = vmul.f32 -1.442695, %v2047_v28  ;;  %2583 = vmatmul.mubr.f32.gmra.mrb[60].mxu1 %v2411_v33  ;;  %v5268_v18 = vadd.f32 %v1894_v14, %v6917_v61  ;;  %v1896_v58 = vpop.f32.mrb[41].mxu0 }
 0x2bc   : > { %v5700_v19 = vpop.eup %5699  ;;  %5719 = vrcp.f32 %v2263_v40  ;;  %v2264_v34 = vadd.f32 1.0, %v5698_v57  ;;  %v5269_v35 = vadd.f32 %v1896_v58, %v6919_v62  ;;  %v4521_v46 = vmul.f32 -1.442695, %v2048_v60 }
 0x2bd   : > { %v5702_v51 = vpop.eup %5701  ;;  %v2265_v15 = vadd.f32 1.0, %v5700_v19  ;;  %5721 = vpow2.f32 %v4520_v45  ;;  %v2049_v26 = vadd.f32 %v5268_v18, %v6958_v24 }
 0x2be   : > { %v5704_v52 = vpop.eup %5703  ;;  %5723 = vrcp.f32 %v2264_v34  ;;  %v2266_v41 = vadd.f32 1.0, %v5702_v51  ;;  %v2050_v16 = vadd.f32 %v5269_v35, %v6962_v25  ;;  %v1900_v37 = vpop.f32.mrb[42].mxu0 }
 0x2bf   : > { %v5706_v31 = vpop.eup %5705  ;;  %5725 = vrcp.f32 %v2265_v15  ;;  %v4522_v61 = vmul.f32 -1.442695, %v2049_v26  ;;  %v5270_v20 = vadd.f32 %v1900_v37, %v6921_v0  ;;  %v1902_v42 = vpop.f32.mrb[43].mxu0  ;;  %v2413_v22 = vadd.f32 %v5704_v52, %v5692_v10 }
 0x2c0   : > { %v5708_v62 = vpop.eup %5707  ;;  %5727 = vrcp.f32 %v2266_v41  ;;  %v5271_v23 = vadd.f32 %v1902_v42, %v6923_v1  ;;  %v2414_v53 = vadd.f32 %v5706_v31, %v5696_v36  ;;  %v4523_v54 = vmul.f32 -1.442695, %v2050_v16 }
 0x2c1   : > { %v5710_v13 = vpop.eup %5709  ;;  %v2267_v9 = vadd.f32 1.0, %v5708_v62  ;;  %5729 = vpow2.f32 %v4521_v46  ;;  %v2051_v47 = vadd.f32 %v5270_v20, %v6958_v24 }
 0x2c2   : > { %v5712_v32 = vpop.eup %5711  ;;  %v2268_v12 = vadd.f32 1.0, %v5710_v13  ;;  %5731 = vpow2.f32 %v4522_v61  ;;  %v2052_v21 = vadd.f32 %v5271_v23, %v6962_v25  ;;  %4544 = vmatprep.mubr.msk.f32.mxu1 %vm2450_vm4, %v2414_v53  ;;  %v1906_v0 = vpop.f32.mrb[44].mxu0 }
 0x2c3   : > { %v5714_v30 = vpop.eup %5713  ;;  %5733 = vrcp.f32 %v2267_v9  ;;  %v4524_v48 = vmul.f32 -1.442695, %v2051_v47  ;;  %2588 = vmatmul.mubr.f32.gmra.mrb[62].mxu1 %v2413_v22  ;;  %v5272_v1 = vadd.f32 %v1906_v0, %v6925_v2  ;;  %v1908_v33 = vpop.f32.mrb[45].mxu0 }
 0x2c4   : > { %v5716_v11 = vpop.eup %5715  ;;  %5735 = vrcp.f32 %v2268_v12  ;;  %v5273_v6 = vadd.f32 %v1908_v33, %v6927_v3  ;;  %v4525_v8 = vmul.f32 -1.442695, %v2052_v21 }
 0x2c5   : > { %v5718_v27 = vpop.eup %5717  ;;  %v2269_v43 = vadd.f32 1.0, %v5716_v11  ;;  %5737 = vpow2.f32 %v4523_v54  ;;  %v2053_v39 = vadd.f32 %v5272_v1, %v6958_v24 }
 0x2c6   : > { %v5720_v56 = vpop.eup %5719  ;;  %v2270_v49 = vadd.f32 1.0, %v5718_v27  ;;  %5739 = vpow2.f32 %v4524_v48  ;;  %v2054_v29 = vadd.f32 %v5273_v6, %v6962_v25  ;;  %v1912_v10 = vpop.f32.mrb[46].mxu0  ;;  %v7985_v6 = vld [vmem:[#allocation7_spill] sm:$0xff] }
 0x2c7   : > { %v5722_v38 = vpop.eup %5721  ;;  %5741 = vrcp.f32 %v2269_v43  ;;  %v4526_v2 = vmul.f32 -1.442695, %v2053_v39  ;;  %v5274_v17 = vadd.f32 %v1912_v10, %v6929_v55  ;;  %v1914_v50 = vpop.f32.mrb[47].mxu0  ;;  %v2415_v44 = vadd.f32 %v5720_v56, %v5712_v32 }
 0x2c8   : > { %v5724_v3 = vpop.eup %5723  ;;  %5743 = vrcp.f32 %v2270_v49  ;;  %v2271_v28 = vadd.f32 1.0, %v5722_v38  ;;  %v4527_v36 = vmul.f32 -1.442695, %v2054_v29  ;;  %v5275_v40 = vadd.f32 %v1914_v50, %v6931_v59  ;;  %v7986_v50 = vld [vmem:[#allocation8_spill] sm:$0xff] }
 0x2c9   : > { %v5726_v60 = vpop.eup %5725  ;;  %5745 = vpow2.f32 %v4525_v8  ;;  %v2055_v14 = vadd.f32 %v5274_v17, %v6958_v24  ;;  %v2416_v57 = vadd.f32 %v5724_v3, %v5714_v30  ;;  %v7984_v30 = vld [vmem:[#allocation6_spill] sm:$0xff] }
 0x2ca   : > { %v5728_v45 = vpop.eup %5727  ;;  %5747 = vrcp.f32 %v2271_v28  ;;  %v2056_v18 = vadd.f32 %v5275_v40, %v6962_v25  ;;  %v1918_v58 = vpop.f32.mrb[48].mxu0 }
 0x2cb   : > { %v5730_v19 = vpop.eup %5729  ;;  %5749 = vpow2.f32 %v4526_v2  ;;  %v4528_v55 = vmul.f32 -1.442695, %v2055_v14  ;;  %4545 = vmatprep.mubr.msk.f32.mxu1 %vm2450_vm4, %v2416_v57  ;;  %v5276_v34 = vadd.f32 %v1918_v58, %v6933_v63  ;;  %v1920_v35 = vpop.f32.mrb[49].mxu0 }
 0x2cc   : > { %v5732_v51 = vpop.eup %5731  ;;  %v2272_v59 = vadd.f32 1.0, %v5730_v19  ;;  %5751 = vpow2.f32 %v4527_v36  ;;  %v4529_v15 = vmul.f32 -1.442695, %v2056_v18  ;;  %2593 = vmatmul.mubr.f32.gmra.mrb[64].mxu1 %v2415_v44  ;;  %v5277_v46 = vadd.f32 %v1920_v35, %v6935_v4 }
 0x2cd   : > { %v5734_v26 = vpop.eup %5733  ;;  %v2273_v52 = vadd.f32 1.0, %v5732_v51  ;;  %5753 = vpow2.f32 %v4528_v55  ;;  %v2057_v41 = vadd.f32 %v5276_v34, %v6958_v24 }
 0x2ce   : > { %v5736_v16 = vpop.eup %5735  ;;  %5755 = vrcp.f32 %v2272_v59  ;;  %v2058_v37 = vadd.f32 %v5277_v46, %v6962_v25  ;;  %v1924_v31 = vpop.f32.mrb[50].mxu0  ;;  %v2417_v61 = vadd.f32 %v5734_v26, %v5726_v60  ;;  %v7987_v60 = vld [vmem:[#allocation9_spill] sm:$0xff] }
 0x2cf   : > { %v5738_v63 = vpop.eup %5737  ;;  %5757 = vrcp.f32 %v2273_v52  ;;  %v4530_v20 = vmul.f32 -1.442695, %v2057_v41  ;;  %v5278_v42 = vadd.f32 %v1924_v31, %v6937_v5  ;;  %v1926_v22 = vpop.f32.mrb[51].mxu0  ;;  %v2418_v62 = vadd.f32 %v5736_v16, %v5728_v45 }
 0x2d0   : > { %v5740_v23 = vpop.eup %5739  ;;  %v2274_v4 = vadd.f32 1.0, %v5738_v63  ;;  %5759 = vpow2.f32 %v4529_v15  ;;  %v4531_v53 = vmul.f32 -1.442695, %v2058_v37  ;;  %v5279_v13 = vadd.f32 %v1926_v22, %v6939_v7  ;;  %v4567_v22 = vld [vmem:[%s7961_s4 + $0x128] sm:$0xff] }
 0x2d1   : > { %v5742_v9 = vpop.eup %5741  ;;  %v2275_v54 = vadd.f32 1.0, %v5740_v23  ;;  %5761 = vpow2.f32 %v4530_v20  ;;  %v2059_v47 = vadd.f32 %v5278_v42, %v6958_v24  ;;  %4546 = vmatprep.mubr.msk.f32.mxu1 %vm2450_vm4, %v2418_v62  ;;  %v4565_v42 = vld [vmem:[%s7961_s4 + $0x118] sm:$0xff]  ;;  %v4564_v62 = vld [vmem:[%s7961_s4 + $0x110] sm:$0xff] }
 0x2d2   : > { %v5744_v32 = vpop.eup %5743  ;;  %5763 = vrcp.f32 %v2274_v4  ;;  %v2060_v12 = vadd.f32 %v5279_v13, %v6962_v25  ;;  %2598 = vmatmul.mubr.f32.gmra.mrb[66].mxu1 %v2417_v61  ;;  %v1930_v5 = vpop.f32.mrb[52].mxu0  ;;  %v5037_v4 = vpack.c.bf16 %v4567_v22, %v4565_v42  ;;  %v4569_v13 = vld [vmem:[%s7961_s4 + $0x138] sm:$0xff]  ;;  %v2640_v42 = vld [vmem:[%s7961_s4 + $0x60] sm:$0xff]  ;;  %v2642_v22 = vld [vmem:[%s7961_s4 + $0x70] sm:$0xff] }
 0x2d3   : > { %v5746_v21 = vpop.eup %5745  ;;  %5765 = vrcp.f32 %v2275_v54  ;;  %v4532_v0 = vmul.f32 -1.442695, %v2059_v47  ;;  %v5280_v48 = vadd.f32 %v1930_v5, %v7984_v30  ;;  %v1932_v1 = vpop.f32.mrb[53].mxu0  ;;  %v4568_v5 = vld [vmem:[%s7961_s4 + $0x130] sm:$0xff] }
 0x2d4   : > { %v5748_v7 = vpop.eup %5747  ;;  %v2276_v33 = vadd.f32 1.0, %v5746_v21  ;;  %5767 = vpow2.f32 %v4531_v53  ;;  %v4533_v11 = vmul.f32 -1.442695, %v2060_v12  ;;  %v5281_v27 = vadd.f32 %v1932_v1, %v7985_v6  ;;  %v4566_v53 = vld [vmem:[%s7961_s4 + $0x120] sm:$0xff]  ;;  %5038 = vmatprep.subr.bf16.mxu1 %v5037_v4  ;;  %v2647_v4 = vld [vmem:[%s7961_s4 + $0x98] sm:$0xff] }
 0x2d5   : > { %v5750_v43 = vpop.eup %5749  ;;  %5769 = vpow2.f32 %v4532_v0  ;;  %v2061_v8 = vadd.f32 %v5280_v48, %v6958_v24  ;;  %v2419_v39 = vadd.f32 %v5748_v7, %v5742_v9  ;;  %v4571_v9 = vld [vmem:[%s7961_s4 + $0x148] sm:$0xff]  ;;  %v4570_v21 = vld [vmem:[%s7961_s4 + $0x140] sm:$0xff] }
 0x2d6   : > { %v5752_v56 = vpop.eup %5751  ;;  %5771 = vrcp.f32 %v2276_v33  ;;  %v2277_v49 = vadd.f32 1.0, %v5750_v43  ;;  %v2062_v29 = vadd.f32 %v5281_v27, %v6962_v25  ;;  %v1936_v10 = vpop.f32.mrb[54].mxu0  ;;  %v5041_v12 = vpack.c.bf16 %v4571_v9, %v4569_v13  ;;  %v4573_v43 = vld [vmem:[%s7961_s4 + $0x158] sm:$0xf] }
 0x2d7   : > { %v5754_v38 = vpop.eup %5753  ;;  %v2278_v2 = vadd.f32 1.0, %v5752_v56  ;;  %5773 = vpow2.f32 %v4533_v11  ;;  %v4534_v17 = vmul.f32 -1.442695, %v2061_v8  ;;  %v5282_v44 = vadd.f32 %v1936_v10, %v7986_v50  ;;  %v1938_v3 = vpop.f32.mrb[55].mxu0  ;;  %v4572_v10 = vld [vmem:[%s7961_s4 + $0x150] sm:$0xf] }
 0x2d8   : > { %v5756_v28 = vpop.eup %5755  ;;  %5775 = vrcp.f32 %v2277_v49  ;;  %v2279_v36 = vadd.f32 1.0, %v5754_v38  ;;  %v4535_v40 = vmul.f32 -1.442695, %v2062_v29  ;;  %v5283_v14 = vadd.f32 %v1938_v3, %v7987_v60  ;;  %v2629_v60 = vld [vmem:[%s7961_s4 + $0x8] sm:$0xff] }
 0x2d9   : > { %v5758_v57 = vpop.eup %5757  ;;  %5777 = vrcp.f32 %v2278_v2  ;;  %v2063_v45 = vadd.f32 %v5282_v44, %v6958_v24  ;;  %v2420_v18 = vadd.f32 %v5756_v28, %v5744_v32  ;;  %v5039_v32 = vpack.c.bf16 %v4566_v53, %v4564_v62 }
 0x2da   : > { %v5760_v58 = vpop.eup %5759  ;;  %5779 = vrcp.f32 %v2279_v36  ;;  %v2064_v19 = vadd.f32 %v5283_v14, %v6962_v25  ;;  %v5043_v33 = vpack.c.bf16 %v4570_v21, %v4568_v5  ;;  %v2631_v14 = vld [vmem:[%s7961_s4 + $0x18] sm:$0xff]  ;;  %v5059_v13 = vpack.c.bf16 %v2642_v22, %v2640_v42  ;;  %v2649_v21 = vld [vmem:[%s7961_s4 + $0xa8] sm:$0xf] }
 0x2db   : > { %v5762_v55 = vpop.eup %5761  ;;  %v2280_v34 = vadd.f32 1.0, %v5760_v58  ;;  %5781 = vpow2.f32 %v4534_v17  ;;  %v4536_v35 = vmul.f32 -1.442695, %v2063_v45  ;;  %4547 = vmatprep.mubr.msk.f32.mxu1 %vm2450_vm4, %v2420_v18  ;;  %5040 = vmatpush1.bf16.msra.mxu1 %v5039_v32  ;;  %v2628_v58 = vld [vmem:[%s7961_s4] sm:$0xff]  ;;  %v4619_v42 = vld [vmem:[%s7961_s4 + $0x208] sm:$0xf] }
 0x2dc   : > { %v5764_v51 = vpop.eup %5763  ;;  %5783 = vpow2.f32 %v4535_v40  ;;  %v4537_v59 = vmul.f32 -1.442695, %v2064_v19  ;;  %2603 = vmatmul.mubr.f32.gmra.mrb[68].mxu1 %v2419_v39  ;;  %v2281_v46 = vadd.f32 1.0, %v5762_v55  ;;  %5042 = vmatprep.subr.bf16.mxu1 %v5041_v12  ;;  %v7988_v40 = vmov 0.0   ;;  %v2630_v19 = vld [vmem:[%s7961_s4 + $0x10] sm:$0xff]  ;;  %v2633_v55 = vld [vmem:[%s7961_s4 + $0x28] sm:$0xff] }
 0x2dd   : > { %v5766_v15 = vpop.eup %5765  ;;  %5785 = vrcp.f32 %v2280_v34  ;;  %v2635_v34 = vld [vmem:[%s7961_s4 + $0x38] sm:$0xff] }
 0x2de   : > { %v5768_v26 = vpop.eup %5767  ;;  %v2421_v24 = vadd.f32 %v5766_v15, %v5758_v57  ;;  %5787 = vpow2.f32 %v4536_v35  ;;  %v5045_v57 = vpack.c.bf16 %v2631_v14, %v2629_v60  ;;  %v5047_v35 = vpack.c.bf16 %v2630_v19, %v2628_v58  ;;  %v2634_v15 = vld [vmem:[%s7961_s4 + $0x30] sm:$0xff]  ;;  %v4602_v60 = vld [vmem:[%s7961_s4 + $0x180] sm:$0xff]  ;;  %v4633_v22 = vld [vmem:[%s7961_s4 + $0x218] sm:$0xff] }
 0x2df   : > { %v5770_v52 = vpop.eup %5769  ;;  %v2282_v41 = vadd.f32 1.0, %v5768_v26  ;;  %5789 = vpow2.f32 %v4537_v59  ;;  %5044 = vmatpush1.bf16.msra.mxu1 %v5043_v33  ;;  %v2632_v59 = vld [vmem:[%s7961_s4 + $0x20] sm:$0xff]  ;;  %v2637_v26 = vld [vmem:[%s7961_s4 + $0x48] sm:$0xff]  ;;  %v4604_v14 = vld [vmem:[%s7961_s4 + $0x190] sm:$0xff] }
 0x2e0   : > { %v5772_v16 = vpop.eup %5771  ;;  %v2283_v25 = vadd.f32 1.0, %v5770_v52  ;;  %5791 = vrcp.f32 %v2281_v46  ;;  %4574 = vmatprep.subr.msk.mxu1 %vm603_vm0, %v4573_v43  ;;  %v5071_v58 = vpack.c.bf16 %v4604_v14, %v4602_v60  ;;  %v4648_v14 = vld [vmem:[%s7961_s4 + $0x290] sm:$0xff] }
 0x2e1   : > { %v5774_v37 = vpop.eup %5773  ;;  %v2422_v31 = vadd.f32 %v5772_v16, %v5764_v51  ;;  %v5049_v51 = vpack.c.bf16 %v2635_v34, %v2633_v55  ;;  %v4606_v34 = vld [vmem:[%s7961_s4 + $0x1a0] sm:$0xff] }
 0x2e2   : > { %v5776_v61 = vpop.eup %5775  ;;  %5793 = vrcp.f32 %v2283_v25  ;;  %v2284_v63 = vadd.f32 1.0, %v5774_v37  ;;  %v2636_v25 = vld [vmem:[%s7961_s4 + $0x40] sm:$0xff]  ;;  %v2638_v37 = vld [vmem:[%s7961_s4 + $0x50] sm:$0xff] }
 0x2e3   : > { %v5778_v20 = vpop.eup %5777  ;;  %5795 = vrcp.f32 %v2282_v41  ;;  %4548 = vmatprep.mubr.msk.f32.mxu1 %vm2450_vm4, %v2422_v31  ;;  %4575 = vmatpush1.msk.msra.mxu1 %vm603_vm0, %v4572_v10  ;;  %v5051_v41 = vpack.c.bf16 %v2634_v15, %v2632_v59  ;;  %v2641_v31 = vld [vmem:[%s7961_s4 + $0x68] sm:$0xff]  ;;  %v4613_v59 = vld [vmem:[%s7961_s4 + $0x1d8] sm:$0xff] }
 0x2e4   : > { %v5780_v23 = vpop.eup %5779  ;;  %5797 = vrcp.f32 %v2284_v63  ;;  %2608 = vmatmul.mubr.f32.gmra.mrb[70].mxu1 %v2421_v24  ;;  %5046 = vmatprep.subr.bf16.mxu1 %v5045_v57  ;;  %v2639_v24 = vld [vmem:[%s7961_s4 + $0x58] sm:$0xff]  ;;  %v5055_v63 = vpack.c.bf16 %v2638_v37, %v2636_v25  ;;  %v4607_v57 = vld [vmem:[%s7961_s4 + $0x1a8] sm:$0xff] }
 0x2e5   : > { %v5782_v54 = vpop.eup %5781  ;;  %v2423_v47 = vadd.f32 %v5780_v23, %v5776_v61  ;;  %v5053_v16 = vpack.c.bf16 %v2639_v24, %v2637_v26  ;;  %v2643_v61 = vld [vmem:[%s7961_s4 + $0x78] sm:$0xff]  ;;  %v2645_v23 = vld [vmem:[%s7961_s4 + $0x88] sm:$0xff]  ;;  %v4610_v24 = vld [vmem:[%s7961_s4 + $0x1c0] sm:$0xff] }
 0x2e6   : > { %v5784_v0 = vpop.eup %5783  ;;  %v2285_v30 = vadd.f32 1.0, %v5782_v54  ;;  %v5061_v9 = vpack.c.bf16 %v2647_v4, %v2645_v23  ;;  %v2644_v54 = vld [vmem:[%s7961_s4 + $0x80] sm:$0xff]  ;;  %v4635_v23 = vld [vmem:[%s7961_s4 + $0x228] sm:$0xff] }
 0x2e7   : > { %v5786_v48 = vpop.eup %5785  ;;  %v2286_v1 = vadd.f32 1.0, %v5784_v0  ;;  %v4599_v0 = vld [vmem:[%s7961_s4 + $0x168] sm:$0xff] }
 0x2e8   : > { %v2424_v7 = vadd.f32 %v5786_v48, %v5778_v20  ;;  %v5788_v11 = vpop.eup %5787  ;;  %5799 = vrcp.f32 %v2285_v30  ;;  %v5057_v20 = vpack.c.bf16 %v2643_v61, %v2641_v31  ;;  %v4601_v30 = vld [vmem:[%s7961_s4 + $0x178] sm:$0xff]  ;;  %v2648_v48 = vld [vmem:[%s7961_s4 + $0xa0] sm:$0xf] }
 0x2e9   : > { %v5790_v6 = vpop.eup %5789  ;;  %v2287_v27 = vadd.f32 1.0, %v5788_v11  ;;  %5801 = vrcp.f32 %v2286_v1  ;;  %v5065_v1 = vpack.c.bf16 %v4601_v30, %v4599_v0  ;;  %v4614_v61 = vld [vmem:[%s7961_s4 + $0x1e0] sm:$0xff]  ;;  %v4636_v30 = vld [vmem:[%s7961_s4 + $0x230] sm:$0xff] }
 0x2ea   : > { %4549 = vmatprep.mubr.msk.f32.mxu1 %vm2450_vm4, %v2424_v7  ;;  %v5792_v8 = vpop.eup %5791  ;;  %v2288_v39 = vadd.f32 1.0, %v5790_v6 }
 0x2eb   : > { %2613 = vmatmul.mubr.f32.gmra.mrb[72].mxu1 %v2423_v47  ;;  %5803 = vrcp.f32 %v2287_v27  ;;  %v2646_v47 = vld [vmem:[%s7961_s4 + $0x90] sm:$0xff] }
 0x2ec   : > { %v5794_v56 = vpop.eup %5793  ;;  %5805 = vrcp.f32 %v2288_v39  ;;  %v5063_v32 = vpack.c.bf16 %v2646_v47, %v2644_v54  ;;  %v4632_v54 = vld [vmem:[%s7961_s4 + $0x210] sm:$0xff]  ;;  %v4634_v47 = vld [vmem:[%s7961_s4 + $0x220] sm:$0xff] }
 0x2ed   : > { %v5796_v49 = vpop.eup %5795  ;;  %v2425_v29 = vadd.f32 %v5794_v56, %v5792_v8 }
 0x2ee   : > { %v5798_v38 = vpop.eup %5797 }
 0x2ef   : > { %v2426_v2 = vadd.f32 %v5798_v38, %v5796_v49  ;;  %v4598_v38 = vld [vmem:[%s7961_s4 + $0x160] sm:$0xff] }
 0x2f1   : > { %4550 = vmatprep.mubr.msk.f32.mxu1 %vm2450_vm4, %v2426_v2  ;;  %v4600_v2 = vld [vmem:[%s7961_s4 + $0x170] sm:$0xff] }
 0x2f2   : > { %2618 = vmatmul.mubr.f32.gmra.mrb[74].mxu1 %v2425_v29  ;;  %v5800_v17 = vpop.eup %5799 }
 0x2f3   : > { %v5802_v50 = vpop.eup %5801 }
 0x2f5   : > { %v5804_v44 = vpop.eup %5803 }
 0x2f6   : > { %v5806_v3 = vpop.eup %5805  ;;  %v2427_v28 = vadd.f32 %v5804_v44, %v5800_v17  ;;  %v4605_v44 = vld [vmem:[%s7961_s4 + $0x198] sm:$0xff] }
 0x2f7   : > { %v2428_v36 = vadd.f32 %v5806_v3, %v5802_v50  ;;  %v4603_v50 = vld [vmem:[%s7961_s4 + $0x188] sm:$0xff] }
 0x2f9   : > { %4551 = vmatprep.mubr.msk.f32.mxu1 %vm2450_vm4, %v2428_v36  ;;  %v5069_v36 = vpack.c.bf16 %v4605_v44, %v4603_v50  ;;  %v4644_v50 = vld [vmem:[%s7961_s4 + $0x270] sm:$0xff]  ;;  %v4646_v44 = vld [vmem:[%s7961_s4 + $0x280] sm:$0xff] }
 0x2fa   : > { %2623 = vmatmul.mubr.f32.gmra.mrb[76].mxu1 %v2427_v28  ;;  %v5067_v28 = vpack.c.bf16 %v4600_v2, %v4598_v38 }
 0x2fb   : > { %2774 = vmatprep.mubr.f32.mxu1 %v7988_v40 }
 0x362   : > { %v7159_v45 = vpop.f32.mrb[50].mxu1 }
 0x363   : > { %v2561_v18 = vpop.f32.mrb[51].mxu1 }
 0x364   : > { %v4609_v18 = vld [vmem:[%s7961_s4 + $0x1b8] sm:$0xff] }
 0x365   : > { %v5073_v55 = vpack.c.bf16 %v4609_v18, %v4607_v57  ;;  %v4650_v57 = vld [vmem:[%s7961_s4 + $0x2a0] sm:$0xff] }
 0x366   : > { %v5103_v18 = vpack.c.bf16 %v4650_v57, %v4648_v14  ;;  %v3679_v14 = vld [vmem:[%s7963_s6 + $0x88] sm:$0xff] }
 0x36d   : > { %v7179_v46 = vpop.f32.mrb[52].mxu1 }
 0x36e   : > { %v2566_v52 = vpop.f32.mrb[53].mxu1  ;;  %4576 = vmatmul.mubr.msk.f32.vlgmr.msra.gmra.mrb[78].mxu1 %vm2673_vm5, %v7179_v46 }
 0x36f   : > { %2780 = vmatprep.mubr.f32.mxu1 %v7988_v40  ;;  %5048 = vmatpush1.bf16.msra.mxu1 %v5047_v35  ;;  %v4608_v35 = vld [vmem:[%s7961_s4 + $0x1b0] sm:$0xff] }
 0x370   : > { %5050 = vmatprep.subr.bf16.mxu1 %v5049_v51  ;;  %v5075_v15 = vpack.c.bf16 %v4608_v35, %v4606_v34  ;;  %v4612_v52 = vld [vmem:[%s7961_s4 + $0x1d0] sm:$0xff]  ;;  %v4669_v34 = vld [vmem:[%s7961_s4 + $0x2d8] sm:$0xff] }
 0x371   : > { %v5079_v25 = vpack.c.bf16 %v4612_v52, %v4610_v24  ;;  %v4652_v35 = vld [vmem:[%s7961_s4 + $0x2b0] sm:$0xf] }
 0x373   : > { %5052 = vmatpush1.bf16.msra.mxu1 %v5051_v41  ;;  %v4615_v41 = vld [vmem:[%s7961_s4 + $0x1e8] sm:$0xff] }
 0x374   : > { %5054 = vmatprep.subr.bf16.mxu1 %v5053_v16 }
 0x375   : > { %v7208_v62 = vpop.f32.mrb[54].mxu1 }
 0x376   : > { %v2571_v53 = vpop.f32.mrb[55].mxu1  ;;  %4577 = vmatmul.mubr.msk.f32.gmra.mrb[80].mxu1 %vm2673_vm5, %v7208_v62 }
 0x377   : > { %2786 = vmatprep.mubr.f32.mxu1 %v7988_v40  ;;  %5056 = vmatpush1.bf16.msra.mxu1 %v5055_v63  ;;  %v4616_v63 = vld [vmem:[%s7961_s4 + $0x1f0] sm:$0xff]  ;;  %v4618_v53 = vld [vmem:[%s7961_s4 + $0x200] sm:$0xf] }
 0x378   : > { %5058 = vmatprep.subr.bf16.mxu1 %v5057_v20  ;;  %v5083_v20 = vpack.c.bf16 %v4616_v63, %v4614_v61  ;;  %v4674_v63 = vld [vmem:[%s7961_s4 + $0x300] sm:$0xff] }
 0x37b   : > { %5060 = vmatpush1.bf16.msra.mxu1 %v5059_v13  ;;  %v5085_v13 = vpack.c.bf16 %v4635_v23, %v4633_v22 }
 0x37c   : > { %v7225_v12 = vpop.f32.mrb[56].mxu1  ;;  %5062 = vmatprep.subr.bf16.mxu1 %v5061_v9 }
 0x37d   : > { %v2576_v5 = vpop.f32.mrb[57].mxu1  ;;  %4578 = vmatmul.mubr.msk.f32.gmra.mrb[82].mxu1 %vm2673_vm5, %v7225_v12 }
 0x37e   : > { %2792 = vmatprep.mubr.f32.mxu1 %v7988_v40  ;;  %v4639_v5 = vld [vmem:[%s7961_s4 + $0x248] sm:$0xff] }
 0x37f   : > { %5064 = vmatpush1.bf16.msra.mxu1 %v5063_v32  ;;  %v4637_v32 = vld [vmem:[%s7961_s4 + $0x238] sm:$0xff] }
 0x380   : > { %4586 = vmatprep.subr.msk.mxu1 %vm603_vm0, %v2649_v21  ;;  %v5087_v21 = vpack.c.bf16 %v4634_v47, %v4632_v54  ;;  %v5089_v0 = vpack.c.bf16 %v4639_v5, %v4637_v32  ;;  %v4685_v54 = vld [vmem:[%s7961_s4 + $0x358] sm:$0xff]  ;;  %v4682_v5 = vld [vmem:[%s7961_s4 + $0x340] sm:$0xff] }
 0x383   : > { %4587 = vmatpush1.msk.msra.mxu1 %vm603_vm0, %v2648_v48  ;;  %v4638_v48 = vld [vmem:[%s7961_s4 + $0x240] sm:$0xff] }
 0x384   : > { %5066 = vmatprep.subr.bf16.mxu1 %v5065_v1  ;;  %v4641_v1 = vld [vmem:[%s7961_s4 + $0x258] sm:$0xff] }
 0x386   : > { %v7244_v7 = vpop.f32.mrb[58].mxu1 }
 0x387   : > { %v2581_v33 = vpop.f32.mrb[59].mxu1  ;;  %4579 = vmatmul.mubr.msk.f32.gmra.mrb[84].mxu1 %vm2673_vm5, %v7244_v7 }
 0x388   : > { %2798 = vmatprep.mubr.f32.mxu1 %v7988_v40  ;;  %v4643_v33 = vld [vmem:[%s7961_s4 + $0x268] sm:$0xff] }
 0x38e   : > { %v7249_v11 = vpop.f32.mrb[60].mxu1 }
 0x38f   : > { %v2586_v6 = vpop.f32.mrb[61].mxu1  ;;  %4580 = vmatmul.mubr.msk.f32.gmra.mrb[86].mxu1 %vm2673_vm5, %v7249_v11 }
 0x390   : > { %2804 = vmatprep.mubr.f32.mxu1 %v7988_v40  ;;  %v5091_v6 = vpack.c.bf16 %v4638_v48, %v4636_v30  ;;  %v4687_v30 = vld [vmem:[%s7961_s4 + $0x368] sm:$0xf]  ;;  %v4686_v48 = vld [vmem:[%s7961_s4 + $0x360] sm:$0xf] }
 0x396   : > { %v7254_v27 = vpop.f32.mrb[62].mxu1 }
 0x397   : > { %v2591_v43 = vpop.f32.mrb[63].mxu1  ;;  %4581 = vmatmul.mubr.msk.f32.gmra.mrb[88].mxu1 %vm2673_vm5, %v7254_v27 }
 0x398   : > { %2810 = vmatprep.mubr.f32.mxu1 %v7988_v40  ;;  %v5093_v43 = vpack.c.bf16 %v4643_v33, %v4641_v1  ;;  %v7989_v1 = vmov 0.0|0.0   ;;  %v3662_v33 = vld [vmem:[%s7963_s6] sm:$0xff] }
 0x39f   : > { %v7259_v8 = vpop.f32.mrb[64].mxu1 }
 0x3a0   : > { %v2596_v39 = vpop.f32.mrb[65].mxu1  ;;  %4582 = vmatmul.mubr.msk.f32.gmra.mrb[90].mxu1 %vm2673_vm5, %v7259_v8 }
 0x3a1   : > { %2816 = vmatprep.mubr.f32.mxu1 %v7988_v40  ;;  %v4640_v39 = vld [vmem:[%s7961_s4 + $0x250] sm:$0xff] }
 0x3a5   : > { %v7264_v56 = vpop.f32.mrb[66].mxu1 }
 0x3a6   : > { %v2601_v49 = vpop.f32.mrb[67].mxu1  ;;  %4583 = vmatmul.mubr.msk.f32.gmra.mrb[92].mxu1 %vm2673_vm5, %v7264_v56 }
 0x3a7   : > { %2822 = vmatprep.mubr.f32.mxu1 %v7988_v40  ;;  %v4642_v49 = vld [vmem:[%s7961_s4 + $0x260] sm:$0xff] }
 0x3a8   : > { %v5095_v38 = vpack.c.bf16 %v4642_v49, %v4640_v39  ;;  %v3671_v39 = vld [vmem:[%s7963_s6 + $0x48] sm:$0xff] }
 0x3af   : > { %v7269_v29 = vpop.f32.mrb[68].mxu1 }
 0x3b0   : > { %v2606_v10 = vpop.f32.mrb[69].mxu1  ;;  %4584 = vmatmul.mubr.msk.f32.gmra.mrb[94].mxu1 %vm2673_vm5, %v7269_v29 }
 0x3b1   : > { %2828 = vmatprep.mubr.f32.mxu1 %v7988_v40  ;;  %v4645_v10 = vld [vmem:[%s7961_s4 + $0x278] sm:$0xff] }
 0x3b7   : > { %v7280_v17 = vpop.f32.mrb[70].mxu1 }
 0x3b8   : > { %v2611_v3 = vpop.f32.mrb[71].mxu1  ;;  %4585 = vmatmul.mubr.msk.f32.gmra.mrb[96].mxu1 %vm2673_vm5, %v7280_v17 }
 0x3b9   : > { %2908 = vmatprep.mubr.f32.mxu1 %v7988_v40  ;;  %v4649_v3 = vld [vmem:[%s7961_s4 + $0x298] sm:$0xff] }
 0x3bc   : > { %4588 = vmatmul.mubr.msk.f32.vlgmr.msra.gmra.mrb[78].mxu1 %vm2673_vm5, %v7159_v45  ;;  %v4611_v45 = vld [vmem:[%s7961_s4 + $0x1c8] sm:$0xff] }
 0x3bd   : > { %5068 = vmatpush1.bf16.msra.mxu1 %v5067_v28  ;;  %2914 = vmatprep.mubr.f32.mxu1 %v7988_v40  ;;  %v5077_v26 = vpack.c.bf16 %v4613_v59, %v4611_v45  ;;  %v4651_v28 = vld [vmem:[%s7961_s4 + $0x2a8] sm:$0xff]  ;;  %v4666_v45 = vld [vmem:[%s7961_s4 + $0x2c0] sm:$0xff]  ;;  %v4668_v59 = vld [vmem:[%s7961_s4 + $0x2d0] sm:$0xff] }
 0x3be   : > { %v7306_v19 = vpop.f32.mrb[72].mxu1  ;;  %5070 = vmatprep.subr.bf16.mxu1 %v5069_v36  ;;  %v5099_v36 = vpack.c.bf16 %v4646_v44, %v4644_v50  ;;  %v5101_v60 = vpack.c.bf16 %v4651_v28, %v4649_v3  ;;  %v5107_v24 = vpack.c.bf16 %v4668_v59, %v4666_v45  ;;  %v3675_v50 = vld [vmem:[%s7963_s6 + $0x68] sm:$0xff]  ;;  %v3676_v3 = vld [vmem:[%s7963_s6 + $0x70] sm:$0xff]  ;;  %v3677_v28 = vld [vmem:[%s7963_s6 + $0x78] sm:$0xff] }
 0x3bf   : > { %v2616_v51 = vpop.f32.mrb[73].mxu1 }
 0x3c0   : > { %4589 = vmatmul.mubr.msk.f32.gmra.mrb[80].mxu1 %vm2673_vm5, %v7179_v46  ;;  %v4617_v46 = vld [vmem:[%s7961_s4 + $0x1f8] sm:$0xff] }
 0x3c1   : > { %2920 = vmatprep.mubr.f32.mxu1 %v7988_v40  ;;  %5072 = vmatpush1.bf16.msra.mxu1 %v5071_v58  ;;  %v5081_v31 = vpack.c.bf16 %v4617_v46, %v4615_v41  ;;  %v4653_v58 = vld [vmem:[%s7961_s4 + $0x2b8] sm:$0xf]  ;;  %v4670_v41 = vld [vmem:[%s7961_s4 + $0x2e0] sm:$0xff]  ;;  %v4672_v46 = vld [vmem:[%s7961_s4 + $0x2f0] sm:$0xff] }
 0x3c2   : > { %5074 = vmatprep.subr.bf16.mxu1 %v5073_v55  ;;  %v4667_v55 = vld [vmem:[%s7961_s4 + $0x2c8] sm:$0xff] }
 0x3c3   : > { %v5105_v51 = vpack.c.bf16 %v4669_v34, %v4667_v55  ;;  %v3500_v34 = vld [vmem:[%s7962_s5] sm:$0x3] }
 0x3c4   : > { %4590 = vmatmul.mubr.msk.f32.gmra.mrb[82].mxu1 %vm2673_vm5, %v7208_v62 }
 0x3c5   : > { %v7337_v16 = vpop.f32.mrb[74].mxu1  ;;  %2926 = vmatprep.mubr.f32.mxu1 %v7988_v40  ;;  %5076 = vmatpush1.bf16.msra.mxu1 %v5075_v15  ;;  %v4671_v15 = vld [vmem:[%s7961_s4 + $0x2e8] sm:$0xff] }
 0x3c6   : > { %v2621_v37 = vpop.f32.mrb[75].mxu1  ;;  %5078 = vmatprep.subr.bf16.mxu1 %v5077_v26  ;;  %v4673_v26 = vld [vmem:[%s7961_s4 + $0x2f8] sm:$0xff] }
 0x3c7   : > { %v5109_v52 = vpack.c.bf16 %v4673_v26, %v4671_v15  ;;  %v4677_v37 = vld [vmem:[%s7961_s4 + $0x318] sm:$0xff] }
 0x3c8   : > { %4591 = vmatmul.mubr.msk.f32.gmra.mrb[84].mxu1 %vm2673_vm5, %v7225_v12 }
 0x3c9   : > { %2932 = vmatprep.mubr.f32.mxu1 %v7988_v40  ;;  %5080 = vmatpush1.bf16.msra.mxu1 %v5079_v25  ;;  %v4675_v25 = vld [vmem:[%s7961_s4 + $0x308] sm:$0xff] }
 0x3ca   : > { %5082 = vmatprep.subr.bf16.mxu1 %v5081_v31  ;;  %v5111_v31 = vpack.c.bf16 %v4672_v46, %v4670_v41  ;;  %v5113_v61 = vpack.c.bf16 %v4677_v37, %v4675_v25 }
 0x3cc   : > { %4592 = vmatmul.mubr.msk.f32.gmra.mrb[86].mxu1 %vm2673_vm5, %v7244_v7 }
 0x3cd   : > { %2938 = vmatprep.mubr.f32.mxu1 %v7988_v40  ;;  %5084 = vmatpush1.bf16.msra.mxu1 %v5083_v20  ;;  %v7361_v4 = vpop.f32.mrb[76].mxu1  ;;  %v4676_v20 = vld [vmem:[%s7961_s4 + $0x310] sm:$0xff] }
 0x3ce   : > { %4620 = vmatprep.subr.msk.mxu1 %vm603_vm0, %v4619_v42  ;;  %v2626_v9 = vpop.f32.mrb[77].mxu1  ;;  %v4679_v42 = vld [vmem:[%s7961_s4 + $0x328] sm:$0xff]  ;;  %v5115_v22 = vpack.c.bf16 %v4676_v20, %v4674_v63 }
 0x3cf   : > { %v4683_v9 = vld [vmem:[%s7961_s4 + $0x348] sm:$0xff] }
 0x3d0   : > { %4593 = vmatmul.mubr.msk.f32.gmra.mrb[88].mxu1 %vm2673_vm5, %v7249_v11  ;;  %v5121_v32 = vpack.c.bf16 %v4685_v54, %v4683_v9 }
 0x3d1   : > { %2944 = vmatprep.mubr.f32.mxu1 %v7988_v40  ;;  %4621 = vmatpush1.msk.msra.mxu1 %vm603_vm0, %v4618_v53  ;;  %v4678_v53 = vld [vmem:[%s7961_s4 + $0x320] sm:$0xff] }
 0x3d2   : > { %5086 = vmatprep.subr.bf16.mxu1 %v5085_v13  ;;  %v4680_v13 = vld [vmem:[%s7961_s4 + $0x330] sm:$0xff] }
 0x3d3   : > { %v5119_v47 = vpack.c.bf16 %v4680_v13, %v4678_v53 }
 0x3d4   : > { %4594 = vmatmul.mubr.msk.f32.gmra.mrb[90].mxu1 %vm2673_vm5, %v7254_v27 }
 0x3d5   : > { %2950 = vmatprep.mubr.f32.mxu1 %v7988_v40 }
 0x3d8   : > { %4595 = vmatmul.mubr.msk.f32.gmra.mrb[92].mxu1 %vm2673_vm5, %v7259_v8 }
 0x3d9   : > { %2956 = vmatprep.mubr.f32.mxu1 %v7988_v40 }
 0x3dc   : > { %4596 = vmatmul.mubr.msk.f32.gmra.mrb[94].mxu1 %vm2673_vm5, %v7264_v56 }
 0x3dd   : > { %2962 = vmatprep.mubr.f32.mxu1 %v7988_v40 }
 0x3e0   : > { %4597 = vmatmul.mubr.msk.f32.gmra.mrb[96].mxu1 %vm2673_vm5, %v7269_v29 }
 0x3e1   : > { %3065 = vmatprep.mubr.f32.mxu1 %v7988_v40 }
 0x3e4   : > { %4622 = vmatmul.mubr.msk.f32.vlgmr.msra.gmra.mrb[78].mxu1 %vm2673_vm5, %v7208_v62  ;;  %v4647_v62 = vld [vmem:[%s7961_s4 + $0x288] sm:$0xff] }
 0x3e5   : > { %5088 = vmatpush1.bf16.msra.mxu1 %v5087_v21  ;;  %3071 = vmatprep.mubr.f32.mxu1 %v7988_v40  ;;  %v5097_v2 = vpack.c.bf16 %v4647_v62, %v4645_v10  ;;  %v4684_v21 = vld [vmem:[%s7961_s4 + $0x350] sm:$0xff]  ;;  %v3673_v62 = vld [vmem:[%s7963_s6 + $0x58] sm:$0xff] }
 0x3e6   : > { %5090 = vmatprep.subr.bf16.mxu1 %v5089_v0  ;;  %v5123_v0 = vpack.c.bf16 %v4684_v21, %v4682_v5  ;;  %v3672_v10 = vld [vmem:[%s7963_s6 + $0x50] sm:$0xff] }
 0x3e8   : > { %4623 = vmatmul.mubr.msk.f32.gmra.mrb[80].mxu1 %vm2673_vm5, %v7225_v12 }
 0x3e9   : > { %3077 = vmatprep.mubr.f32.mxu1 %v7988_v40  ;;  %5092 = vmatpush1.bf16.msra.mxu1 %v5091_v6  ;;  %v3663_v6 = vld [vmem:[%s7963_s6 + $0x8] sm:$0xff] }
 0x3ea   : > { %5094 = vmatprep.subr.bf16.mxu1 %v5093_v43  ;;  %v5126_v43 = vpack.c.bf16 %v3663_v6, %v3662_v33 }
 0x3ec   : > { %4624 = vmatmul.mubr.msk.f32.gmra.mrb[82].mxu1 %vm2673_vm5, %v7244_v7 }
 0x3ed   : > { %3083 = vmatprep.mubr.f32.mxu1 %v7988_v40  ;;  %5096 = vmatpush1.bf16.msra.mxu1 %v5095_v38  ;;  %v5141_v38 = vpack.c.bf16 %v3673_v62, %v3672_v10 }
 0x3ee   : > { %5098 = vmatprep.subr.bf16.mxu1 %v5097_v2  ;;  %v3674_v2 = vld [vmem:[%s7963_s6 + $0x60] sm:$0xff] }
 0x3ef   : > { %v5144_v44 = vpack.c.bf16 %v3675_v50, %v3674_v2 }
 0x3f0   : > { %4625 = vmatmul.mubr.msk.f32.gmra.mrb[84].mxu1 %vm2673_vm5, %v7249_v11 }
 0x3f1   : > { %3089 = vmatprep.mubr.f32.mxu1 %v7988_v40  ;;  %5100 = vmatpush1.bf16.msra.mxu1 %v5099_v36  ;;  %v5147_v36 = vpack.c.bf16 %v3677_v28, %v3676_v3 }
 0x3f2   : > { %5102 = vmatprep.subr.bf16.mxu1 %v5101_v60  ;;  %v3678_v60 = vld [vmem:[%s7963_s6 + $0x80] sm:$0xff] }
 0x3f3   : > { %v5150_v57 = vpack.c.bf16 %v3679_v14, %v3678_v60 }
 0x3f4   : > { %4626 = vmatmul.mubr.msk.f32.gmra.mrb[86].mxu1 %vm2673_vm5, %v7254_v27 }
 0x3f5   : > { %3095 = vmatprep.mubr.f32.mxu1 %v7988_v40  ;;  %5104 = vmatpush1.bf16.msra.mxu1 %v5103_v18  ;;  %v3680_v18 = vld [vmem:[%s7963_s6 + $0x90] sm:$0xff] }
 0x3f6   : > { %4654 = vmatprep.subr.msk.mxu1 %vm603_vm0, %v4653_v58  ;;  %v3681_v58 = vld [vmem:[%s7963_s6 + $0x98] sm:$0xff] }
 0x3f7   : > { %v5153_v55 = vpack.c.bf16 %v3681_v58, %v3680_v18 }
 0x3f8   : > { %4627 = vmatmul.mubr.msk.f32.gmra.mrb[88].mxu1 %vm2673_vm5, %v7259_v8 }
 0x3f9   : > { %3101 = vmatprep.mubr.f32.mxu1 %v7988_v40  ;;  %4655 = vmatpush1.msk.msra.mxu1 %vm603_vm0, %v4652_v35  ;;  %v7990_v35 = vld [vmem:[#allocation10_spill] sm:$0xff] }
 0x3fa   : > { %5106 = vmatprep.subr.bf16.mxu1 %v5105_v51  ;;  %v7991_v51 = vsub.s32 0, %v7990_v35  ;;  %v7992_v59 = vsub.s32 1, %v7990_v35 }
 0x3fc   : > { %4628 = vmatmul.mubr.msk.f32.gmra.mrb[90].mxu1 %vm2673_vm5, %v7264_v56  ;;  %v7678_v45 = vrot.slane %v3500_v34, %v7991_v51  ;;  %v7682_v15 = vrot.slane %v3500_v34, %v7992_v59 }
 0x3fd   : > { %3107 = vmatprep.mubr.f32.mxu1 %v7988_v40 }
 0x400   : > { %4629 = vmatmul.mubr.msk.f32.gmra.mrb[92].mxu1 %vm2673_vm5, %v7269_v29 }
 0x401   : > { %3113 = vmatprep.mubr.f32.mxu1 %v7988_v40 }
 0x404   : > { %4630 = vmatmul.mubr.msk.f32.gmra.mrb[94].mxu1 %vm2673_vm5, %v7280_v17 }
 0x405   : > { %3119 = vmatprep.mubr.f32.mxu1 %v7988_v40 }
 0x408   : > { %4631 = vmatmul.mubr.msk.f32.gmra.mrb[96].mxu1 %vm2673_vm5, %v7306_v19 }
 0x409   : > { %3242 = vmatprep.mubr.f32.mxu1 %v7988_v40 }
 0x40c   : > { %4656 = vmatmul.mubr.msk.f32.vlgmr.msra.gmra.mrb[78].mxu1 %vm2673_vm5, %v7225_v12  ;;  %v4681_v12 = vld [vmem:[%s7961_s4 + $0x338] sm:$0xff] }
 0x40d   : > { %5108 = vmatpush1.bf16.msra.mxu1 %v5107_v24  ;;  %3248 = vmatprep.mubr.f32.mxu1 %v7988_v40  ;;  %v5117_v23 = vpack.c.bf16 %v4681_v12, %v4679_v42 }
 0x40e   : > { %5110 = vmatprep.subr.bf16.mxu1 %v5109_v52 }
 0x410   : > { %4657 = vmatmul.mubr.msk.f32.gmra.mrb[80].mxu1 %vm2673_vm5, %v7244_v7 }
 0x411   : > { %3254 = vmatprep.mubr.f32.mxu1 %v7988_v40  ;;  %5112 = vmatpush1.bf16.msra.mxu1 %v5111_v31 }
 0x412   : > { %5114 = vmatprep.subr.bf16.mxu1 %v5113_v61 }
 0x414   : > { %4658 = vmatmul.mubr.msk.f32.gmra.mrb[82].mxu1 %vm2673_vm5, %v7249_v11 }
 0x415   : > { %3260 = vmatprep.mubr.f32.mxu1 %v7988_v40  ;;  %5116 = vmatpush1.bf16.msra.mxu1 %v5115_v22 }
 0x416   : > { %5118 = vmatprep.subr.bf16.mxu1 %v5117_v23 }
 0x418   : > { %4659 = vmatmul.mubr.msk.f32.gmra.mrb[84].mxu1 %vm2673_vm5, %v7254_v27 }
 0x419   : > { %3266 = vmatprep.mubr.f32.mxu1 %v7988_v40  ;;  %5120 = vmatpush1.bf16.msra.mxu1 %v5119_v47 }
 0x41a   : > { %5122 = vmatprep.subr.bf16.mxu1 %v5121_v32 }
 0x41c   : > { %4660 = vmatmul.mubr.msk.f32.gmra.mrb[86].mxu1 %vm2673_vm5, %v7259_v8 }
 0x41d   : > { %3272 = vmatprep.mubr.f32.mxu1 %v7988_v40  ;;  %5124 = vmatpush1.bf16.msra.mxu1 %v5123_v0 }
 0x41e   : > { %4688 = vmatprep.subr.msk.mxu1 %vm603_vm0, %v4687_v30 }
 0x420   : > { %4661 = vmatmul.mubr.msk.f32.gmra.mrb[88].mxu1 %vm2673_vm5, %v7264_v56 }
 0x421   : > { %3278 = vmatprep.mubr.f32.mxu1 %v7988_v40  ;;  %4689 = vmatpush1.msk.msra.mxu1 %vm603_vm0, %v4686_v48 }
 0x422   : > { %5125 = vmatprep.subr.bf16.mxu1 %v7989_v1 }
 0x424   : > { %4662 = vmatmul.mubr.msk.f32.gmra.mrb[90].mxu1 %vm2673_vm5, %v7269_v29 }
 0x425   : > { %3284 = vmatprep.mubr.f32.mxu1 %v7988_v40 }
 0x428   : > { %4663 = vmatmul.mubr.msk.f32.gmra.mrb[92].mxu1 %vm2673_vm5, %v7280_v17 }
 0x429   : > { %3290 = vmatprep.mubr.f32.mxu1 %v7988_v40 }
 0x42c   : > { %4664 = vmatmul.mubr.msk.f32.gmra.mrb[94].mxu1 %vm2673_vm5, %v7306_v19 }
 0x42d   : > { %3296 = vmatprep.mubr.f32.mxu1 %v7988_v40 }
 0x430   : > { %4665 = vmatmul.mubr.msk.f32.gmra.mrb[96].mxu1 %vm2673_vm5, %v7337_v16 }
 0x431   : > { %3419 = vmatprep.mubr.f32.mxu1 %v7988_v40 }
 0x434   : > { %4690 = vmatmul.mubr.msk.f32.vlgmr.msra.gmra.mrb[78].mxu1 %vm2673_vm5, %v7244_v7  ;;  %v3664_v7 = vld [vmem:[%s7963_s6 + $0x10] sm:$0xff] }
 0x435   : > { %3425 = vmatprep.mubr.f32.mxu1 %v7988_v40  ;;  %5127 = vmatpush1.bf16.msra.mxu1 %v5126_v43 }
 0x436   : > { %5128 = vmatprep.subr.bf16.mxu1 %v7989_v1 }
 0x438   : > { %4691 = vmatmul.mubr.msk.f32.gmra.mrb[80].mxu1 %vm2673_vm5, %v7249_v11  ;;  %v3665_v11 = vld [vmem:[%s7963_s6 + $0x18] sm:$0xff] }
 0x439   : > { %3431 = vmatprep.mubr.f32.mxu1 %v7988_v40 }
 0x43c   : > { %4692 = vmatmul.mubr.msk.f32.gmra.mrb[82].mxu1 %vm2673_vm5, %v7254_v27  ;;  %v5129_v27 = vpack.c.bf16 %v3665_v11, %v3664_v7 }
 0x43d   : > { %3437 = vmatprep.mubr.f32.mxu1 %v7988_v40 }
 0x43e   : > { %5130 = vmatpush1.bf16.msra.mxu1 %v5129_v27 }
 0x43f   : > { %5131 = vmatprep.subr.bf16.mxu1 %v7989_v1 }
 0x440   : > { %4693 = vmatmul.mubr.msk.f32.gmra.mrb[84].mxu1 %vm2673_vm5, %v7259_v8  ;;  %v3666_v8 = vld [vmem:[%s7963_s6 + $0x20] sm:$0xff] }
 0x441   : > { %3443 = vmatprep.mubr.f32.mxu1 %v7988_v40 }
 0x444   : > { %4694 = vmatmul.mubr.msk.f32.gmra.mrb[86].mxu1 %vm2673_vm5, %v7264_v56  ;;  %v3667_v56 = vld [vmem:[%s7963_s6 + $0x28] sm:$0xff] }
 0x445   : > { %3449 = vmatprep.mubr.f32.mxu1 %v7988_v40 }
 0x448   : > { %4695 = vmatmul.mubr.msk.f32.gmra.mrb[88].mxu1 %vm2673_vm5, %v7269_v29  ;;  %v5132_v29 = vpack.c.bf16 %v3667_v56, %v3666_v8 }
 0x449   : > { %3455 = vmatprep.mubr.f32.mxu1 %v7988_v40 }
 0x44a   : > { %5133 = vmatpush1.bf16.msra.mxu1 %v5132_v29 }
 0x44b   : > { %5134 = vmatprep.subr.bf16.mxu1 %v7989_v1 }
 0x44c   : > { %4696 = vmatmul.mubr.msk.f32.gmra.mrb[90].mxu1 %vm2673_vm5, %v7280_v17  ;;  %v3668_v17 = vld [vmem:[%s7963_s6 + $0x30] sm:$0xff] }
 0x44d   : > { %3461 = vmatprep.mubr.f32.mxu1 %v7988_v40 }
 0x450   : > { %4697 = vmatmul.mubr.msk.f32.gmra.mrb[92].mxu1 %vm2673_vm5, %v7306_v19  ;;  %v3669_v19 = vld [vmem:[%s7963_s6 + $0x38] sm:$0xff] }
 0x451   : > { %3467 = vmatprep.mubr.f32.mxu1 %v7988_v40 }
 0x454   : > { %4698 = vmatmul.mubr.msk.f32.gmra.mrb[94].mxu1 %vm2673_vm5, %v7337_v16  ;;  %v5135_v16 = vpack.c.bf16 %v3669_v19, %v3668_v17 }
 0x455   : > { %3473 = vmatprep.mubr.f32.mxu1 %v7988_v40 }
 0x456   : > { %5136 = vmatpush1.bf16.msra.mxu1 %v5135_v16 }
 0x457   : > { %5137 = vmatprep.subr.bf16.mxu1 %v7989_v1 }
 0x458   : > { %4699 = vmatmul.mubr.msk.f32.gmra.mrb[96].mxu1 %vm2673_vm5, %v7361_v4  ;;  %v3670_v4 = vld [vmem:[%s7963_s6 + $0x40] sm:$0xff] }
 0x459   : > { %v5138_v49 = vpack.c.bf16 %v3671_v39, %v3670_v4 }
 0x45b   : > { %5139 = vmatpush1.bf16.msra.mxu1 %v5138_v49 }
 0x45c   : > { %5140 = vmatprep.subr.bf16.mxu1 %v7989_v1 }
 0x45f   : > { %5142 = vmatpush1.bf16.msra.mxu1 %v5141_v38 }
 0x460   : > { %5143 = vmatprep.subr.bf16.mxu1 %v7989_v1 }
 0x463   : > { %5145 = vmatpush1.bf16.msra.mxu1 %v5144_v44 }
 0x464   : > { %5146 = vmatprep.subr.bf16.mxu1 %v7989_v1 }
 0x467   : > { %5148 = vmatpush1.bf16.msra.mxu1 %v5147_v36 }
 0x468   : > { %5149 = vmatprep.subr.bf16.mxu1 %v7989_v1 }
 0x46b   : > { %5151 = vmatpush1.bf16.msra.mxu1 %v5150_v57 }
 0x46c   : > { %5152 = vmatprep.subr.bf16.mxu1 %v7989_v1 }
 0x46f   : > { %5154 = vmatpush1.bf16.msra.mxu1 %v5153_v55 }
 0x470   : > { %5155 = vmatprep.subr.bf16.mxu1 %v7989_v1 }
 0x507   : > { %v3421_v26 = vpop.f32.mrb[78].mxu1 }
 0x508   : > { %v3512_v24 = vadd.f32 %v7678_v45, %v3421_v26  ;;  %v3423_v52 = vpop.f32.mrb[79].mxu1 }
 0x509   : > { %v3513_v41 = vadd.f32 %v7682_v15, %v3423_v52 }
 0x50a   : > { %v4700_v46 = vmul.f32 -1.442695, %v3512_v24 }
 0x50b   : > { %v4701_v25 = vmul.f32 -1.442695, %v3513_v41  ;;  %v3427_v37 = vpop.f32.mrb[80].mxu1 }
 0x50c   : > { %5807 = vpow2.f32 %v4700_v46  ;;  %v3514_v31 = vadd.f32 %v7678_v45, %v3427_v37  ;;  %v3429_v61 = vpop.f32.mrb[81].mxu1  ;;  %v4725_v37 = vld [vmem:[%s7964_s7 + $0x50] sm:$0xff] }
 0x50d   : > { %5809 = vpow2.f32 %v4701_v25  ;;  %v3515_v63 = vadd.f32 %v7682_v15, %v3429_v61 }
 0x50e   : > { %v4702_v20 = vmul.f32 -1.442695, %v3514_v31  ;;  %v4726_v31 = vld [vmem:[%s7964_s7 + $0x58] sm:$0xff] }
 0x50f   : > { %v4703_v42 = vmul.f32 -1.442695, %v3515_v63  ;;  %v3433_v12 = vpop.f32.mrb[82].mxu1 }
 0x510   : > { %5811 = vpow2.f32 %v4702_v20  ;;  %v3516_v22 = vadd.f32 %v7678_v45, %v3433_v12  ;;  %v3435_v23 = vpop.f32.mrb[83].mxu1 }
 0x511   : > { %5813 = vpow2.f32 %v4703_v42  ;;  %v3517_v53 = vadd.f32 %v7682_v15, %v3435_v23 }
 0x512   : > { %v4704_v13 = vmul.f32 -1.442695, %v3516_v22 }
 0x513   : > { %v4705_v9 = vmul.f32 -1.442695, %v3517_v53  ;;  %v3439_v54 = vpop.f32.mrb[84].mxu1 }
 0x514   : > { %5815 = vpow2.f32 %v4704_v13  ;;  %v3518_v47 = vadd.f32 %v7678_v45, %v3439_v54  ;;  %v3441_v32 = vpop.f32.mrb[85].mxu1 }
 0x515   : > { %v3519_v5 = vadd.f32 %v7682_v15, %v3441_v32  ;;  %5817 = vpow2.f32 %v4705_v9 }
 0x516   : > { %v5808_v21 = vpop.eup %5807  ;;  %v4706_v0 = vmul.f32 -1.442695, %v3518_v47  ;;  %v5156_v47 = vpack.c.bf16 %v4726_v31, %v4725_v37 }
 0x517   : > { %v5810_v30 = vpop.eup %5809  ;;  %v3592_v48 = vadd.f32 1.0, %v5808_v21  ;;  %v4707_v33 = vmul.f32 -1.442695, %v3519_v5  ;;  %v3445_v6 = vpop.f32.mrb[86].mxu1 }
 0x518   : > { %v3593_v43 = vadd.f32 1.0, %v5810_v30  ;;  %5819 = vpow2.f32 %v4706_v0  ;;  %v3520_v7 = vadd.f32 %v7678_v45, %v3445_v6  ;;  %v3447_v11 = vpop.f32.mrb[87].mxu1  ;;  %v4727_v0 = vld [vmem:[%s7964_s7 + $0x60] sm:$0xff]  ;;  %v4728_v30 = vld [vmem:[%s7964_s7 + $0x68] sm:$0xff] }
 0x519   : > { %5821 = vrcp.f32 %v3592_v48  ;;  %v3521_v27 = vadd.f32 %v7682_v15, %v3447_v11 }
 0x51a   : > { %v5812_v8 = vpop.eup %5811  ;;  %5823 = vrcp.f32 %v3593_v43  ;;  %v4708_v56 = vmul.f32 -1.442695, %v3520_v7 }
 0x51b   : > { %v5814_v29 = vpop.eup %5813  ;;  %v3594_v17 = vadd.f32 1.0, %v5812_v8  ;;  %5825 = vpow2.f32 %v4707_v33  ;;  %v4709_v19 = vmul.f32 -1.442695, %v3521_v27  ;;  %v3451_v16 = vpop.f32.mrb[88].mxu1 }
 0x51c   : > { %v3595_v4 = vadd.f32 1.0, %v5814_v29  ;;  %5827 = vpow2.f32 %v4708_v56  ;;  %v3522_v39 = vadd.f32 %v7678_v45, %v3451_v16  ;;  %v3453_v49 = vpop.f32.mrb[89].mxu1  ;;  %v5159_v56 = vpack.c.bf16 %v4728_v30, %v4727_v0  ;;  %v4729_v16 = vld [vmem:[%s7964_s7 + $0x70] sm:$0xff] }
 0x51d   : > { %5829 = vrcp.f32 %v3594_v17  ;;  %v3523_v10 = vadd.f32 %v7682_v15, %v3453_v49 }
 0x51e   : > { %v5816_v62 = vpop.eup %5815  ;;  %5831 = vrcp.f32 %v3595_v4  ;;  %v4710_v38 = vmul.f32 -1.442695, %v3522_v39 }
 0x51f   : > { %v3596_v2 = vadd.f32 1.0, %v5816_v62  ;;  %5833 = vpow2.f32 %v4709_v19  ;;  %v4711_v50 = vmul.f32 -1.442695, %v3523_v10  ;;  %v3457_v44 = vpop.f32.mrb[90].mxu1  ;;  %v5818_v3 = vpop.eup %5817 }
 0x520   : > { %5835 = vpow2.f32 %v4710_v38  ;;  %v3524_v28 = vadd.f32 %v7678_v45, %v3457_v44  ;;  %v3459_v36 = vpop.f32.mrb[91].mxu1  ;;  %v3597_v58 = vadd.f32 1.0, %v5818_v3 }
 0x521   : > { %v3525_v60 = vadd.f32 %v7682_v15, %v3459_v36  ;;  %5837 = vrcp.f32 %v3596_v2 }
 0x522   : > { %v5820_v14 = vpop.eup %5819  ;;  %v4712_v57 = vmul.f32 -1.442695, %v3524_v28  ;;  %5839 = vpow2.f32 %v4711_v50 }
 0x523   : > { %v5822_v18 = vpop.eup %5821  ;;  %v3598_v55 = vadd.f32 1.0, %v5820_v14  ;;  %v4713_v34 = vmul.f32 -1.442695, %v3525_v60  ;;  %v3463_v35 = vpop.f32.mrb[92].mxu1 }
 0x524   : > { %v5824_v51 = vpop.eup %5823  ;;  %5841 = vpow2.f32 %v4712_v57  ;;  %v3526_v59 = vadd.f32 %v7678_v45, %v3463_v35  ;;  %v3465_v26 = vpop.f32.mrb[93].mxu1 }
 0x525   : > { %v5826_v24 = vpop.eup %5825  ;;  %5843 = vrcp.f32 %v3598_v55  ;;  %v3527_v52 = vadd.f32 %v7682_v15, %v3465_v26 }
 0x526   : > { %v5828_v41 = vpop.eup %5827  ;;  %v3599_v46 = vadd.f32 1.0, %v5826_v24  ;;  %5845 = vpow2.f32 %v4713_v34  ;;  %v4714_v25 = vmul.f32 -1.442695, %v3526_v59 }
 0x527   : > { %v5830_v61 = vpop.eup %5829  ;;  %5847 = vrcp.f32 %v3597_v58  ;;  %v3600_v63 = vadd.f32 1.0, %v5828_v41  ;;  %v4715_v20 = vmul.f32 -1.442695, %v3527_v52  ;;  %v3469_v42 = vpop.f32.mrb[94].mxu1 }
 0x528   : > { %v5832_v12 = vpop.eup %5831  ;;  %5849 = vrcp.f32 %v3599_v46  ;;  %v3528_v22 = vadd.f32 %v7678_v45, %v3469_v42  ;;  %v3471_v23 = vpop.f32.mrb[95].mxu1  ;;  %v3652_v53 = vadd.f32 %v5830_v61, %v5822_v18 }
 0x529   : > { %v5834_v13 = vpop.eup %5833  ;;  %5851 = vrcp.f32 %v3600_v63  ;;  %v3529_v9 = vadd.f32 %v7682_v15, %v3471_v23  ;;  %v3653_v54 = vadd.f32 %v5832_v12, %v5824_v51 }
 0x52a   : > { %v5836_v32 = vpop.eup %5835  ;;  %v3601_v5 = vadd.f32 1.0, %v5834_v13  ;;  %5853 = vpow2.f32 %v4714_v25  ;;  %v4716_v21 = vmul.f32 -1.442695, %v3528_v22 }
 0x52b   : > { %v3602_v48 = vadd.f32 1.0, %v5836_v32  ;;  %5855 = vpow2.f32 %v4715_v20  ;;  %v4717_v33 = vmul.f32 -1.442695, %v3529_v9  ;;  %v3475_v6 = vpop.f32.mrb[96].mxu1  ;;  %4720 = vmatprep.mubr.msk.f32.mxu1 %vm3682_vm6, %v3653_v54  ;;  %v5838_v43 = vpop.eup %5837  ;;  %v4731_v9 = vld [vmem:[%s7964_s7 + $0x80] sm:$0xff]  ;;  %v4732_v54 = vld [vmem:[%s7964_s7 + $0x88] sm:$0xff] }
 0x52c   : > { %5857 = vrcp.f32 %v3601_v5  ;;  %v3530_v7 = vadd.f32 %v7678_v45, %v3475_v6  ;;  %v3477_v11 = vpop.f32.mrb[97].mxu1  ;;  %3763 = vmatmul.mubr.f32.vlgmr.msra.gmra.mrb[98].mxu1 %v3652_v53  ;;  %v5840_v27 = vpop.eup %5839  ;;  %v4730_v45 = vld [vmem:[%s7964_s7 + $0x78] sm:$0xff]  ;;  %v5165_v32 = vpack.c.bf16 %v4732_v54, %v4731_v9  ;;  %v4760_v9 = vld [vmem:[%s7964_s7 + $0x148] sm:$0xff] }
 0x52d   : > { %5859 = vrcp.f32 %v3602_v48  ;;  %v3531_v8 = vadd.f32 %v7682_v15, %v3477_v11  ;;  %5157 = vmatpush3.bf16.msra.mxu1 %v5156_v47  ;;  %v3603_v17 = vadd.f32 1.0, %v5840_v27  ;;  %v5162_v38 = vpack.c.bf16 %v4730_v45, %v4729_v16  ;;  %v4733_v47 = vld [vmem:[%s7964_s7 + $0x90] sm:$0xff]  ;;  %v4734_v5 = vld [vmem:[%s7964_s7 + $0x98] sm:$0xff]  ;;  %v3788_v48 = vld [vmem:[%s7964_s7] sm:$0xff] }
 0x52e   : > { %v5842_v29 = vpop.eup %5841  ;;  %5861 = vpow2.f32 %v4716_v21  ;;  %v4718_v19 = vmul.f32 -1.442695, %v3530_v7  ;;  %5158 = vmatprep.subr.bf16.mxu1 %v7989_v1  ;;  %v5168_v21 = vpack.c.bf16 %v4734_v5, %v4733_v47  ;;  %v3791_v7 = vld [vmem:[%s7964_s7 + $0x18] sm:$0xff]  ;;  %v4761_v47 = vld [vmem:[%s7964_s7 + $0x150] sm:$0xff] }
 0x52f   : > { %v5844_v4 = vpop.eup %5843  ;;  %5863 = vpow2.f32 %v4717_v33  ;;  %v4719_v15 = vmul.f32 -1.442695, %v3531_v8  ;;  %v3604_v62 = vadd.f32 1.0, %v5842_v29  ;;  %v3789_v33 = vld [vmem:[%s7964_s7 + $0x8] sm:$0xff]  ;;  %v3795_v16 = vld [vmem:[%s7964_s7 + $0x38] sm:$0xff] }
 0x530   : > { %v5846_v39 = vpop.eup %5845  ;;  %5865 = vrcp.f32 %v3603_v17  ;;  %v3654_v49 = vadd.f32 %v5844_v4, %v5838_v43  ;;  %v5171_v6 = vpack.c.bf16 %v3789_v33, %v3788_v48  ;;  %v3790_v43 = vld [vmem:[%s7964_s7 + $0x10] sm:$0xff]  ;;  %v3793_v29 = vld [vmem:[%s7964_s7 + $0x28] sm:$0xff] }
 0x531   : > { %v5848_v10 = vpop.eup %5847  ;;  %5160 = vmatpush3.bf16.msra.mxu1 %v5159_v56  ;;  %v3605_v50 = vadd.f32 1.0, %v5846_v39  ;;  %5867 = vpow2.f32 %v4718_v19  ;;  %v5174_v8 = vpack.c.bf16 %v3791_v7, %v3790_v43  ;;  %v3792_v56 = vld [vmem:[%s7964_s7 + $0x20] sm:$0xff]  ;;  %v3794_v19 = vld [vmem:[%s7964_s7 + $0x30] sm:$0xff]  ;;  %v4768_v43 = vld [vmem:[%s7964_s7 + $0x188] sm:$0xff] }
 0x532   : > { %v5850_v2 = vpop.eup %5849  ;;  %5161 = vmatprep.subr.bf16.mxu1 %v7989_v1  ;;  %5869 = vpow2.f32 %v4719_v15  ;;  %v5177_v17 = vpack.c.bf16 %v3793_v29, %v3792_v56  ;;  %v5180_v39 = vpack.c.bf16 %v3795_v16, %v3794_v19  ;;  %v3796_v15 = vld [vmem:[%s7964_s7 + $0x40] sm:$0xff]  ;;  %v4765_v48 = vld [vmem:[%s7964_s7 + $0x170] sm:$0xff] }
 0x533   : > { %v5852_v44 = vpop.eup %5851  ;;  %v3655_v3 = vadd.f32 %v5850_v2, %v5848_v10  ;;  %5871 = vrcp.f32 %v3604_v62  ;;  %v4737_v62 = vld [vmem:[%s7964_s7 + $0xa0] sm:$0xff] }
 0x534   : > { %v5854_v28 = vpop.eup %5853  ;;  %5873 = vrcp.f32 %v3605_v50 }
 0x535   : > { %v5856_v36 = vpop.eup %5855  ;;  %v3606_v60 = vadd.f32 1.0, %v5854_v28  ;;  %4721 = vmatprep.mubr.msk.f32.mxu1 %vm3682_vm6, %v3655_v3  ;;  %5163 = vmatpush3.bf16.msra.mxu1 %v5162_v38  ;;  %v4738_v38 = vld [vmem:[%s7964_s7 + $0xa8] sm:$0xff]  ;;  %v4739_v3 = vld [vmem:[%s7964_s7 + $0xb0] sm:$0xff]  ;;  %v4740_v28 = vld [vmem:[%s7964_s7 + $0xb8] sm:$0xff] }
 0x536   : > { %v5858_v14 = vpop.eup %5857  ;;  %v3607_v57 = vadd.f32 1.0, %v5856_v36  ;;  %3768 = vmatmul.mubr.f32.gmra.mrb[100].mxu1 %v3654_v49  ;;  %5164 = vmatprep.subr.bf16.mxu1 %v7989_v1  ;;  %v3797_v49 = vld [vmem:[%s7964_s7 + $0x48] sm:$0xff]  ;;  %v5189_v36 = vpack.c.bf16 %v4740_v28, %v4739_v3 }
 0x537   : > { %v5860_v18 = vpop.eup %5859  ;;  %5875 = vrcp.f32 %v3606_v60  ;;  %v5183_v10 = vpack.c.bf16 %v3797_v49, %v3796_v15  ;;  %v4741_v60 = vld [vmem:[%s7964_s7 + $0xc0] sm:$0xff] }
 0x538   : > { %v5862_v58 = vpop.eup %5861  ;;  %5877 = vrcp.f32 %v3607_v57  ;;  %v3656_v55 = vadd.f32 %v5860_v18, %v5852_v44  ;;  %v5186_v44 = vpack.c.bf16 %v4738_v38, %v4737_v62  ;;  %v4770_v15 = vld [vmem:[%s7965_s8] ss:$0 sm:$0xff] }
 0x539   : > { %v5864_v34 = vpop.eup %5863  ;;  %v3608_v51 = vadd.f32 1.0, %v5862_v58  ;;  %5166 = vmatpush3.bf16.msra.mxu1 %v5165_v32  ;;  %v4762_v32 = vld [vmem:[%s7964_s7 + $0x158] sm:$0xff] }
 0x53a   : > { %v5866_v35 = vpop.eup %5865  ;;  %v3609_v24 = vadd.f32 1.0, %v5864_v34  ;;  %5167 = vmatprep.subr.bf16.mxu1 %v7989_v1  ;;  %v4744_v34 = vld [vmem:[%s7964_s7 + $0xd8] sm:$0xff]  ;;  %v5219_v5 = vpack.c.bf16 %v4762_v32, %v4761_v47 }
 0x53b   : > { %v3657_v59 = vadd.f32 %v5866_v35, %v5858_v14  ;;  %v5868_v26 = vpop.eup %5867  ;;  %5879 = vrcp.f32 %v3608_v51  ;;  %v4742_v14 = vld [vmem:[%s7964_s7 + $0xc8] sm:$0xff]  ;;  %v4745_v51 = vld [vmem:[%s7964_s7 + $0xe0] sm:$0xff] }
 0x53c   : > { %v3610_v52 = vadd.f32 1.0, %v5868_v26  ;;  %v5870_v41 = vpop.eup %5869  ;;  %v5192_v58 = vpack.c.bf16 %v4742_v14, %v4741_v60 }
 0x53d   : > { %4722 = vmatprep.mubr.msk.f32.mxu1 %vm3682_vm6, %v3657_v59  ;;  %v5872_v46 = vpop.eup %5871  ;;  %v3611_v25 = vadd.f32 1.0, %v5870_v41  ;;  %5169 = vmatpush3.bf16.msra.mxu1 %v5168_v21  ;;  %v4746_v59 = vld [vmem:[%s7964_s7 + $0xe8] sm:$0xff]  ;;  %v4763_v21 = vld [vmem:[%s7964_s7 + $0x160] sm:$0xff] }
 0x53e   : > { %3773 = vmatmul.mubr.f32.gmra.mrb[102].mxu1 %v3656_v55  ;;  %5881 = vrcp.f32 %v3610_v52  ;;  %v5874_v37 = vpop.eup %5873  ;;  %5170 = vmatprep.subr.bf16.mxu1 %v7989_v1  ;;  %v4743_v55 = vld [vmem:[%s7964_s7 + $0xd0] sm:$0xff]  ;;  %v5198_v26 = vpack.c.bf16 %v4746_v59, %v4745_v51  ;;  %v4749_v52 = vld [vmem:[%s7964_s7 + $0xf8] sm:$0xff] }
 0x53f   : > { %5883 = vrcp.f32 %v3609_v24  ;;  %v5195_v35 = vpack.c.bf16 %v4744_v34, %v4743_v55  ;;  %v4748_v24 = vld [vmem:[%s7964_s7 + $0xf0] sm:$0xff] }
 0x540   : > { %5885 = vrcp.f32 %v3611_v25  ;;  %v5201_v41 = vpack.c.bf16 %v4749_v52, %v4748_v24  ;;  %v4751_v25 = vld [vmem:[%s7964_s7 + $0x108] sm:$0xff] }
 0x541   : > { %v5876_v31 = vpop.eup %5875 }
 0x542   : > { %v5878_v61 = vpop.eup %5877  ;;  %v3658_v63 = vadd.f32 %v5876_v31, %v5872_v46  ;;  %v4750_v46 = vld [vmem:[%s7964_s7 + $0x100] sm:$0xff]  ;;  %v4752_v31 = vld [vmem:[%s7964_s7 + $0x110] sm:$0xff] }
 0x543   : > { %v3659_v20 = vadd.f32 %v5878_v61, %v5874_v37  ;;  %v5204_v37 = vpack.c.bf16 %v4751_v25, %v4750_v46  ;;  %v4753_v61 = vld [vmem:[%s7964_s7 + $0x118] sm:$0xff] }
 0x545   : > { %4723 = vmatprep.mubr.msk.f32.mxu1 %vm3682_vm6, %v3659_v20  ;;  %v5880_v42 = vpop.eup %5879  ;;  %v4754_v20 = vld [vmem:[%s7964_s7 + $0x120] sm:$0xff] }
 0x546   : > { %3778 = vmatmul.mubr.f32.gmra.mrb[104].mxu1 %v3658_v63  ;;  %v5207_v63 = vpack.c.bf16 %v4753_v61, %v4752_v31 }
 0x548   : > { %v5882_v12 = vpop.eup %5881 }
 0x549   : > { %v5884_v22 = vpop.eup %5883  ;;  %v3660_v23 = vadd.f32 %v5882_v12, %v5880_v42  ;;  %v4755_v42 = vld [vmem:[%s7964_s7 + $0x128] sm:$0xff] }
 0x54a   : > { %v5886_v53 = vpop.eup %5885  ;;  %v5210_v12 = vpack.c.bf16 %v4755_v42, %v4754_v20 }
 0x54b   : > { %v3661_v13 = vadd.f32 %v5886_v53, %v5884_v22  ;;  %v4756_v22 = vld [vmem:[%s7964_s7 + $0x130] sm:$0xff] }
 0x54d   : > { %4724 = vmatprep.mubr.msk.f32.mxu1 %vm3682_vm6, %v3661_v13  ;;  %v4759_v13 = vld [vmem:[%s7964_s7 + $0x140] sm:$0xff] }
 0x54e   : > { %3783 = vmatmul.mubr.f32.gmra.mrb[106].mxu1 %v3660_v23  ;;  %v4757_v23 = vld [vmem:[%s7964_s7 + $0x138] sm:$0xff]  ;;  %v5216_v54 = vpack.c.bf16 %v4760_v9, %v4759_v13 }
 0x54f   : > { %4850 = vmatprep.mubr.msk.f32.mxu1 %vm5954_vm7, %v7988_v40  ;;  %v5213_v53 = vpack.c.bf16 %v4757_v23, %v4756_v22 }
 0x5ff   : > { %v3764_v0 = vpop.f32.mrb[98].mxu1 }
 0x600   : > { %v3766_v30 = vpop.f32.mrb[99].mxu1 }
 0x609   : > { %v3769_v11 = vpop.f32.mrb[100].mxu1 }
 0x60a   : > { %v3771_v27 = vpop.f32.mrb[101].mxu1  ;;  %4851 = vmatmul.mubr.msk.f32.vlgmr.msra.gmra.mrb[108].mxu1 %vm3809_vm8, %v3769_v11 }
 0x60b   : > { %5172 = vmatpush3.bf16.msra.mxu1 %v5171_v6  ;;  %4873 = vmatprep.mubr.msk.f32.mxu1 %vm5954_vm7, %v7988_v40  ;;  %v4767_v6 = vld [vmem:[%s7964_s7 + $0x180] sm:$0xff] }
 0x60c   : > { %5173 = vmatprep.subr.bf16.mxu1 %v7989_v1  ;;  %v5228_v7 = vpack.c.bf16 %v4768_v43, %v4767_v6 }
 0x60f   : > { %5175 = vmatpush3.bf16.msra.mxu1 %v5174_v8 }
 0x610   : > { %5176 = vmatprep.subr.bf16.mxu1 %v7989_v1 }
 0x611   : > { %v3774_v45 = vpop.f32.mrb[102].mxu1 }
 0x612   : > { %v3776_v4 = vpop.f32.mrb[103].mxu1 }
 0x613   : > { %5178 = vmatpush3.bf16.msra.mxu1 %v5177_v17 }
 0x614   : > { %5179 = vmatprep.subr.bf16.mxu1 %v7989_v1 }
 0x617   : > { %5181 = vmatpush3.bf16.msra.mxu1 %v5180_v39 }
 0x618   : > { %5182 = vmatprep.subr.bf16.mxu1 %v7989_v1 }
 0x619   : > { %v7789_v2 = vpop.f32.mrb[104].mxu1 }
 0x61a   : > { %v3781_v50 = vpop.f32.mrb[105].mxu1 }
 0x61b   : > { %5184 = vmatpush3.bf16.msra.mxu1 %v5183_v10 }
 0x61c   : > { %5185 = vmatprep.subr.bf16.mxu1 %v7989_v1 }
 0x61e   : > { %4874 = vmatmul.mubr.msk.f32.vlgmr.msra.gmra.mrb[110].mxu1 %vm3809_vm8, %v3764_v0  ;;  %v4764_v0 = vld [vmem:[%s7964_s7 + $0x168] sm:$0xff] }
 0x61f   : > { %5187 = vmatpush3.bf16.msra.mxu1 %v5186_v44  ;;  %4896 = vmatprep.mubr.msk.f32.mxu1 %vm5954_vm7, %v7988_v40  ;;  %v5222_v30 = vpack.c.bf16 %v4764_v0, %v4763_v21 }
 0x620   : > { %5188 = vmatprep.subr.bf16.mxu1 %v7989_v1 }
 0x621   : > { %v7808_v57 = vpop.f32.mrb[106].mxu1 }
 0x622   : > { %v3786_v18 = vpop.f32.mrb[107].mxu1 }
 0x623   : > { %5190 = vmatpush3.bf16.msra.mxu1 %v5189_v36 }
 0x624   : > { %5191 = vmatprep.subr.bf16.mxu1 %v7989_v1 }
 0x627   : > { %5193 = vmatpush3.bf16.msra.mxu1 %v5192_v58 }
 0x628   : > { %5194 = vmatprep.subr.bf16.mxu1 %v7989_v1 }
 0x62b   : > { %5196 = vmatpush3.bf16.msra.mxu1 %v5195_v35 }
 0x62c   : > { %5197 = vmatprep.subr.bf16.mxu1 %v7989_v1 }
 0x62f   : > { %5199 = vmatpush3.bf16.msra.mxu1 %v5198_v26 }
 0x630   : > { %5200 = vmatprep.subr.bf16.mxu1 %v7989_v1 }
 0x632   : > { %4897 = vmatmul.mubr.msk.f32.vlgmr.msra.gmra.mrb[112].mxu1 %vm3809_vm8, %v3774_v45 }
 0x633   : > { %5202 = vmatpush3.bf16.msra.mxu1 %v5201_v41  ;;  %4919 = vmatprep.mubr.msk.f32.mxu1 %vm5954_vm7, %v7988_v40 }
 0x634   : > { %5203 = vmatprep.subr.bf16.mxu1 %v7989_v1 }
 0x637   : > { %5205 = vmatpush3.bf16.msra.mxu1 %v5204_v37 }
 0x638   : > { %5206 = vmatprep.subr.bf16.mxu1 %v7989_v1 }
 0x63b   : > { %5208 = vmatpush3.bf16.msra.mxu1 %v5207_v63 }
 0x63c   : > { %5209 = vmatprep.subr.bf16.mxu1 %v7989_v1 }
 0x63f   : > { %5211 = vmatpush3.bf16.msra.mxu1 %v5210_v12 }
 0x640   : > { %5212 = vmatprep.subr.bf16.mxu1 %v7989_v1 }
 0x643   : > { %5214 = vmatpush3.bf16.msra.mxu1 %v5213_v53 }
 0x644   : > { %5215 = vmatprep.subr.bf16.mxu1 %v7989_v1 }
 0x646   : > { %4920 = vmatmul.mubr.msk.f32.vlgmr.msra.gmra.mrb[114].mxu1 %vm3809_vm8, %v7789_v2 }
 0x647   : > { %5217 = vmatpush3.bf16.msra.mxu1 %v5216_v54  ;;  %4942 = vmatprep.mubr.msk.f32.mxu1 %vm5954_vm7, %v7988_v40  ;;  %v4766_v40 = vld [vmem:[%s7964_s7 + $0x178] sm:$0xff] }
 0x648   : > { %5218 = vmatprep.subr.bf16.mxu1 %v7989_v1  ;;  %v5225_v33 = vpack.c.bf16 %v4766_v40, %v4765_v48 }
 0x64b   : > { %5220 = vmatpush3.bf16.msra.mxu1 %v5219_v5 }
 0x64c   : > { %5221 = vmatprep.subr.bf16.mxu1 %v7989_v1 }
 0x64f   : > { %5223 = vmatpush3.bf16.msra.mxu1 %v5222_v30 }
 0x650   : > { %5224 = vmatprep.subr.bf16.mxu1 %v7989_v1 }
 0x653   : > { %5226 = vmatpush3.bf16.msra.mxu1 %v5225_v33 }
 0x654   : > { %5227 = vmatprep.subr.bf16.mxu1 %v7989_v1 }
 0x657   : > { %5229 = vmatpush3.bf16.msra.mxu1 %v5228_v7 }
 0x65a   : > { %4943 = vmatmul.mubr.msk.f32.vlgmr.msra.gmra.mrb[116].mxu1 %vm3809_vm8, %v7808_v57 }
 0x6dd   : > { %v3879_v11 = vpop.f32.mrb[108].mxu1 }
 0x6de   : > { %v4852_v27 = vpop.f32.mrb[109].mxu1 }
 0x6f1   : > { %v3952_v8 = vpop.f32.mrb[110].mxu1 }
 0x6f2   : > { %v3953_v56 = vadd.f32 %v3952_v8, %v3879_v11  ;;  %v4875_v29 = vpop.f32.mrb[111].mxu1 }
 0x705   : > { %v4036_v17 = vpop.f32.mrb[112].mxu1 }
 0x706   : > { %v4040_v19 = vadd.f32 %v4036_v17, %v3953_v56  ;;  %v4898_v16 = vpop.f32.mrb[113].mxu1 }
 0x719   : > { %v4121_v45 = vpop.f32.mrb[114].mxu1 }
 0x71a   : > { %v4125_v4 = vadd.f32 %v4121_v45, %v4040_v19  ;;  %v4921_v39 = vpop.f32.mrb[115].mxu1 }
 0x72d   : > { %v4206_v1 = vpop.f32.mrb[116].mxu1 }
 0x72e   : > { %v4210_v49 = vadd.f32 %v4206_v1, %v4125_v4  ;;  %v4944_v10 = vpop.f32.mrb[117].mxu1 }
 0x730   : > { %v4218_v62 = vadd.f32 %v4770_v15, %v4210_v49 }
 0x732   : > { %4220 = vst.msk [vmem:[%s472_s27] sm:$0xff] %vm4219_vm9, %v4218_v62 }
 0x733   : > { %5900 = shalt.err (!%p5897_p5)
}
 0x734   : > { %s5901_s17 = scalar_lea.hbm %s7913_s21, 128  ;;  %s5905_s27 = scalar_lea.hbm %s7966_s9, 256 }
 0x735   : > { %p5902_p7 = scmp.ne.s32.totalorder %s7913_s21, %s5901_s17  ;;  %p5906_p12 = scmp.lt.u32.totalorder %s7913_s21, %s7966_s9 }
 0x736   : > { %p5907_p13 = scmp.lt.u32.totalorder %s5905_s27, %s5901_s17  ;;  %p5909_p1 = scmp.lt.u32.totalorder %s5901_s17, %s7913_s21 }
 0x737   : > { %p5903_p10 = pnand %p5902_p7, %p6044_p6 }
 0x738   : > { %p5908_p0 = por %p5907_p13, %p5906_p12 }
 0x739   : > { %p5904_p11 = pneg %p5903_p10 }
 0x73a   : > { %p5910_p2 = por %p5909_p1, %p5908_p0 }
 0x73c   : > { %p5911_p3 = pnand %p5910_p2, %p5904_p11 }
 0x73e   : > { %5914 = shalt.err (!%p5911_p3)
}
 0x73f   : > { %5540 = dma.vmem_to_hbm [thread:$0]  (%p6044_p6), %s7915_s28, 128, %s7913_s21, %s4222_s29  }
 0x740 PF: > { %s4247_s22 = sand.u32 1, %s5937_s30   ;;  %p5543_p4 = pnand %p4302_p9, %p6048_p8 }
 0x741   : > { %s4248_s13 = scalar_lea.sflag [#allocation4], %s4247_s22 }
 0x742   : > { %5932 = dma.done.wait (!%p5543_p4), %s4248_s13, 128  }
 0x743   : > { %5934 = vsyncadd (!%p5543_p4), %s4248_s13, 4294967168  ;;  %p19_p5 = scmp.ge.s32.totalorder %s6029_s15, 4   ;;  %s7993_s30 = smov %s5941_s10 }
 0x744   : > { %s7994_s10 = smov %s5945_s11  ;;  %s7995_s11 = smov %s6042_s18 }
 0x745   : > { %s7996_s12 = smov %s6029_s15  ;;  %21 = sbr.rel (!%p19_p5) target bundleno = 3 (0x3), region = 146 }
 0x74c   :  { %4253 = vsyncpa [#allocation4], 1 }
 0x74d   :  { %4255 = vsyncpa [#allocation4 + $0x1], 1 }

</bundles_post_ra>
